<compile_context>
chip_gen: v6e
topology: v6e:2x2x1
jax: 0.10.0
libtpu: 0.0.40
codegen_flags: <defaults>
</compile_context>

<pallas_src>
import math
from functools import partial

import jax
import jax.numpy as jnp
from jax.experimental import pallas as pl
from jax.experimental.pallas import tpu as pltpu


def _round_up(x, m):
    return ((x + m - 1) // m) * m


def _networks_kernel(m_ref, inp_ref, x_ref, o1_ref, o2_ref, mnd_ref,
                     *, T, blk, ragged, compute_dtype):
    i = pl.program_id(0)          # output-row tile (= column tile of M)
    k = pl.program_id(1)          # reduction tile (= row tile of M / input)
    nk = pl.num_programs(1)

    row0 = k * blk                # global row offset of this M tile
    col0 = i * blk                # global col offset of this M tile

    # ---- M_nd tile, computed fully in-register -------------------------------
    # Zero the true diagonal everywhere; on the ragged last k tile also zero the
    # rows >= T (their VMEM contents are unspecified and feed the contraction).
    # Columns >= T only affect output rows >= T, whose writebacks Pallas drops.
    m_blk = m_ref[...]
    r = jax.lax.broadcasted_iota(jnp.int32, (blk, blk), 0) + row0
    c = jax.lax.broadcasted_iota(jnp.int32, (blk, blk), 1) + col0
    keep = r != c
    if ragged:
        keep = jnp.logical_and(keep, r < T)
    m_nd = jnp.where(keep, m_blk, 0.0)

    # Single store per tile; boundary tiles get a masked (partial) writeback.
    mnd_ref[...] = m_nd

    # ---- output1 = M_nd.T @ input, accumulated directly in the f32 out block --
    @pl.when(k == 0)
    def _():
        o1_ref[...] = jnp.zeros_like(o1_ref)

    # Contract the shared row axis directly (no explicit transpose in-kernel).
    o1_ref[...] += jax.lax.dot_general(
        m_nd.astype(compute_dtype), inp_ref[...].astype(compute_dtype),
        dimension_numbers=(((0,), (0,)), ((), ())),
        preferred_element_type=jnp.float32)

    # ---- finalize this row tile: output2 = output1 @ X (always f32) -----------
    @pl.when(k == nk - 1)
    def _():
        o2_ref[...] = jnp.dot(o1_ref[...], x_ref[...],
                              preferred_element_type=jnp.float32)


def _choose_block(T, block):
    """Multiple-of-128 tile; prefer >= 2 row tiles so v7x's 2 TCs both work."""
    t128 = _round_up(max(T, 1), 128)
    blk = min(_round_up(max(block, 128), 128), t128, 1024)
    if (t128 + blk - 1) // blk < 2 and t128 > 128:
        blk = _round_up((t128 + 1) // 2, 128)
    return max(blk, 128)


@partial(jax.jit, static_argnums=(3, 4))
def _networks_forward_impl(M, inp, X, block, compute_dtype):
    T = M.shape[0]
    D = inp.shape[1]
    C = X.shape[1]

    blk = _choose_block(T, block)
    nt = (T + blk - 1) // blk          # grid extent along both i and k
    Dp = _round_up(D, 128)
    Cp = _round_up(C, 128)
    ragged = (T % blk) != 0

    # Pad ONLY the cheap O(T*D) operands (lane-dense columns, genuine-zero rows
    # for the reduction).  The dominant T^2 buffer M is consumed in place.
    inp_p = inp.astype(jnp.float32)
    if (nt * blk != T) or (Dp != D):
        inp_p = jnp.pad(inp_p, ((0, nt * blk - T), (0, Dp - D)))
    X_p = X.astype(jnp.float32)
    if (Dp != D) or (Cp != C):
        X_p = jnp.pad(X_p, ((0, Dp - D), (0, Cp - C)))
    M_f = M.astype(jnp.float32)

    grid = (nt, nt)

    # VMEM budget (double-buffered blocks), capped well under v7x's 64 MiB/TC.
    est = 4 * (2 * blk * blk           # M input blocks
               + 2 * blk * blk         # M_nd output blocks
               + 2 * blk * Dp          # input blocks
               + 2 * Dp * Cp           # X (resident)
               + 2 * blk * Dp          # output1 block (doubles as accumulator)
               + 2 * blk * Cp)         # output2 block
    vmem_limit = int(min(max(2 * est, 32 * 1024 * 1024), 48 * 1024 * 1024))

    out_shapes = (
        jax.ShapeDtypeStruct((T, Dp), jnp.float32),   # output1 (cols padded)
        jax.ShapeDtypeStruct((T, Cp), jnp.float32),   # output2 (cols padded)
        jax.ShapeDtypeStruct((T, T), jnp.float32),    # M - diag(diag(M)), exact shape
    )

    o1_p, o2_p, m_nd = pl.pallas_call(
        partial(_networks_kernel, T=T, blk=blk, ragged=ragged,
                compute_dtype=compute_dtype),
        out_shape=out_shapes,
        grid_spec=pltpu.PrefetchScalarGridSpec(
            num_scalar_prefetch=0,
            grid=grid,
            in_specs=[
                pl.BlockSpec((blk, blk), lambda i, k: (k, i)),   # M tile (rows k, cols i)
                pl.BlockSpec((blk, Dp), lambda i, k: (k, 0)),    # input tile (rows k)
                pl.BlockSpec((Dp, Cp), lambda i, k: (0, 0)),     # X resident in VMEM
            ],
            out_specs=(
                pl.BlockSpec((blk, Dp), lambda i, k: (i, 0)),    # output1 row tile (acc)
                pl.BlockSpec((blk, Cp), lambda i, k: (i, 0)),    # output2 row tile
                pl.BlockSpec((blk, blk), lambda i, k: (k, i)),   # M_nd tile
            ),
        ),
        compiler_params=pltpu.CompilerParams(
            dimension_semantics=("parallel", "arbitrary"),
            vmem_limit_bytes=vmem_limit,
        ),
    )(M_f, inp_p, X_p)

    output1 = o1_p if Dp == D else o1_p[:, :D]
    output2 = o2_p if Cp == C else o2_p[:, :C]
    return output1, output2, X, m_nd


def networks_forward(M, inp, X, *, block=512, compute_dtype=jnp.float32):
    """Pallas implementation of Networks.forward.

    Args:
      M:   (train_num, train_num) f32 parameter.
      inp: (train_num, dim)       f32 input.
      X:   (dim, class_num)       f32 parameter.
      block: row/reduction tile size (rounded to a multiple of 128; 128-256 on
             v5e, 512-1024 on v6e/v7x — it is auto-shrunk so the row-tile grid
             has >= 2 tiles when possible).
      compute_dtype: dtype fed to the MXU for the big contraction (f32
             accumulation and f32 output2 always).
    Returns:
      (output1, output2, X, M - diag(diag(M)))
    """
    return _networks_forward_impl(M, inp, X, block, compute_dtype)


def xavier_uniform(key, shape, dtype=jnp.float32):
    """torch.nn.init.xavier_uniform_ for a 2-D tensor."""
    fan_out, fan_in = shape
    bound = math.sqrt(6.0 / (fan_in + fan_out))
    return jax.random.uniform(key, shape, dtype=dtype, minval=-bound, maxval=bound)


if __name__ == "__main__":
    # Shapes implied by the module (class_num, train_num, dim); train_num > 256
    # so the tiled grid, ragged-boundary masking, diagonal masking and k-axis
    # accumulation paths are all exercised.
    class_num, train_num, dim = 4, 300, 100

    key = jax.random.PRNGKey(0)
    k_x, k_m, k_in = jax.random.split(key, 3)

    X = xavier_uniform(k_x, (dim, class_num))
    M = xavier_uniform(k_m, (train_num, train_num))
    inp = jax.random.normal(k_in, (train_num, dim), dtype=jnp.float32)

    # Pure-JAX reference.
    m_nd_ref = M - jnp.diag(jnp.diag(M))
    o1_ref = jnp.dot(m_nd_ref.T, inp, precision=jax.lax.Precision.HIGHEST)
    o2_ref = jnp.dot(o1_ref, X, precision=jax.lax.Precision.HIGHEST)

    o1, o2, X_out, m_nd = networks_forward(M, inp, X)
    jax.block_until_ready((o1, o2, X_out, m_nd))

    assert o1.shape == (train_num, dim)
    assert o2.shape == (train_num, class_num)
    assert m_nd.shape == (train_num, train_num)
    assert jnp.allclose(m_nd, m_nd_ref, atol=1e-6)
    assert jnp.allclose(o1, o1_ref, rtol=1e-3, atol=1e-3)
    assert jnp.allclose(o2, o2_ref, rtol=1e-3, atol=1e-3)
    assert jnp.allclose(X_out, X)

    print("KERNEL_OK")
</pallas_src>

<mosaic_0001>
module attributes {stable_mosaic.version = 11 : i64} {
  func.func @_networks_kernel(%arg0: i32, %arg1: i32, %arg2: memref<256x256xf32, #tpu.memory_space<vmem>>, %arg3: memref<256x128xf32, #tpu.memory_space<vmem>>, %arg4: memref<128x128xf32, #tpu.memory_space<vmem>>, %arg5: memref<256x128xf32, #tpu.memory_space<vmem>>, %arg6: memref<256x128xf32, #tpu.memory_space<vmem>>, %arg7: memref<256x256xf32, #tpu.memory_space<vmem>>) attributes {dimension_semantics = [#tpu.dimension_semantics<parallel>, #tpu.dimension_semantics<arbitrary>], iteration_bounds = array<i64: 2, 2>, scalar_prefetch = 0 : i64, scratch_operands = 0 : i64, tpu.core_type = #tpu.core_type<tc>, window_params = [{transform_indices = @transform_0, window_bounds = array<i64: 256, 256>}, {transform_indices = @transform_1, window_bounds = array<i64: 256, 128>}, {pipeline_mode = #tpu.pipeline_mode<synchronous>, transform_indices = @transform_2, window_bounds = array<i64: 128, 128>}, {transform_indices = @transform_3, window_bounds = array<i64: 256, 128>}, {transform_indices = @transform_4, window_bounds = array<i64: 256, 128>}, {transform_indices = @transform_5, window_bounds = array<i64: 256, 256>}]} {
    %c256_i32 = arith.constant 256 : i32
    %0 = arith.muli %arg1, %c256_i32 : i32
    %c256_i32_0 = arith.constant 256 : i32
    %1 = arith.muli %arg0, %c256_i32_0 : i32
    %c0 = arith.constant 0 : index
    %c0_1 = arith.constant 0 : index
    %2 = vector.load %arg2[%c0, %c0_1] : memref<256x256xf32, #tpu.memory_space<vmem>>, vector<256x256xf32>
    %3 = tpu.iota {dimensions = array<i32: 0>} : vector<256x256xi32>
    %4 = vector.broadcast %0 : i32 to vector<256x256xi32>
    %5 = arith.addi %3, %4 : vector<256x256xi32>
    %6 = tpu.iota {dimensions = array<i32: 1>} : vector<256x256xi32>
    %7 = vector.broadcast %1 : i32 to vector<256x256xi32>
    %8 = arith.addi %6, %7 : vector<256x256xi32>
    %9 = arith.cmpi ne, %5, %8 : vector<256x256xi32>
    %c300_i32 = arith.constant 300 : i32
    %10 = vector.broadcast %c300_i32 : i32 to vector<256x256xi32>
    %11 = arith.cmpi slt, %5, %10 : vector<256x256xi32>
    %12 = arith.andi %9, %11 : vector<256x256xi1>
    %cst = arith.constant 0.000000e+00 : f32
    %13 = vector.broadcast %cst : f32 to vector<256x256xf32>
    %14 = arith.select %12, %2, %13 : vector<256x256xi1>, vector<256x256xf32>
    %c0_2 = arith.constant 0 : index
    %c0_3 = arith.constant 0 : index
    %15 = vector.load %arg7[%c0_2, %c0_3] : memref<256x256xf32, #tpu.memory_space<vmem>>, vector<256x256xf32>
    tpu.vector_store %arg7[%c0_2, %c0_3], %14 {strides = array<i32>} : memref<256x256xf32, #tpu.memory_space<vmem>>, vector<256x256xf32>,
    %c0_i32 = arith.constant 0 : i32
    %16 = arith.cmpi eq, %arg1, %c0_i32 : i32
    %17 = arith.extui %16 : i1 to i32
    %c0_i32_4 = arith.constant 0 : i32
    %18 = arith.cmpi ne, %17, %c0_i32_4 : i32
    scf.if %18 {
      %cst_13 = arith.constant 0.000000e+00 : f32
      %27 = vector.broadcast %cst_13 : f32 to vector<256x128xf32>
      %c0_14 = arith.constant 0 : index
      %c0_15 = arith.constant 0 : index
      %28 = vector.load %arg5[%c0_14, %c0_15] : memref<256x128xf32, #tpu.memory_space<vmem>>, vector<256x128xf32>
      tpu.vector_store %arg5[%c0_14, %c0_15], %27 {strides = array<i32>} : memref<256x128xf32, #tpu.memory_space<vmem>>, vector<256x128xf32>,
    } else {
    }
    %c0_5 = arith.constant 0 : index
    %c0_6 = arith.constant 0 : index
    %19 = vector.load %arg5[%c0_5, %c0_6] : memref<256x128xf32, #tpu.memory_space<vmem>>, vector<256x128xf32>
    %c0_7 = arith.constant 0 : index
    %c0_8 = arith.constant 0 : index
    %20 = vector.load %arg3[%c0_7, %c0_8] : memref<256x128xf32, #tpu.memory_space<vmem>>, vector<256x128xf32>
    %cst_9 = arith.constant dense<0.000000e+00> : vector<256x128xf32>
    %21 = tpu.matmul %14, %20, %cst_9 {dimension_numbers = #tpu.dot_dimension_numbers<[0], [0], [1], [1], [0, 1, 1, 1], [], []>} : vector<256x256xf32>, vector<256x128xf32>, vector<256x128xf32> -> vector<256x128xf32>
    %22 = arith.addf %19, %21 : vector<256x128xf32>
    %c0_10 = arith.constant 0 : index
    %c0_11 = arith.constant 0 : index
    %23 = vector.load %arg5[%c0_10, %c0_11] : memref<256x128xf32, #tpu.memory_space<vmem>>, vector<256x128xf32>
    tpu.vector_store %arg5[%c0_10, %c0_11], %22 {strides = array<i32>} : memref<256x128xf32, #tpu.memory_space<vmem>>, vector<256x128xf32>,
    %c1_i32 = arith.constant 1 : i32
    %24 = arith.cmpi eq, %arg1, %c1_i32 : i32
    %25 = arith.extui %24 : i1 to i32
    %c0_i32_12 = arith.constant 0 : i32
    %26 = arith.cmpi ne, %25, %c0_i32_12 : i32
    scf.if %26 {
      %c0_13 = arith.constant 0 : index
      %c0_14 = arith.constant 0 : index
      %27 = vector.load %arg5[%c0_13, %c0_14] : memref<256x128xf32, #tpu.memory_space<vmem>>, vector<256x128xf32>
      %c0_15 = arith.constant 0 : index
      %c0_16 = arith.constant 0 : index
      %28 = vector.load %arg4[%c0_15, %c0_16] : memref<128x128xf32, #tpu.memory_space<vmem>>, vector<128x128xf32>
      %cst_17 = arith.constant dense<0.000000e+00> : vector<256x128xf32>
      %29 = tpu.matmul %27, %28, %cst_17 {dimension_numbers = #tpu.dot_dimension_numbers<[1], [0], [0], [1], [0, 0, 1, 1], [], []>} : vector<256x128xf32>, vector<128x128xf32>, vector<256x128xf32> -> vector<256x128xf32>
      %c0_18 = arith.constant 0 : index
      %c0_19 = arith.constant 0 : index
      %30 = vector.load %arg6[%c0_18, %c0_19] : memref<256x128xf32, #tpu.memory_space<vmem>>, vector<256x128xf32>
      tpu.vector_store %arg6[%c0_18, %c0_19], %29 {strides = array<i32>} : memref<256x128xf32, #tpu.memory_space<vmem>>, vector<256x128xf32>,
    } else {
    }
    return
  }
  func.func @transform_0(%arg0: i32, %arg1: i32) -> (i32, i32) {
    %c0_i32 = arith.constant 0 : i32
    return %arg1, %arg0 : i32, i32
  }
  func.func @transform_1(%arg0: i32, %arg1: i32) -> (i32, i32) {
    %c0_i32 = arith.constant 0 : i32
    %c0_i32_0 = arith.constant 0 : i32
    return %arg1, %c0_i32 : i32, i32
  }
  func.func @transform_2(%arg0: i32, %arg1: i32) -> (i32, i32) {
    %c0_i32 = arith.constant 0 : i32
    %c0_i32_0 = arith.constant 0 : i32
    %c0_i32_1 = arith.constant 0 : i32
    return %c0_i32, %c0_i32_0 : i32, i32
  }
  func.func @transform_3(%arg0: i32, %arg1: i32) -> (i32, i32) {
    %c0_i32 = arith.constant 0 : i32
    %c0_i32_0 = arith.constant 0 : i32
    return %arg0, %c0_i32 : i32, i32
  }
  func.func @transform_4(%arg0: i32, %arg1: i32) -> (i32, i32) {
    %c0_i32 = arith.constant 0 : i32
    %c0_i32_0 = arith.constant 0 : i32
    return %arg0, %c0_i32 : i32, i32
  }
  func.func @transform_5(%arg0: i32, %arg1: i32) -> (i32, i32) {
    %c0_i32 = arith.constant 0 : i32
    return %arg1, %arg0 : i32, i32
  }
}

</mosaic_0001>

<bundles_post_ra>
// kernel: _networks_forward_impl.1
= control target key start
LH: loop header
LB: loop body
LE: loop exit
PB: predicated region body
PF: predicated region fallthrough
CT: control target
= control target key end

     0   :  { %s6625_s0 = inlined_call_operand.vmem [shape: f32[300,300], index: 0, kind: input, shape index: {}]   ;;  %s6626_s1 = inlined_call_operand.vmem [shape: f32[512,128], index: 1, kind: input, shape index: {}]   ;;  %s6627_s2 = inlined_call_operand.vmem [shape: f32[128,128], index: 2, kind: input, shape index: {}]   ;;  %s6628_s3 = inlined_call_operand.hbm [shape: f32[300,128], index: 3, kind: output, shape index: {0}]   ;;  %s6629_s4 = inlined_call_operand.vmem [shape: f32[300,128], index: 4, kind: output, shape index: {1}]   ;;  %s6630_s5 = inlined_call_operand.hbm [shape: f32[300,300], index: 5, kind: output, shape index: {2}]  }
   0x1   :  { %6650 = sst [smem:[#allocation29_spill]] %s6625_s0 }
   0x2   :  { %6651 = sst [smem:[#allocation30_spill]] %s6628_s3 }
   0x3   :  { %6652 = sst [smem:[#allocation31_spill]] %s6629_s4 }
   0x4   :  { %6653 = sst [smem:[#allocation32_spill]] %s6630_s5 }
   0x5   :  { %11 = vsyncpa [#allocation4], 0 }
   0x6   :  { %13 = vsyncpa [#allocation4 + $0x1], 0 }
   0x7   :  { %14 = vsyncpa [#allocation7], 0 }
   0x8   :  { %16 = vsyncpa [#allocation7 + $0x1], 0  ;;  %s4691_s18 = smov 0   ;;  %s4693_s19 = smov 0  }
   0x9   :  { %s4695_s20 = smov 0   ;;  %s4697_s21 = smov 0  }
   0xa   :  { %s4699_s22 = smov 0   ;;  %s4701_s23 = smov 0  }
   0xb   :  { %s4703_s24 = smov 0   ;;  %s4705_s25 = smov 0  }
   0xc   :  { %s4707_s26 = smov 0   ;;  %s4709_s27 = smov 0  }
   0xd   :  { %s4711_s28 = smov 0  }
   0xe LB: > { %6654 = sst [smem:[#allocation10_spill]] %s4473_s18  ;;  %s3041_s29 = sadd.s32 4294967295, %s4513_s28   ;;  %s4513_s28 = sphi %s4711_s28, %s22_s28   ;;  %s4509_s27 = sphi %s4709_s27, %s6723_s27   ;;  %s4505_s26 = sphi %s4707_s26, %s6722_s26   ;;  %s4501_s25 = sphi %s4705_s25, %s6721_s25   ;;  %s4497_s24 = sphi %s4703_s24, %s6720_s24   ;;  %s4493_s23 = sphi %s4701_s23, %s6719_s23   ;;  %s4489_s22 = sphi %s4699_s22, %s6727_s22   ;;  %s4485_s21 = sphi %s4697_s21, %s6717_s21   ;;  %s4481_s20 = sphi %s4695_s20, %s6726_s20   ;;  %s4477_s19 = sphi %s4693_s19, %s6725_s19   ;;  %s4473_s18 = sphi %s4691_s18, %s6724_s18  }
   0xf   : > { %6655 = sst [smem:[#allocation11_spill]] %s4477_s19  ;;  %s3042_s30 = sadd.s32 4294967294, %s4513_s28  }
  0x10   : > { %6656 = sst [smem:[#allocation12_spill]] %s4485_s21  ;;  %s31_s6 = sadd.s32 1, %s4505_s26 }
  0x11   : > { %6657 = sst [smem:[#allocation13_spill]] %s4493_s23  ;;  %s34_s7 = sadd.s32 1, %s4509_s27 }
  0x12   : > { %6658 = sst [smem:[#allocation14_spill]] %s4505_s26  ;;  %p32_p0 = scmp.ge.s32.totalorder %s31_s6, 2 }
  0x13   : > { %6659 = sst [smem:[#allocation15_spill]] %s4509_s27  ;;  %s43_s8 = sadd.s32 1, %s4493_s23 }
  0x14   : > { %p50_p1 = scmp.ne.s32.totalorder %s4493_s23, %s4489_s22  ;;  %p51_p2 = scmp.eq.s32.totalorder %s4513_s28, 0 }
  0x15   : > { %s6729_s6 = smov (%p32_p0, %s31_s6), 0  ;;  %s6731_s7 = smov (!%p32_p0, %s34_s7), %s4509_s27 }
  0x16   : > { %6660 = sst [smem:[#allocation16_spill]] %s6729_s6  ;;  %s38_s9 = ssub.s32 %s4505_s26, %s6729_s6 }
  0x17   : > { %p4762_p3 = por %p51_p2, %p50_p1  ;;  %p36_p4 = scmp.ge.s32.totalorder %s6731_s7, 2 }
  0x18   : > { %s116_s11 = sadd.s32 1, %s4485_s21  ;;  %p126_p5 = scmp.ne.s32.totalorder %s4485_s21, %s4481_s20 }
  0x19   : > { %p127_p6 = scmp.eq.s32.totalorder %s3041_s29, 3  ;;  %s6733_s7 = smov (%p36_p4, %s6731_s7), 0 }
  0x1a   : > { %6662 = sst [smem:[#allocation17_spill]] %s6733_s7  ;;  %p132_p8 = scmp.ne.s32.totalorder %s4481_s20, %s4477_s19 }
  0x1b   : > { %p4771_p7 = por %p127_p6, %p126_p5  ;;  %s39_s13 = ssub.s32 %s4509_s27, %s6733_s7 }
  0x1c   : > { %p133_p9 = scmp.eq.s32.totalorder %s3042_s30, 3  ;;  %s40_s14 = sor.u32 %s39_s13, %s38_s9 }
  0x1d   : > { %p114_p10 = scmp.eq.s32.totalorder %s39_s13, 0  ;;  %p41_p11 = scmp.eq.s32.totalorder %s40_s14, 0 }
  0x1e   : > { %p4779_p12 = por %p133_p9, %p132_p8  ;;  %p4792_p13 = por %p127_p6, %p50_p1 }
  0x1f   : > { %s4784_s16 = scalar_select %p114_p10, %s4485_s21, %s116_s11  }
  0x20   : > { %s6664_s15 = scalar_select %p4779_p12, 1, 0 }
  0x21   : > { %6666 = sst [smem:[#allocation19_spill]] %s4784_s16  ;;  %p186_p0 = scmp.ne.s32.totalorder %s4489_s22, %s4473_s18 }
  0x22   : > { %6665 = sst [smem:[#allocation18_spill]] %s6664_s15  ;;  %p3044_p4 = scmp.ge.s32.totalorder %s4513_s28, 4 }
  0x23   : > { %s4787_s17 = scalar_select %p41_p11, %s4493_s23, %s43_s8  }
  0x24   : > { %s6668_s29 = scalar_select %p4792_p13, 1, 0 }
  0x25   : > { %6667 = sst [smem:[#allocation20_spill]] %s4787_s17  ;;  %p4798_p2 = por %p186_p0, %p133_p9 }
  0x26   : > { %6669 = sst [smem:[#allocation21_spill]] %s6668_s29  ;;  %206 = sbr.rel (%p3044_p4) target bundleno = 227 (0xe3), region = 20 }
  0x27   : > { %s6670_s7 = scalar_select %p4798_p2, 1, 0 }
  0x29   : > { %6671 = sst [smem:[#allocation22_spill]] %s6670_s7 }
  0x2b   : > { %209 = sbr.rel (!%p4762_p3) target bundleno = 227 (0xe3), region = 24  ;;  %s211_s30 = sand.u32 (%p4762_p3), 1, %s4493_s23  }
  0x2c   : > { %s3046_s8 = sshll.u32 (%p4762_p3), %s4505_s26, 5  ;;  %s3045_s9 = sshll.u32 (%p4762_p3), %s211_s30, 9 }
  0x2d   : > { %s3047_s11 = sshll.u32 (%p4762_p3), %s4509_s27, 1  ;;  %s216_s13 = ssub.s32 (%p4762_p3), 38, %s3046_s8 }
  0x2e   : > { %p217_p1 = scmp.lt.s32.totalorder (%p4762_p3), %s216_s13, 32  ;;  %s220_s14 = ssub.s32 (%p4762_p3), 3, %s3047_s11 }
  0x2f   : > { %p221_p5 = scmp.lt.s32.totalorder (%p4762_p3), %s220_s14, 2  ;;  %s3387_s6 = smul.u32 (%p4762_p3), 96, %s4505_s26 }
  0x30   : > { %s6735_s13 = smov (!%p217_p1, %s216_s13), 32  ;;  %s6672_s0 = sld [smem:[#allocation29_spill]] }
  0x31   : > { %s6737_s14 = smov (!%p221_p5, %s220_s14), 2  ;;  %s3048_s17 = sshll.u32 %s6735_s13, 7 }
  0x32   : > { %s226_s10 = sadd.s32 %s3387_s6, %s3047_s11  ;;  %s223_s16 = smul.u32 %s3048_s17, %s6737_s14 }
  0x33   : > { %s3051_s21 = sshll.u32 %s226_s10, 3  ;;  %s4817_s30 = sshll.u32 %s6737_s14, 3 }
  0x34   : > { %s4819_s8 = scalar_lea.vmem [#allocation2], %s3045_s9   ;;  %p3053_p3 = scmp.eq.s32.totalorder %s223_s16, 0 }
  0x35   : > { %p233_p6 = scmp.lt.u32.totalorder (!%p3053_p3), %s4817_s30, 8 }
  0x36   : > { %s4815_s23 = scalar_lea.vmem %s6672_s0, %s3051_s21   ;;  %232 = sbr.rel (%p3053_p3) target bundleno = 227 (0xe3), region = 28 }
  0x3b   : > { %236 = sbr.rel (%p233_p6) target bundleno = 167 (0xa7), region = 32  ;;  %s4823_s27 = sand.u32 (!%p233_p6), 7, %s4817_s30  }
  0x3c   : > { %p349_p8 = scmp.eq.s32.totalorder (!%p233_p6), %s4823_s27, 0  ;;  %p3054_p9 = scmp.ne.s32.totalorder (!%p233_p6), %s4823_s27, 0 }
  0x40   : > { %352 = sbr.rel (%p3054_p9) target bundleno = 87 (0x57), region = 54  ;;  %s353_s18 = sshrl.u32 (!%p3054_p9), %s4817_s30, 3 }
  0x41   : > { %s355_s21 = sshrl.u32 (!%p3054_p9), %s353_s18, 2  ;;  %s4828_s6 = sand.u32 (!%p3054_p9), 3, %s353_s18  }
  0x42   : > { %s3152_s7 = sshll.u32 (!%p3054_p9), %s355_s21, 9  ;;  %s4832_s17 = smul.u32 (!%p3054_p9), %s4828_s6, %s6735_s13 }
  0x43   : > { %s560_s16 = sshra.s32 (!%p3054_p9), %s3152_s7, 4 }
  0x44   : > { %s4835_s9 = scalar_lea.vmem (!%p3054_p9), %s4815_s23, %s560_s16   ;;  %s4838_s11 = scalar_lea.vmem (!%p3054_p9), %s4819_s8, %s560_s16 [#allocation2]  }
  0x45   : > { %p3069_p10 = scmp.le.s32.totalorder %s4832_s17, 0 }
  0x46   : > { %s6673_s14 = smov (!%p3069_p10), %s4838_s11  ;;  %s6674_s10 = smov (!%p3069_p10), %s4835_s9 }
  0x47   : > { %2839 = sbr.rel (%p3069_p10) target bundleno = 87 (0x57), region = 312  ;;  %s4847_s18 = smov (!%p3069_p10), 0  }
  0x48   : > { %s4849_s0 = smov (!%p3069_p10), 0   ;;  %s4851_s21 = smov (!%p3069_p10), 0  }
  0x4c LB: >> { %v578_v0 = vld [vmem:[%s4521_s10] sm:$0xff]  ;;  %s580_s7 = sadd.s32 1, %s4525_s18  ;;  %s583_s16 = sadd.s32 1, %s4529_s0  ;;  %s4533_s21 = sphi %s4851_s21, %s571_s21   ;;  %s4529_s0 = sphi %s4849_s0, %s6676_s0   ;;  %s4525_s18 = sphi %s4847_s18, %s6675_s18   ;;  %s4521_s10 = sphi %s6674_s10, %s593_s10   ;;  %s4517_s14 = sphi %s6673_s14, %s594_s14  }
  0x4d   : >> { %579 = vst [vmem:[%s4517_s14] sm:$0xff] %v578_v0  ;;  %p581_p11 = scmp.ge.s32.totalorder %s580_s7, %s4828_s6  ;;  %s571_s21 = sadd.s32 1, %s4533_s21  }
  0x4e   : >> { %p570_p4 = scmp.ge.s32.totalorder %s571_s21, %s4832_s17 }
  0x4f   : >> { %s6739_s7 = smov (%p581_p11, %s580_s7), 0  ;;  %s6741_s16 = smov (!%p581_p11, %s583_s16), %s4529_s0 }
  0x50   : >> { %p585_p0 = scmp.ge.s32.totalorder %s6741_s16, %s6735_s13  ;;  %s3070_s26 = sshll.u32 %s6739_s7, 3 }
  0x51   : >> { %s6675_s18 = smov %s6739_s7 }
  0x52   : >> { %s6743_s16 = smov (%p585_p0, %s6741_s16), 0  ;;  %573 = sbr.rel (!%p570_p4) target bundleno = 76 (0x4c), region = 318 }
  0x53   : >> { %s587_s15 = smul.u32 24, %s6743_s16  ;;  %s3071_s19 = sshll.u32 %s6743_s16, 4 }
  0x54   : >> { %s592_s5 = sadd.s32 %s3071_s19, %s3070_s26  ;;  %s6676_s0 = smov %s6743_s16 }
  0x55   : >> { %s589_s29 = sadd.s32 %s3070_s26, %s587_s15  ;;  %s594_s14 = scalar_lea.vmem %s4838_s11, %s592_s5 [#allocation2]  }
  0x56   : >> { %s593_s10 = scalar_lea.vmem %s4835_s9, %s589_s29  }
  0x57 PF: > { %597 = sbr.rel (%p349_p8) target bundleno = 167 (0xa7), region = 79  ;;  %s599_s5 = ssub.s32 (!%p349_p8), %s4817_s30, %s4823_s27 }
  0x58   : > { %s603_s19 = sshrl.u32 (!%p349_p8), %s4817_s30, 3  ;;  %s4879_s26 = scalar_lea.vmem (!%p349_p8), %s4815_s23, %s599_s5  }
  0x59   : > { %s4882_s15 = scalar_lea.vmem (!%p349_p8), %s4819_s8, %s599_s5 [#allocation2]   ;;  %s605_s29 = sshrl.u32 (!%p349_p8), %s603_s19, 2 }
  0x5a   : > { %s4884_s0 = sand.u32 (!%p349_p8), 3, %s603_s19   ;;  %s3155_s6 = sshll.u32 (!%p349_p8), %s605_s29, 9 }
  0x5b   : > { %s810_s17 = sshra.s32 (!%p349_p8), %s3155_s6, 4  ;;  %s4888_s9 = smul.u32 (!%p349_p8), %s4884_s0, %s6735_s13 }
  0x5c   : > { %s4891_s11 = scalar_lea.vmem %s4815_s23, %s810_s17   ;;  %s4894_s14 = scalar_lea.vmem %s4819_s8, %s810_s17 [#allocation2]  }
  0x5d   : > { %p3087_p1 = scmp.le.s32.totalorder %s4888_s9, 0 }
  0x5e   : > { %s6677_s10 = smov (!%p3087_p1), %s4894_s14  ;;  %s6678_s18 = smov (!%p3087_p1), %s4891_s11 }
  0x5f   : > { %2890 = sbr.rel (%p3087_p1) target bundleno = 111 (0x6f), region = 345  ;;  %s4903_s21 = smov (!%p3087_p1), 0  }
  0x60   : > { %s4905_s7 = smov (!%p3087_p1), 0   ;;  %s4907_s16 = smov (!%p3087_p1), 0  }
  0x64 LB: >> { %v828_v1 = vld [vmem:[%s4541_s18] sm:$0xff]  ;;  %s830_s5 = sadd.s32 1, %s4545_s21  ;;  %s833_s19 = sadd.s32 1, %s4549_s7  ;;  %s4553_s16 = sphi %s4907_s16, %s821_s16   ;;  %s4549_s7 = sphi %s4905_s7, %s6680_s7   ;;  %s4545_s21 = sphi %s4903_s21, %s6679_s21   ;;  %s4541_s18 = sphi %s6678_s18, %s843_s18   ;;  %s4537_s10 = sphi %s6677_s10, %s844_s10  }
  0x65   : >> { %829 = vst [vmem:[%s4537_s10] sm:$0xff] %v828_v1  ;;  %p831_p5 = scmp.ge.s32.totalorder %s830_s5, %s4884_s0  ;;  %s821_s16 = sadd.s32 1, %s4553_s16  }
  0x66   : >> { %p820_p6 = scmp.ge.s32.totalorder %s821_s16, %s4888_s9 }
  0x67   : >> { %s6745_s5 = smov (%p831_p5, %s830_s5), 0  ;;  %s6747_s19 = smov (!%p831_p5, %s833_s19), %s4549_s7 }
  0x68   : >> { %p835_p3 = scmp.ge.s32.totalorder %s6747_s19, %s6735_s13  ;;  %s3088_s29 = sshll.u32 %s6745_s5, 3 }
  0x69   : >> { %s6679_s21 = smov %s6745_s5 }
  0x6a   : >> { %s6749_s19 = smov (%p835_p3, %s6747_s19), 0  ;;  %823 = sbr.rel (!%p820_p6) target bundleno = 100 (0x64), region = 351 }
  0x6b   : >> { %s837_s6 = smul.u32 24, %s6749_s19  ;;  %s3089_s17 = sshll.u32 %s6749_s19, 4 }
  0x6c   : >> { %s842_s4 = sadd.s32 %s3089_s17, %s3088_s29  ;;  %s6680_s7 = smov %s6749_s19 }
  0x6d   : >> { %s839_s3 = sadd.s32 %s3088_s29, %s837_s6  ;;  %s844_s10 = scalar_lea.vmem %s4894_s14, %s842_s4 [#allocation2]  }
  0x6e   : >> { %s843_s18 = scalar_lea.vmem %s4891_s11, %s839_s3  }
  0x6f PF: > { %s4930_s29 = sshrl.u32 %s6735_s13, 5  ;;  %s4651_s3 = smov 1  }
  0x70   : > { %s845_s4 = sshll.u32 %s4651_s3, %s4823_s27  ;;  %p3092_p8 = scmp.le.s32.totalorder %s4930_s29, 0 }
  0x71   : > { %s4933_s6 = sadd.s32 4294967295, %s845_s4  ;;  %s6681_s5 = smov (!%p3092_p8), %s4882_s15 }
  0x72   : > { %2906 = sbr.rel (%p3092_p8) target bundleno = 151 (0x97), region = 356  ;;  %s6682_s19 = smov (!%p3092_p8), %s4879_s26 }
  0x73   : > { %s4942_s16 = smov (!%p3092_p8), 0   ;;  %s4944_s0 = smov (!%p3092_p8), 0  }
  0x77 LB: >> { %v857_v2 = vld [vmem:[%s4561_s19] sm:%s4933_s6]  ;;  %v859_v3 = vld [vmem:[%s4561_s19 + $0x18] sm:%s4933_s6]  ;;  %s921_s27 = sadd.s32 1, %s4565_s16  ;;  %s851_s0 = sadd.s32 1, %s4569_s0   ;;  %s4569_s0 = sphi %s4944_s0, %s851_s0   ;;  %s4565_s16 = sphi %s4942_s16, %s6685_s16   ;;  %s4561_s19 = sphi %s6682_s19, %s6684_s19   ;;  %s4557_s5 = sphi %s6681_s5, %s6683_s5  }
  0x78   : >> { %858 = vst [vmem:[%s4557_s5] sm:%s4933_s6] %v857_v2  ;;  %860 = vst [vmem:[%s4557_s5 + $0x10] sm:%s4933_s6] %v859_v3  ;;  %p922_p9 = scmp.ge.s32.totalorder %s921_s27, %s4930_s29  ;;  %p850_p10 = scmp.ge.s32.totalorder %s851_s0, %s4930_s29 }
  0x79   : >> { %v861_v4 = vld [vmem:[%s4561_s19 + $0x30] sm:%s4933_s6]  ;;  %v863_v5 = vld [vmem:[%s4561_s19 + $0x48] sm:%s4933_s6] }
  0x7a   : >> { %862 = vst [vmem:[%s4557_s5 + $0x20] sm:%s4933_s6] %v861_v4  ;;  %864 = vst [vmem:[%s4557_s5 + $0x30] sm:%s4933_s6] %v863_v5  ;;  %s6751_s27 = smov (%p922_p9, %s921_s27), 0 }
  0x7b   : >> { %v865_v6 = vld [vmem:[%s4561_s19 + $0x60] sm:%s4933_s6]  ;;  %v867_v7 = vld [vmem:[%s4561_s19 + $0x78] sm:%s4933_s6]  ;;  %s924_s9 = smul.u32 768, %s6751_s27  ;;  %s3093_s11 = sshll.u32 %s6751_s27, 9 }
  0x7c   : >> { %866 = vst [vmem:[%s4557_s5 + $0x40] sm:%s4933_s6] %v865_v6  ;;  %868 = vst [vmem:[%s4557_s5 + $0x50] sm:%s4933_s6] %v867_v7  ;;  %s5014_s14 = scalar_lea.vmem %s4882_s15, %s3093_s11 [#allocation2]   ;;  %s6685_s16 = smov %s6751_s27 }
  0x7d   : >> { %v869_v8 = vld [vmem:[%s4561_s19 + $0x90] sm:%s4933_s6]  ;;  %v871_v9 = vld [vmem:[%s4561_s19 + $0xa8] sm:%s4933_s6]  ;;  %s5025_s10 = scalar_lea.vmem %s4879_s26, %s924_s9  }
  0x7e   : >> { %870 = vst [vmem:[%s4557_s5 + $0x60] sm:%s4933_s6] %v869_v8  ;;  %872 = vst [vmem:[%s4557_s5 + $0x70] sm:%s4933_s6] %v871_v9 }
  0x7f   : >> { %v873_v10 = vld [vmem:[%s4561_s19 + $0xc0] sm:%s4933_s6]  ;;  %v875_v11 = vld [vmem:[%s4561_s19 + $0xd8] sm:%s4933_s6] }
  0x80   : >> { %874 = vst [vmem:[%s4557_s5 + $0x80] sm:%s4933_s6] %v873_v10  ;;  %876 = vst [vmem:[%s4557_s5 + $0x90] sm:%s4933_s6] %v875_v11 }
  0x81   : >> { %v877_v12 = vld [vmem:[%s4561_s19 + $0xf0] sm:%s4933_s6]  ;;  %v879_v13 = vld [vmem:[%s4561_s19 + $0x108] sm:%s4933_s6] }
  0x82   : >> { %878 = vst [vmem:[%s4557_s5 + $0xa0] sm:%s4933_s6] %v877_v12  ;;  %880 = vst [vmem:[%s4557_s5 + $0xb0] sm:%s4933_s6] %v879_v13 }
  0x83   : >> { %v881_v14 = vld [vmem:[%s4561_s19 + $0x120] sm:%s4933_s6]  ;;  %v883_v15 = vld [vmem:[%s4561_s19 + $0x138] sm:%s4933_s6] }
  0x84   : >> { %882 = vst [vmem:[%s4557_s5 + $0xc0] sm:%s4933_s6] %v881_v14  ;;  %884 = vst [vmem:[%s4557_s5 + $0xd0] sm:%s4933_s6] %v883_v15 }
  0x85   : >> { %v885_v16 = vld [vmem:[%s4561_s19 + $0x150] sm:%s4933_s6]  ;;  %v887_v17 = vld [vmem:[%s4561_s19 + $0x168] sm:%s4933_s6] }
  0x86   : >> { %886 = vst [vmem:[%s4557_s5 + $0xe0] sm:%s4933_s6] %v885_v16  ;;  %888 = vst [vmem:[%s4557_s5 + $0xf0] sm:%s4933_s6] %v887_v17 }
  0x87   : >> { %v889_v18 = vld [vmem:[%s4561_s19 + $0x180] sm:%s4933_s6]  ;;  %v891_v19 = vld [vmem:[%s4561_s19 + $0x198] sm:%s4933_s6] }
  0x88   : >> { %890 = vst [vmem:[%s4557_s5 + $0x100] sm:%s4933_s6] %v889_v18  ;;  %892 = vst [vmem:[%s4557_s5 + $0x110] sm:%s4933_s6] %v891_v19 }
  0x89   : >> { %v893_v20 = vld [vmem:[%s4561_s19 + $0x1b0] sm:%s4933_s6]  ;;  %v895_v21 = vld [vmem:[%s4561_s19 + $0x1c8] sm:%s4933_s6] }
  0x8a   : >> { %894 = vst [vmem:[%s4557_s5 + $0x120] sm:%s4933_s6] %v893_v20  ;;  %896 = vst [vmem:[%s4557_s5 + $0x130] sm:%s4933_s6] %v895_v21 }
  0x8b   : >> { %v897_v22 = vld [vmem:[%s4561_s19 + $0x1e0] sm:%s4933_s6]  ;;  %v899_v23 = vld [vmem:[%s4561_s19 + $0x1f8] sm:%s4933_s6] }
  0x8c   : >> { %898 = vst [vmem:[%s4557_s5 + $0x140] sm:%s4933_s6] %v897_v22  ;;  %900 = vst [vmem:[%s4557_s5 + $0x150] sm:%s4933_s6] %v899_v23 }
  0x8d   : >> { %v901_v24 = vld [vmem:[%s4561_s19 + $0x210] sm:%s4933_s6]  ;;  %v903_v25 = vld [vmem:[%s4561_s19 + $0x228] sm:%s4933_s6] }
  0x8e   : >> { %902 = vst [vmem:[%s4557_s5 + $0x160] sm:%s4933_s6] %v901_v24  ;;  %904 = vst [vmem:[%s4557_s5 + $0x170] sm:%s4933_s6] %v903_v25 }
  0x8f   : >> { %v905_v26 = vld [vmem:[%s4561_s19 + $0x240] sm:%s4933_s6]  ;;  %v907_v27 = vld [vmem:[%s4561_s19 + $0x258] sm:%s4933_s6] }
  0x90   : >> { %906 = vst [vmem:[%s4557_s5 + $0x180] sm:%s4933_s6] %v905_v26  ;;  %908 = vst [vmem:[%s4557_s5 + $0x190] sm:%s4933_s6] %v907_v27 }
  0x91   : >> { %v909_v28 = vld [vmem:[%s4561_s19 + $0x270] sm:%s4933_s6]  ;;  %v911_v29 = vld [vmem:[%s4561_s19 + $0x288] sm:%s4933_s6] }
  0x92   : >> { %910 = vst [vmem:[%s4557_s5 + $0x1a0] sm:%s4933_s6] %v909_v28  ;;  %912 = vst [vmem:[%s4557_s5 + $0x1b0] sm:%s4933_s6] %v911_v29  ;;  %853 = sbr.rel (!%p850_p10) target bundleno = 119 (0x77), region = 362 }
  0x93   : >> { %v913_v30 = vld [vmem:[%s4561_s19 + $0x2a0] sm:%s4933_s6]  ;;  %v915_v31 = vld [vmem:[%s4561_s19 + $0x2b8] sm:%s4933_s6] }
  0x94   : >> { %914 = vst [vmem:[%s4557_s5 + $0x1c0] sm:%s4933_s6] %v913_v30  ;;  %916 = vst [vmem:[%s4557_s5 + $0x1d0] sm:%s4933_s6] %v915_v31 }
  0x95   : >> { %v917_v32 = vld [vmem:[%s4561_s19 + $0x2d0] sm:%s4933_s6]  ;;  %v919_v33 = vld [vmem:[%s4561_s19 + $0x2e8] sm:%s4933_s6]  ;;  %s6684_s19 = smov %s5025_s10 }
  0x96   : >> { %918 = vst [vmem:[%s4557_s5 + $0x1e0] sm:%s4933_s6] %v917_v32  ;;  %920 = vst [vmem:[%s4557_s5 + $0x1f0] sm:%s4933_s6] %v919_v33  ;;  %s6683_s5 = smov %s5014_s14 }
  0x97 PF: > { %s5109_s18 = sand.u32 31, %s6735_s13   ;;  %s3095_s21 = smul.u32 768, %s4930_s29 }
  0x98   : > { %s3157_s7 = sshll.u32 %s4930_s29, 9  ;;  %p3097_p11 = scmp.le.s32.totalorder %s5109_s18, 0 }
  0x99   : > { %s932_s17 = scalar_lea.vmem %s4879_s26, %s3095_s21   ;;  %s934_s3 = scalar_lea.vmem %s4882_s15, %s3157_s7 [#allocation2]  }
  0x9a   : > { %2920 = sbr.rel (%p3097_p11) target bundleno = 167 (0xa7), region = 367  ;;  %s4571_s4 = smov (!%p3097_p11), %s934_s3  }
  0x9b   : > { %s4575_s27 = smov (!%p3097_p11), %s932_s17   ;;  %s4579_s9 = smov (!%p3097_p11), 0  }
  0x9c   : > { %s4583_s0 = smov (!%p3097_p11), 0  }
  0x9f LB: >> { %v944_v34 = vld [vmem:[%s4577_s27] sm:%s4933_s6]  ;;  %s946_s29 = sadd.s32 1, %s4581_s9  ;;  %s938_s0 = sadd.s32 1, %s4585_s0   ;;  %s4585_s0 = sphi %s4583_s0, %s938_s0   ;;  %s4581_s9 = sphi %s4579_s9, %s4580_s9   ;;  %s4577_s27 = sphi %s4575_s27, %s951_s27   ;;  %s4573_s4 = sphi %s4571_s4, %s952_s4  }
  0xa0   : >> { %945 = vst [vmem:[%s4573_s4] sm:%s4933_s6] %v944_v34  ;;  %p947_p0 = scmp.ge.s32.totalorder %s946_s29, %s5109_s18  ;;  %p937_p4 = scmp.ge.s32.totalorder %s938_s0, %s5109_s18 }
  0xa2   : >> { %s6753_s29 = smov (%p947_p0, %s946_s29), 0  ;;  %940 = sbr.rel (!%p937_p4) target bundleno = 159 (0x9f), region = 373 }
  0xa3   : >> { %s949_s26 = smul.u32 24, %s6753_s29  ;;  %s3098_s15 = sshll.u32 %s6753_s29, 4 }
  0xa4   : >> { %s952_s4 = scalar_lea.vmem %s934_s3, %s3098_s15 [#allocation2]   ;;  %s4580_s9 = smov %s6753_s29  }
  0xa5   : >> { %s951_s27 = scalar_lea.vmem %s932_s17, %s949_s26  }
  0xa7 PF: > { %p3099_p1 = scmp.ge.u32.totalorder %s4817_s30, 8 }
  0xa8   : > { %s5122_s5 = sshrl.u32 (!%p3099_p1), %s6735_s13, 5  ;;  %s4652_s19 = smov (!%p3099_p1), 1  }
  0xa9   : > { %239 = sbr.rel (%p3099_p1) target bundleno = 227 (0xe3), region = 36  ;;  %s240_s16 = sshll.u32 (!%p3099_p1), %s4652_s19, %s4817_s30 }
  0xaa   : > { %s5125_s11 = sadd.s32 (!%p3099_p1), 4294967295, %s240_s16  ;;  %p3101_p5 = scmp.le.s32.totalorder (!%p3099_p1), %s5122_s5, 0 }
  0xae   : > { %2934 = sbr.rel (%p3101_p5) target bundleno = 211 (0xd3), region = 378  ;;  %s6686_s6 = smov (!%p3101_p5), %s4819_s8 }
  0xaf   : > { %s6687_s14 = smov (!%p3101_p5), %s4815_s23  ;;  %s5134_s10 = smov (!%p3101_p5), 0  }
  0xb0   : > { %s5136_s18 = smov (!%p3101_p5), 0  }
  0xb3 LB: >> { %v252_v35 = vld [vmem:[%s4593_s14] sm:%s5125_s11]  ;;  %v254_v36 = vld [vmem:[%s4593_s14 + $0x18] sm:%s5125_s11]  ;;  %s316_s30 = sadd.s32 1, %s4597_s10  ;;  %s246_s18 = sadd.s32 1, %s4601_s18   ;;  %s4601_s18 = sphi %s5136_s18, %s246_s18   ;;  %s4597_s10 = sphi %s5134_s10, %s6690_s10   ;;  %s4593_s14 = sphi %s6687_s14, %s6689_s14   ;;  %s4589_s6 = sphi %s6686_s6, %s6688_s6  }
  0xb4   : >> { %253 = vst [vmem:[%s4589_s6] sm:%s5125_s11] %v252_v35  ;;  %255 = vst [vmem:[%s4589_s6 + $0x10] sm:%s5125_s11] %v254_v36  ;;  %p317_p3 = scmp.ge.s32.totalorder %s316_s30, %s5122_s5  ;;  %p245_p6 = scmp.ge.s32.totalorder %s246_s18, %s5122_s5 }
  0xb5   : >> { %v256_v37 = vld [vmem:[%s4593_s14 + $0x30] sm:%s5125_s11]  ;;  %v258_v38 = vld [vmem:[%s4593_s14 + $0x48] sm:%s5125_s11] }
  0xb6   : >> { %257 = vst [vmem:[%s4589_s6 + $0x20] sm:%s5125_s11] %v256_v37  ;;  %259 = vst [vmem:[%s4589_s6 + $0x30] sm:%s5125_s11] %v258_v38  ;;  %s6755_s30 = smov (%p317_p3, %s316_s30), 0 }
  0xb7   : >> { %v260_v39 = vld [vmem:[%s4593_s14 + $0x60] sm:%s5125_s11]  ;;  %v262_v40 = vld [vmem:[%s4593_s14 + $0x78] sm:%s5125_s11]  ;;  %s319_s21 = smul.u32 768, %s6755_s30  ;;  %s3102_s7 = sshll.u32 %s6755_s30, 9 }
  0xb8   : >> { %261 = vst [vmem:[%s4589_s6 + $0x40] sm:%s5125_s11] %v260_v39  ;;  %263 = vst [vmem:[%s4589_s6 + $0x50] sm:%s5125_s11] %v262_v40  ;;  %s5206_s17 = scalar_lea.vmem %s4819_s8, %s3102_s7 [#allocation2]   ;;  %s6690_s10 = smov %s6755_s30 }
  0xb9   : >> { %v264_v41 = vld [vmem:[%s4593_s14 + $0x90] sm:%s5125_s11]  ;;  %v266_v42 = vld [vmem:[%s4593_s14 + $0xa8] sm:%s5125_s11]  ;;  %s5217_s3 = scalar_lea.vmem %s4815_s23, %s319_s21  }
  0xba   : >> { %265 = vst [vmem:[%s4589_s6 + $0x60] sm:%s5125_s11] %v264_v41  ;;  %267 = vst [vmem:[%s4589_s6 + $0x70] sm:%s5125_s11] %v266_v42 }
  0xbb   : >> { %v268_v43 = vld [vmem:[%s4593_s14 + $0xc0] sm:%s5125_s11]  ;;  %v270_v44 = vld [vmem:[%s4593_s14 + $0xd8] sm:%s5125_s11] }
  0xbc   : >> { %269 = vst [vmem:[%s4589_s6 + $0x80] sm:%s5125_s11] %v268_v43  ;;  %271 = vst [vmem:[%s4589_s6 + $0x90] sm:%s5125_s11] %v270_v44 }
  0xbd   : >> { %v272_v45 = vld [vmem:[%s4593_s14 + $0xf0] sm:%s5125_s11]  ;;  %v274_v46 = vld [vmem:[%s4593_s14 + $0x108] sm:%s5125_s11] }
  0xbe   : >> { %273 = vst [vmem:[%s4589_s6 + $0xa0] sm:%s5125_s11] %v272_v45  ;;  %275 = vst [vmem:[%s4589_s6 + $0xb0] sm:%s5125_s11] %v274_v46 }
  0xbf   : >> { %v276_v47 = vld [vmem:[%s4593_s14 + $0x120] sm:%s5125_s11]  ;;  %v278_v48 = vld [vmem:[%s4593_s14 + $0x138] sm:%s5125_s11] }
  0xc0   : >> { %277 = vst [vmem:[%s4589_s6 + $0xc0] sm:%s5125_s11] %v276_v47  ;;  %279 = vst [vmem:[%s4589_s6 + $0xd0] sm:%s5125_s11] %v278_v48 }
  0xc1   : >> { %v280_v49 = vld [vmem:[%s4593_s14 + $0x150] sm:%s5125_s11]  ;;  %v282_v50 = vld [vmem:[%s4593_s14 + $0x168] sm:%s5125_s11] }
  0xc2   : >> { %281 = vst [vmem:[%s4589_s6 + $0xe0] sm:%s5125_s11] %v280_v49  ;;  %283 = vst [vmem:[%s4589_s6 + $0xf0] sm:%s5125_s11] %v282_v50 }
  0xc3   : >> { %v284_v51 = vld [vmem:[%s4593_s14 + $0x180] sm:%s5125_s11]  ;;  %v286_v52 = vld [vmem:[%s4593_s14 + $0x198] sm:%s5125_s11] }
  0xc4   : >> { %285 = vst [vmem:[%s4589_s6 + $0x100] sm:%s5125_s11] %v284_v51  ;;  %287 = vst [vmem:[%s4589_s6 + $0x110] sm:%s5125_s11] %v286_v52 }
  0xc5   : >> { %v288_v53 = vld [vmem:[%s4593_s14 + $0x1b0] sm:%s5125_s11]  ;;  %v290_v54 = vld [vmem:[%s4593_s14 + $0x1c8] sm:%s5125_s11] }
  0xc6   : >> { %289 = vst [vmem:[%s4589_s6 + $0x120] sm:%s5125_s11] %v288_v53  ;;  %291 = vst [vmem:[%s4589_s6 + $0x130] sm:%s5125_s11] %v290_v54 }
  0xc7   : >> { %v292_v55 = vld [vmem:[%s4593_s14 + $0x1e0] sm:%s5125_s11]  ;;  %v294_v56 = vld [vmem:[%s4593_s14 + $0x1f8] sm:%s5125_s11] }
  0xc8   : >> { %293 = vst [vmem:[%s4589_s6 + $0x140] sm:%s5125_s11] %v292_v55  ;;  %295 = vst [vmem:[%s4589_s6 + $0x150] sm:%s5125_s11] %v294_v56 }
  0xc9   : >> { %v296_v57 = vld [vmem:[%s4593_s14 + $0x210] sm:%s5125_s11]  ;;  %v298_v58 = vld [vmem:[%s4593_s14 + $0x228] sm:%s5125_s11] }
  0xca   : >> { %297 = vst [vmem:[%s4589_s6 + $0x160] sm:%s5125_s11] %v296_v57  ;;  %299 = vst [vmem:[%s4589_s6 + $0x170] sm:%s5125_s11] %v298_v58 }
  0xcb   : >> { %v300_v59 = vld [vmem:[%s4593_s14 + $0x240] sm:%s5125_s11]  ;;  %v302_v60 = vld [vmem:[%s4593_s14 + $0x258] sm:%s5125_s11] }
  0xcc   : >> { %301 = vst [vmem:[%s4589_s6 + $0x180] sm:%s5125_s11] %v300_v59  ;;  %303 = vst [vmem:[%s4589_s6 + $0x190] sm:%s5125_s11] %v302_v60 }
  0xcd   : >> { %v304_v61 = vld [vmem:[%s4593_s14 + $0x270] sm:%s5125_s11]  ;;  %v306_v62 = vld [vmem:[%s4593_s14 + $0x288] sm:%s5125_s11] }
  0xce   : >> { %305 = vst [vmem:[%s4589_s6 + $0x1a0] sm:%s5125_s11] %v304_v61  ;;  %307 = vst [vmem:[%s4589_s6 + $0x1b0] sm:%s5125_s11] %v306_v62  ;;  %248 = sbr.rel (!%p245_p6) target bundleno = 179 (0xb3), region = 384 }
  0xcf   : >> { %v308_v63 = vld [vmem:[%s4593_s14 + $0x2a0] sm:%s5125_s11]  ;;  %v310_v0 = vld [vmem:[%s4593_s14 + $0x2b8] sm:%s5125_s11] }
  0xd0   : >> { %309 = vst [vmem:[%s4589_s6 + $0x1c0] sm:%s5125_s11] %v308_v63  ;;  %311 = vst [vmem:[%s4589_s6 + $0x1d0] sm:%s5125_s11] %v310_v0 }
  0xd1   : >> { %v312_v1 = vld [vmem:[%s4593_s14 + $0x2d0] sm:%s5125_s11]  ;;  %v314_v2 = vld [vmem:[%s4593_s14 + $0x2e8] sm:%s5125_s11]  ;;  %s6689_s14 = smov %s5217_s3 }
  0xd2   : >> { %313 = vst [vmem:[%s4589_s6 + $0x1e0] sm:%s5125_s11] %v312_v1  ;;  %315 = vst [vmem:[%s4589_s6 + $0x1f0] sm:%s5125_s11] %v314_v2  ;;  %s6688_s6 = smov %s5206_s17 }
  0xd3 PF: > { %s5301_s4 = sand.u32 31, %s6735_s13   ;;  %s3104_s27 = smul.u32 768, %s5122_s5 }
  0xd4   : > { %s3158_s9 = sshll.u32 %s5122_s5, 9  ;;  %p3106_p8 = scmp.le.s32.totalorder %s5301_s4, 0 }
  0xd5   : > { %s327_s0 = scalar_lea.vmem %s4815_s23, %s3104_s27   ;;  %s329_s29 = scalar_lea.vmem %s4819_s8, %s3158_s9 [#allocation2]  }
  0xd6   : > { %2948 = sbr.rel (%p3106_p8) target bundleno = 227 (0xe3), region = 389  ;;  %s4603_s26 = smov (!%p3106_p8), %s329_s29  }
  0xd7   : > { %s4607_s15 = smov (!%p3106_p8), %s327_s0   ;;  %s4611_s19 = smov (!%p3106_p8), 0  }
  0xd8   : > { %s4615_s16 = smov (!%p3106_p8), 0  }
  0xdb LB: >> { %v339_v3 = vld [vmem:[%s4609_s15] sm:%s5125_s11]  ;;  %s341_s13 = sadd.s32 1, %s4613_s19  ;;  %s333_s16 = sadd.s32 1, %s4617_s16   ;;  %s4617_s16 = sphi %s4615_s16, %s333_s16   ;;  %s4613_s19 = sphi %s4611_s19, %s4612_s19   ;;  %s4609_s15 = sphi %s4607_s15, %s346_s15   ;;  %s4605_s26 = sphi %s4603_s26, %s347_s26  }
  0xdc   : >> { %340 = vst [vmem:[%s4605_s26] sm:%s5125_s11] %v339_v3  ;;  %p342_p9 = scmp.ge.s32.totalorder %s341_s13, %s5301_s4  ;;  %p332_p10 = scmp.ge.s32.totalorder %s333_s16, %s5301_s4 }
  0xde   : >> { %s6757_s13 = smov (%p342_p9, %s341_s13), 0  ;;  %335 = sbr.rel (!%p332_p10) target bundleno = 219 (0xdb), region = 395 }
  0xdf   : >> { %s344_s23 = smul.u32 24, %s6757_s13  ;;  %s3107_s8 = sshll.u32 %s6757_s13, 4 }
  0xe0   : >> { %s347_s26 = scalar_lea.vmem %s329_s29, %s3107_s8 [#allocation2]   ;;  %s4612_s19 = smov %s6757_s13  }
  0xe1   : >> { %s346_s15 = scalar_lea.vmem %s327_s0, %s344_s23  }
  0xe3 PF: > { %p3108_p11 = scmp.ge.s32.totalorder %s4513_s28, 1  ;;  %p964_p0 = scmp.lt.s32.totalorder %s4513_s28, 5 }
  0xe5   : > { %p965_p4 = pnand %p3108_p11, %p964_p0 }
  0xe7   : > { %968 = sbr.rel (%p965_p4) target bundleno = 1099 (0x44b), region = 122 }
  0xec   : > { %s971_s5 = sand.u32 1, %s4489_s22   ;;  %s996_s6 = sand.u32 1, %s4481_s20   ;;  %v1114_v4 = vlaneseq }
  0xed   : > { %s5318_s11 = sshll.u32 %s971_s5, 9  ;;  %s5322_s14 = sshll.u32 %s996_s6, 8 }
  0xee   : > { %v5324_v5 = vshrl.u32 %v1114_v4, 7  ;;  %v1181_v6 = vand.u32 127, %v1114_v4  ;;  %s5327_s10 = sshll.u32 %s4497_s24, 5  ;;  %s3115_s18 = sshll.u32 %s4497_s24, 8 }
  0xef   : > { %p1023_p1 = scmp.lt.s32.totalorder %s5327_s10, 63  ;;  %s3116_s30 = sshll.u32 %s4501_s25, 8  ;;  %v5333_v9 = vstv %s3115_s18 }
  0xf0   : > { %v1182_v7 = vadd.s32 128, %v1181_v6  ;;  %v1116_v8 = vadd.s32 8, %v5324_v5  ;;  %v1117_v10 = vadd.s32 16, %v5324_v5  ;;  %v1118_v11 = vadd.s32 24, %v5324_v5  ;;  %s5350_s7 = scalar_lea.vmem [#allocation2], %s5318_s11  ;;  %s5372_s9 = scalar_lea.vmem [#allocation6], %s5318_s11 }
  0xf1   : > { %v1148_v12 = vadd.s32 %v5333_v9, %v5324_v5  ;;  %v1183_v13 = vstv %s3116_s30  ;;  %s1024_s21 = scalar_select %p1023_p1, %s5327_s10, 63  ;;  %v1119_v18 = vadd.s32 32, %v5324_v5  ;;  %v1050_v19 = vld [vmem:[%s5350_s7] sm:$0xff]  ;;  %v1120_v21 = vadd.s32 40, %v5324_v5  ;;  %v1051_v22 = vld [vmem:[%s5350_s7 + $0x8] sm:$0xff]  ;;  %v1052_v23 = vld [vmem:[%s5350_s7 + $0x10] sm:$0xff] }
  0xf2   : > { %v1149_v14 = vadd.s32 %v5333_v9, %v1116_v8  ;;  %v5343_v15 = vadd.s32 %v1183_v13, %v1181_v6  ;;  %v5345_v16 = vadd.s32 %v1183_v13, %v1182_v7  ;;  %v1150_v17 = vadd.s32 %v5333_v9, %v1117_v10  ;;  %v1053_v25 = vld [vmem:[%s5350_s7 + $0x18] sm:$0xff]  ;;  %v1054_v28 = vld [vmem:[%s5350_s7 + $0x20] sm:$0xff]  ;;  %v1055_v31 = vld [vmem:[%s5350_s7 + $0x28] sm:$0xff]  ;;  %s5979_s0 = scalar_lea.vmem [#allocation3], %s5322_s14  ;;  %s5982_s29 = scalar_lea.vmem [#allocation5], %s5322_s14  }
  0xf3   : > { %vm1250_vm0 = vcmp.lt.s32.totalorder %v1148_v12, 300  ;;  %v1151_v20 = vadd.s32 %v5333_v9, %v1118_v11  ;;  %s3114_s17 = sshll.u32 %s1024_s21, 3  ;;  %v1152_v26 = vadd.s32 %v5333_v9, %v1119_v18  ;;  %v1153_v29 = vadd.s32 %v5333_v9, %v1120_v21  ;;  %v1056_v35 = vld [vmem:[%s5350_s7 + $0x30] sm:$0xff]  ;;  %v1057_v38 = vld [vmem:[%s5350_s7 + $0x38] sm:$0xff]  ;;  %v1058_v41 = vld [vmem:[%s5350_s7 + $0x40] sm:$0xff]  ;;  %p3117_p5 = scmp.ne.s32.totalorder %s4497_s24, 0 }
  0xf4   : > { %vm1186_vm1 = vcmp.ne.s32.totalorder %v1148_v12, %v5343_v15  ;;  %vm1187_vm2 = vcmp.ne.s32.totalorder %v1148_v12, %v5345_v16  ;;  %vm1188_vm3 = vcmp.ne.s32.totalorder %v1149_v14, %v5343_v15  ;;  %vm1251_vm4 = vcmp.lt.s32.totalorder %v1149_v14, 300  ;;  %s5362_s27 = scalar_lea.vmem %s6626_s1, %s3114_s17  ;;  %v1059_v43 = vld [vmem:[%s5350_s7 + $0x48] sm:$0xff]  ;;  %v1060_v47 = vld [vmem:[%s5350_s7 + $0x50] sm:$0xff]  ;;  %v1061_v50 = vld [vmem:[%s5350_s7 + $0x58] sm:$0xff] }
  0xf5   : > { %vm1282_vm5 = vmand %vm1186_vm1, %vm1250_vm0  ;;  %vm1189_vm6 = vcmp.ne.s32.totalorder %v1149_v14, %v5345_v16  ;;  %vm1190_vm8 = vcmp.ne.s32.totalorder %v1150_v17, %v5343_v15  ;;  %vm1252_vm9 = vcmp.lt.s32.totalorder %v1150_v17, 300  ;;  %vm1191_vm11 = vcmp.ne.s32.totalorder %v1150_v17, %v5345_v16  ;;  %v1062_v53 = vld [vmem:[%s5350_s7 + $0x60] sm:$0xff]  ;;  %v1063_v56 = vld [vmem:[%s5350_s7 + $0x68] sm:$0xff] }
  0xf6   : > { %v5366_v24 = vsel %vm1282_vm5, %v1050_v19, 0.0  ;;  %vm1283_vm7 = vmand %vm1187_vm2, %vm1250_vm0  ;;  %vm1192_vm12 = vcmp.ne.s32.totalorder %v1151_v20, %v5343_v15  ;;  %vm1253_vm14 = vcmp.lt.s32.totalorder %v1151_v20, 300  ;;  %v1121_v32 = vadd.s32 48, %v5324_v5  ;;  %v1064_v59 = vld [vmem:[%s5350_s7 + $0x70] sm:$0xff]  ;;  %v1065_v61 = vld [vmem:[%s5350_s7 + $0x78] sm:$0xff] }
  0xf7   : > { %1410 = vst [vmem:[%s5372_s9] sm:$0xff] %v5366_v24  ;;  %v5376_v27 = vsel %vm1283_vm7, %v1051_v22, 0.0  ;;  %vm1284_vm10 = vmand %vm1188_vm3, %vm1251_vm4  ;;  %v1122_v33 = vadd.s32 56, %v5324_v5  ;;  %vm1193_vm0 = vcmp.ne.s32.totalorder %v1151_v20, %v5345_v16  ;;  %v1123_v36 = vadd.s32 64, %v5324_v5  ;;  %v1066_v1 = vld [vmem:[%s5350_s7 + $0x80] sm:$0xff]  ;;  %v1067_v4 = vld [vmem:[%s5350_s7 + $0x88] sm:$0xff] }
  0xf8   : > { %1411 = vst [vmem:[%s5372_s9 + $0x8] sm:$0xff] %v5376_v27  ;;  %v5387_v30 = vsel %vm1284_vm10, %v1052_v23, 0.0  ;;  %vm1285_vm13 = vmand %vm1189_vm6, %vm1251_vm4  ;;  %vm1194_vm2 = vcmp.ne.s32.totalorder %v1152_v26, %v5343_v15  ;;  %vm1254_vm3 = vcmp.lt.s32.totalorder %v1152_v26, 300  ;;  %v1154_v39 = vadd.s32 %v5333_v9, %v1121_v32  ;;  %v1068_v8 = vld [vmem:[%s5350_s7 + $0x90] sm:$0xff]  ;;  %v1069_v12 = vld [vmem:[%s5350_s7 + $0x98] sm:$0xff] }
  0xf9   : > { %1412 = vst [vmem:[%s5372_s9 + $0x10] sm:$0xff] %v5387_v30  ;;  %v5397_v34 = vsel %vm1285_vm13, %v1053_v25, 0.0  ;;  %vm1286_vm15 = vmand %vm1190_vm8, %vm1252_vm9  ;;  %vm1195_vm5 = vcmp.ne.s32.totalorder %v1152_v26, %v5345_v16  ;;  %vm1196_vm6 = vcmp.ne.s32.totalorder %v1153_v29, %v5343_v15  ;;  %vm1255_vm8 = vcmp.lt.s32.totalorder %v1153_v29, 300  ;;  %v1070_v17 = vld [vmem:[%s5350_s7 + $0xa0] sm:$0xff]  ;;  %v1071_v19 = vld [vmem:[%s5350_s7 + $0xa8] sm:$0xff] }
  0xfa   : > { %1413 = vst [vmem:[%s5372_s9 + $0x18] sm:$0xff] %v5397_v34  ;;  %v5407_v37 = vsel %vm1286_vm15, %v1054_v28, 0.0  ;;  %vm1287_vm1 = vmand %vm1191_vm11, %vm1252_vm9  ;;  %v1155_v44 = vadd.s32 %v5333_v9, %v1122_v33  ;;  %v1124_v45 = vadd.s32 72, %v5324_v5  ;;  %vm1197_vm10 = vcmp.ne.s32.totalorder %v1153_v29, %v5345_v16  ;;  %v1072_v23 = vld [vmem:[%s5350_s7 + $0xb0] sm:$0xff]  ;;  %v1073_v28 = vld [vmem:[%s5350_s7 + $0xb8] sm:$0xff] }
  0xfb   : > { %1414 = vst [vmem:[%s5372_s9 + $0x20] sm:$0xff] %v5407_v37  ;;  %v5417_v40 = vsel %vm1287_vm1, %v1055_v31, 0.0  ;;  %vm1288_vm4 = vmand %vm1192_vm12, %vm1253_vm14  ;;  %v1156_v48 = vadd.s32 %v5333_v9, %v1123_v36  ;;  %vm1198_vm12 = vcmp.ne.s32.totalorder %v1154_v39, %v5343_v15  ;;  %vm1256_vm13 = vcmp.lt.s32.totalorder %v1154_v39, 300  ;;  %v1074_v32 = vld [vmem:[%s5350_s7 + $0xc0] sm:$0xff]  ;;  %v1075_v36 = vld [vmem:[%s5350_s7 + $0xc8] sm:$0xff] }
  0xfc   : > { %1415 = vst [vmem:[%s5372_s9 + $0x28] sm:$0xff] %v5417_v40  ;;  %v5427_v42 = vsel %vm1288_vm4, %v1056_v35, 0.0  ;;  %vm1289_vm7 = vmand %vm1193_vm0, %vm1253_vm14  ;;  %v1125_v51 = vadd.s32 80, %v5324_v5  ;;  %vm1199_vm15 = vcmp.ne.s32.totalorder %v1154_v39, %v5345_v16  ;;  %v1126_v54 = vadd.s32 88, %v5324_v5 }
  0xfd   : > { %1416 = vst [vmem:[%s5372_s9 + $0x30] sm:$0xff] %v5427_v42  ;;  %v5437_v46 = vsel %vm1289_vm7, %v1057_v38, 0.0  ;;  %vm1290_vm9 = vmand %vm1194_vm2, %vm1254_vm3  ;;  %vm1200_vm1 = vcmp.ne.s32.totalorder %v1155_v44, %v5343_v15  ;;  %vm1257_vm2 = vcmp.lt.s32.totalorder %v1155_v44, 300  ;;  %v1157_v57 = vadd.s32 %v5333_v9, %v1124_v45 }
  0xfe   : > { %1417 = vst [vmem:[%s5372_s9 + $0x38] sm:$0xff] %v5437_v46  ;;  %v5447_v49 = vsel %vm1290_vm9, %v1058_v41, 0.0  ;;  %vm1291_vm11 = vmand %vm1195_vm5, %vm1254_vm3  ;;  %vm1201_vm4 = vcmp.ne.s32.totalorder %v1155_v44, %v5345_v16  ;;  %vm1202_vm5 = vcmp.ne.s32.totalorder %v1156_v48, %v5343_v15  ;;  %vm1258_vm7 = vcmp.lt.s32.totalorder %v1156_v48, 300  ;;  %v1076_v41 = vld [vmem:[%s5350_s7 + $0xd0] sm:$0xff]  ;;  %v1077_v44 = vld [vmem:[%s5350_s7 + $0xd8] sm:$0xff] }
  0xff   : > { %1418 = vst [vmem:[%s5372_s9 + $0x40] sm:$0xff] %v5447_v49  ;;  %v5457_v52 = vsel %vm1291_vm11, %v1059_v43, 0.0  ;;  %vm1292_vm14 = vmand %vm1196_vm6, %vm1255_vm8  ;;  %v1158_v62 = vadd.s32 %v5333_v9, %v1125_v51  ;;  %v1127_v63 = vadd.s32 96, %v5324_v5  ;;  %vm1203_vm9 = vcmp.ne.s32.totalorder %v1156_v48, %v5345_v16 }
 0x100   : > { %1419 = vst [vmem:[%s5372_s9 + $0x48] sm:$0xff] %v5457_v52  ;;  %v5467_v55 = vsel %vm1292_vm14, %v1060_v47, 0.0  ;;  %vm1293_vm0 = vmand %vm1197_vm10, %vm1255_vm8  ;;  %v1159_v2 = vadd.s32 %v5333_v9, %v1126_v54  ;;  %vm1204_vm11 = vcmp.ne.s32.totalorder %v1157_v57, %v5343_v15  ;;  %v1128_v6 = vadd.s32 104, %v5324_v5  ;;  %v1079_v54 = vld [vmem:[%s5350_s7 + $0xe8] sm:$0xff] }
 0x101   : > { %1420 = vst [vmem:[%s5372_s9 + $0x50] sm:$0xff] %v5467_v55  ;;  %v5477_v58 = vsel %vm1293_vm0, %v1061_v50, 0.0  ;;  %vm1294_vm3 = vmand %vm1198_vm12, %vm1256_vm13  ;;  %vm1259_vm12 = vcmp.lt.s32.totalorder %v1157_v57, 300  ;;  %vm1205_vm14 = vcmp.ne.s32.totalorder %v1157_v57, %v5345_v16  ;;  %v1129_v10 = vadd.s32 112, %v5324_v5  ;;  %v1078_v50 = vld [vmem:[%s5350_s7 + $0xe0] sm:$0xff] }
 0x102   : > { %1421 = vst [vmem:[%s5372_s9 + $0x58] sm:$0xff] %v5477_v58  ;;  %v5487_v60 = vsel %vm1294_vm3, %v1062_v53, 0.0  ;;  %vm1295_vm6 = vmand %vm1199_vm15, %vm1256_vm13  ;;  %vm1206_vm0 = vcmp.ne.s32.totalorder %v1158_v62, %v5343_v15  ;;  %v1160_v13 = vadd.s32 %v5333_v9, %v1127_v63  ;;  %vm1207_vm3 = vcmp.ne.s32.totalorder %v1158_v62, %v5345_v16  ;;  %v1081_v63 = vld [vmem:[%s5350_s7 + $0xf8] sm:$0xff] }
 0x103   : > { %1422 = vst [vmem:[%s5372_s9 + $0x60] sm:$0xff] %v5487_v60  ;;  %v5497_v0 = vsel %vm1295_vm6, %v1063_v56, 0.0  ;;  %vm1296_vm8 = vmand %vm1200_vm1, %vm1257_vm2  ;;  %vm1260_vm1 = vcmp.lt.s32.totalorder %v1158_v62, 300  ;;  %vm1261_vm6 = vcmp.lt.s32.totalorder %v1159_v2, 300  ;;  %v1161_v20 = vadd.s32 %v5333_v9, %v1128_v6 }
 0x104   : > { %1423 = vst [vmem:[%s5372_s9 + $0x68] sm:$0xff] %v5497_v0  ;;  %v5507_v3 = vsel %vm1296_vm8, %v1064_v59, 0.0  ;;  %vm1297_vm10 = vmand %vm1201_vm4, %vm1257_vm2  ;;  %vm1208_vm4 = vcmp.ne.s32.totalorder %v1159_v2, %v5343_v15  ;;  %v1130_v21 = vadd.s32 120, %v5324_v5  ;;  %vm1209_vm8 = vcmp.ne.s32.totalorder %v1159_v2, %v5345_v16  ;;  %v1080_v59 = vld [vmem:[%s5350_s7 + $0xf0] sm:$0xff] }
 0x105   : > { %1424 = vst [vmem:[%s5372_s9 + $0x70] sm:$0xff] %v5507_v3  ;;  %v5517_v7 = vsel %vm1297_vm10, %v1065_v61, 0.0  ;;  %vm1298_vm13 = vmand %vm1202_vm5, %vm1258_vm7  ;;  %v1162_v25 = vadd.s32 %v5333_v9, %v1129_v10  ;;  %vm1210_vm10 = vcmp.ne.s32.totalorder %v1160_v13, %v5343_v15  ;;  %v1131_v29 = vadd.s32 128, %v5324_v5 }
 0x106   : > { %1425 = vst [vmem:[%s5372_s9 + $0x78] sm:$0xff] %v5517_v7  ;;  %v5527_v11 = vsel %vm1298_vm13, %v1066_v1, 0.0  ;;  %vm1299_vm15 = vmand %vm1203_vm9, %vm1258_vm7  ;;  %vm1211_vm13 = vcmp.ne.s32.totalorder %v1160_v13, %v5345_v16  ;;  %v1132_v33 = vadd.s32 136, %v5324_v5  ;;  %v1163_v38 = vadd.s32 %v5333_v9, %v1130_v21  ;;  %v1085_v21 = vld [vmem:[%s5350_s7 + $0x118] sm:$0xff] }
 0x107   : > { %1426 = vst [vmem:[%s5372_s9 + $0x80] sm:$0xff] %v5527_v11  ;;  %v5537_v14 = vsel %vm1299_vm15, %v1067_v4, 0.0  ;;  %vm1300_vm2 = vmand %vm1204_vm11, %vm1259_vm12  ;;  %vm1262_vm11 = vcmp.lt.s32.totalorder %v1160_v13, 300  ;;  %vm1212_vm15 = vcmp.ne.s32.totalorder %v1161_v20, %v5343_v15  ;;  %v1164_v45 = vadd.s32 %v5333_v9, %v1131_v29  ;;  %v1082_v4 = vld [vmem:[%s5350_s7 + $0x100] sm:$0xff] }
 0x108   : > { %1427 = vst [vmem:[%s5372_s9 + $0x88] sm:$0xff] %v5537_v14  ;;  %v5547_v18 = vsel %vm1300_vm2, %v1068_v8, 0.0  ;;  %vm1301_vm5 = vmand %vm1205_vm14, %vm1259_vm12  ;;  %vm1213_vm2 = vcmp.ne.s32.totalorder %v1161_v20, %v5345_v16  ;;  %v1133_v47 = vadd.s32 144, %v5324_v5  ;;  %v1165_v51 = vadd.s32 %v5333_v9, %v1132_v33  ;;  %v1083_v8 = vld [vmem:[%s5350_s7 + $0x108] sm:$0xff] }
 0x109   : > { %1428 = vst [vmem:[%s5372_s9 + $0x90] sm:$0xff] %v5547_v18  ;;  %v5557_v22 = vsel %vm1301_vm5, %v1069_v12, 0.0  ;;  %vm1302_vm7 = vmand %vm1206_vm0, %vm1260_vm1  ;;  %vm1263_vm0 = vcmp.lt.s32.totalorder %v1161_v20, 300  ;;  %vm1264_vm5 = vcmp.lt.s32.totalorder %v1162_v25, 300  ;;  %v1134_v56 = vadd.s32 152, %v5324_v5  ;;  %v1087_v33 = vld [vmem:[%s5350_s7 + $0x128] sm:$0xff] }
 0x10a   : > { %1429 = vst [vmem:[%s5372_s9 + $0x98] sm:$0xff] %v5557_v22  ;;  %v5567_v26 = vsel %vm1302_vm7, %v1070_v17, 0.0  ;;  %vm1303_vm9 = vmand %vm1207_vm3, %vm1260_vm1  ;;  %vm1214_vm3 = vcmp.ne.s32.totalorder %v1162_v25, %v5343_v15  ;;  %vm1215_vm7 = vcmp.ne.s32.totalorder %v1162_v25, %v5345_v16  ;;  %v1135_v61 = vadd.s32 160, %v5324_v5  ;;  %v1084_v17 = vld [vmem:[%s5350_s7 + $0x110] sm:$0xff] }
 0x10b   : > { %1430 = vst [vmem:[%s5372_s9 + $0xa0] sm:$0xff] %v5567_v26  ;;  %v5577_v31 = vsel %vm1303_vm9, %v1071_v19, 0.0  ;;  %vm1304_vm12 = vmand %vm1208_vm4, %vm1261_vm6  ;;  %vm1216_vm9 = vcmp.ne.s32.totalorder %v1163_v38, %v5343_v15  ;;  %v1166_v1 = vadd.s32 %v5333_v9, %v1133_v47  ;;  %v1167_v10 = vadd.s32 %v5333_v9, %v1134_v56 }
 0x10c   : > { %1431 = vst [vmem:[%s5372_s9 + $0xa8] sm:$0xff] %v5577_v31  ;;  %v5587_v35 = vsel %vm1304_vm12, %v1072_v23, 0.0  ;;  %vm1305_vm14 = vmand %vm1209_vm8, %vm1261_vm6  ;;  %vm1217_vm12 = vcmp.ne.s32.totalorder %v1163_v38, %v5345_v16  ;;  %v1136_v12 = vadd.s32 168, %v5324_v5  ;;  %v1168_v19 = vadd.s32 %v5333_v9, %v1135_v61  ;;  %v1091_v61 = vld [vmem:[%s5350_s7 + $0x148] sm:$0xff] }
 0x10d   : > { %1432 = vst [vmem:[%s5372_s9 + $0xb0] sm:$0xff] %v5587_v35  ;;  %v5597_v39 = vsel %vm1305_vm14, %v1073_v28, 0.0  ;;  %vm1306_vm1 = vmand %vm1210_vm10, %vm1262_vm11  ;;  %vm1265_vm10 = vcmp.lt.s32.totalorder %v1163_v38, 300  ;;  %vm1218_vm14 = vcmp.ne.s32.totalorder %v1164_v45, %v5343_v15  ;;  %v1137_v23 = vadd.s32 176, %v5324_v5  ;;  %v1086_v28 = vld [vmem:[%s5350_s7 + $0x120] sm:$0xff] }
 0x10e   : > { %1433 = vst [vmem:[%s5372_s9 + $0xb8] sm:$0xff] %v5597_v39  ;;  %v5607_v43 = vsel %vm1306_vm1, %v1074_v32, 0.0  ;;  %vm1307_vm4 = vmand %vm1211_vm13, %vm1262_vm11  ;;  %vm1219_vm1 = vcmp.ne.s32.totalorder %v1164_v45, %v5345_v16  ;;  %v1138_v29 = vadd.s32 184, %v5324_v5 }
 0x10f   : > { %1434 = vst [vmem:[%s5372_s9 + $0xc0] sm:$0xff] %v5607_v43  ;;  %v5617_v48 = vsel %vm1307_vm4, %v1075_v36, 0.0  ;;  %vm1308_vm6 = vmand %vm1212_vm15, %vm1263_vm0  ;;  %vm1266_vm15 = vcmp.lt.s32.totalorder %v1164_v45, 300  ;;  %vm1267_vm4 = vcmp.lt.s32.totalorder %v1165_v51, 300  ;;  %v1169_v36 = vadd.s32 %v5333_v9, %v1136_v12  ;;  %v1089_v45 = vld [vmem:[%s5350_s7 + $0x138] sm:$0xff] }
 0x110   : > { %1435 = vst [vmem:[%s5372_s9 + $0xc8] sm:$0xff] %v5617_v48  ;;  %v5627_v53 = vsel %vm1308_vm6, %v1076_v41, 0.0  ;;  %vm1309_vm8 = vmand %vm1213_vm2, %vm1263_vm0  ;;  %vm1220_vm2 = vcmp.ne.s32.totalorder %v1165_v51, %v5343_v15  ;;  %vm1221_vm6 = vcmp.ne.s32.totalorder %v1165_v51, %v5345_v16  ;;  %v1088_v41 = vld [vmem:[%s5350_s7 + $0x130] sm:$0xff]  ;;  %v1170_v47 = vadd.s32 %v5333_v9, %v1137_v23  ;;  %v1093_v12 = vld [vmem:[%s5350_s7 + $0x158] sm:$0xff] }
 0x111   : > { %6691 = vst [vmem:[#allocation23_spill] sm:$0xff] %v5627_v53  ;;  %1436 = vst [vmem:[%s5372_s9 + $0xd0] sm:$0xff] %v5627_v53  ;;  %v5637_v57 = vsel %vm1309_vm8, %v1077_v44, 0.0  ;;  %vm1222_vm8 = vcmp.ne.s32.totalorder %v1166_v1, %v5343_v15  ;;  %v1171_v56 = vadd.s32 %v5333_v9, %v1138_v29  ;;  %v1094_v23 = vld [vmem:[%s5350_s7 + $0x160] sm:$0xff]  ;;  %v1113_v53 = vld [vmem:[%s5350_s7 + $0x1f8] sm:$0xff] }
 0x112   : > { %6692 = vst [vmem:[#allocation24_spill] sm:$0xff] %v5637_v57  ;;  %vm1310_vm11 = vmand %vm1214_vm3, %vm1264_vm5 }
 0x113   : > { %1437 = vst [vmem:[%s5372_s9 + $0xd8] sm:$0xff] %v5637_v57  ;;  %v5647_v62 = vsel %vm1310_vm11, %v1078_v50, 0.0  ;;  %vm1311_vm13 = vmand %vm1215_vm7, %vm1264_vm5  ;;  %vm1223_vm11 = vcmp.ne.s32.totalorder %v1166_v1, %v5345_v16  ;;  %v1139_v50 = vadd.s32 192, %v5324_v5 }
 0x114   : > { %6693 = vst [vmem:[#allocation25_spill] sm:$0xff] %v5647_v62  ;;  %1438 = vst [vmem:[%s5372_s9 + $0xe0] sm:$0xff] %v5647_v62  ;;  %v5657_v2 = vsel %vm1311_vm13, %v1079_v54, 0.0  ;;  %vm1224_vm13 = vcmp.ne.s32.totalorder %v1167_v10, %v5343_v15  ;;  %v1090_v54 = vld [vmem:[%s5350_s7 + $0x140] sm:$0xff] }
 0x115   : > { %6694 = vst [vmem:[#allocation26_spill] sm:$0xff] %v5657_v2  ;;  %vm1312_vm0 = vmand %vm1216_vm9, %vm1265_vm10  ;;  %vm1268_vm9 = vcmp.lt.s32.totalorder %v1166_v1, 300 }
 0x116   : > { %1439 = vst [vmem:[%s5372_s9 + $0xe8] sm:$0xff] %v5657_v2  ;;  %v5667_v6 = vsel %vm1312_vm0, %v1080_v59, 0.0  ;;  %vm1313_vm3 = vmand %vm1217_vm12, %vm1265_vm10  ;;  %vm1225_vm0 = vcmp.ne.s32.totalorder %v1167_v10, %v5345_v16  ;;  %v1146_v2 = vadd.s32 248, %v5324_v5 }
 0x117   : > { %6695 = vst [vmem:[#allocation27_spill] sm:$0xff] %v5667_v6  ;;  %1440 = vst [vmem:[%s5372_s9 + $0xf0] sm:$0xff] %v5667_v6  ;;  %v5677_v13 = vsel %vm1313_vm3, %v1081_v63, 0.0  ;;  %vm1270_vm3 = vcmp.lt.s32.totalorder %v1168_v19, 300  ;;  %v1140_v63 = vadd.s32 200, %v5324_v5 }
 0x118   : > { %6696 = vst [vmem:[#allocation28_spill] sm:$0xff] %v5677_v13  ;;  %vm1314_vm5 = vmand %vm1218_vm14, %vm1266_vm15  ;;  %vm1269_vm14 = vcmp.lt.s32.totalorder %v1167_v10, 300 }
 0x119   : > { %1441 = vst [vmem:[%s5372_s9 + $0xf8] sm:$0xff] %v5677_v13  ;;  %v5687_v20 = vsel %vm1314_vm5, %v1082_v4, 0.0  ;;  %vm1315_vm7 = vmand %vm1219_vm1, %vm1266_vm15  ;;  %vm1226_vm1 = vcmp.ne.s32.totalorder %v1168_v19, %v5343_v15  ;;  %vm1227_vm5 = vcmp.ne.s32.totalorder %v1168_v19, %v5345_v16  ;;  %v1092_v4 = vld [vmem:[%s5350_s7 + $0x150] sm:$0xff]  ;;  %v1173_v29 = vadd.s32 %v5333_v9, %v1140_v63 }
 0x11a   : > { %1442 = vst [vmem:[%s5372_s9 + $0x100] sm:$0xff] %v5687_v20  ;;  %v5697_v25 = vsel %vm1315_vm7, %v1083_v8, 0.0  ;;  %vm1316_vm10 = vmand %vm1220_vm2, %vm1267_vm4  ;;  %vm1228_vm7 = vcmp.ne.s32.totalorder %v1169_v36, %v5343_v15  ;;  %v1141_v8 = vadd.s32 208, %v5324_v5  ;;  %v1145_v13 = vadd.s32 240, %v5324_v5 }
 0x11b   : > { %1443 = vst [vmem:[%s5372_s9 + $0x108] sm:$0xff] %v5697_v25  ;;  %v5707_v32 = vsel %vm1316_vm10, %v1084_v17, 0.0  ;;  %vm1317_vm12 = vmand %vm1221_vm6, %vm1267_vm4  ;;  %vm1229_vm10 = vcmp.ne.s32.totalorder %v1169_v36, %v5345_v16  ;;  %v1172_v17 = vadd.s32 %v5333_v9, %v1139_v50 }
 0x11c   : > { %1444 = vst [vmem:[%s5372_s9 + $0x110] sm:$0xff] %v5707_v32  ;;  %v5717_v38 = vsel %vm1317_vm12, %v1085_v21, 0.0  ;;  %vm1318_vm15 = vmand %vm1222_vm8, %vm1268_vm9  ;;  %vm1271_vm8 = vcmp.lt.s32.totalorder %v1169_v36, 300  ;;  %vm1230_vm12 = vcmp.ne.s32.totalorder %v1170_v47, %v5343_v15  ;;  %v1174_v36 = vadd.s32 %v5333_v9, %v1141_v8 }
 0x11d   : > { %1445 = vst [vmem:[%s5372_s9 + $0x118] sm:$0xff] %v5717_v38  ;;  %v5727_v44 = vsel %vm1318_vm15, %v1086_v28, 0.0  ;;  %vm1319_vm2 = vmand %vm1223_vm11, %vm1268_vm9  ;;  %vm1231_vm15 = vcmp.ne.s32.totalorder %v1170_v47, %v5345_v16  ;;  %v1095_v28 = vld [vmem:[%s5350_s7 + $0x168] sm:$0xff] }
 0x11e   : > { %1446 = vst [vmem:[%s5372_s9 + $0x120] sm:$0xff] %v5727_v44  ;;  %v5737_v51 = vsel %vm1319_vm2, %v1087_v33, 0.0  ;;  %vm1320_vm4 = vmand %vm1224_vm13, %vm1269_vm14  ;;  %vm1272_vm13 = vcmp.lt.s32.totalorder %v1170_v47, 300  ;;  %vm1273_vm2 = vcmp.lt.s32.totalorder %v1171_v56, 300  ;;  %v1142_v33 = vadd.s32 216, %v5324_v5 }
 0x11f   : > { %1447 = vst [vmem:[%s5372_s9 + $0x128] sm:$0xff] %v5737_v51  ;;  %v5747_v59 = vsel %vm1320_vm4, %v1088_v41, 0.0  ;;  %vm1321_vm6 = vmand %vm1225_vm0, %vm1269_vm14  ;;  %vm1232_vm0 = vcmp.ne.s32.totalorder %v1171_v56, %v5343_v15  ;;  %vm1233_vm4 = vcmp.ne.s32.totalorder %v1171_v56, %v5345_v16  ;;  %v1144_v47 = vadd.s32 232, %v5324_v5 }
 0x120   : > { %1448 = vst [vmem:[%s5372_s9 + $0x130] sm:$0xff] %v5747_v59  ;;  %v5757_v1 = vsel %vm1321_vm6, %v1089_v45, 0.0  ;;  %vm1322_vm9 = vmand %vm1226_vm1, %vm1270_vm3  ;;  %v1096_v45 = vld [vmem:[%s5350_s7 + $0x170] sm:$0xff]  ;;  %vm1234_vm6 = vcmp.ne.s32.totalorder %v1172_v17, %v5343_v15 }
 0x121   : > { %1449 = vst [vmem:[%s5372_s9 + $0x138] sm:$0xff] %v5757_v1  ;;  %v5767_v10 = vsel %vm1322_vm9, %v1090_v54, 0.0  ;;  %vm1323_vm11 = vmand %vm1227_vm5, %vm1270_vm3  ;;  %v1097_v54 = vld [vmem:[%s5350_s7 + $0x178] sm:$0xff]  ;;  %vm1235_vm9 = vcmp.ne.s32.totalorder %v1172_v17, %v5345_v16 }
 0x122   : > { %1450 = vst [vmem:[%s5372_s9 + $0x140] sm:$0xff] %v5767_v10  ;;  %v5777_v21 = vsel %vm1323_vm11, %v1091_v61, 0.0  ;;  %vm1324_vm14 = vmand %vm1228_vm7, %vm1271_vm8  ;;  %vm1274_vm7 = vcmp.lt.s32.totalorder %v1172_v17, 300  ;;  %v1143_v61 = vadd.s32 224, %v5324_v5  ;;  %vm1236_vm11 = vcmp.ne.s32.totalorder %v1173_v29, %v5343_v15  ;;  %v1105_v5 = vld [vmem:[%s5350_s7 + $0x1b8] sm:$0xff] }
 0x123   : > { %1451 = vst [vmem:[%s5372_s9 + $0x148] sm:$0xff] %v5777_v21  ;;  %v5787_v19 = vsel %vm1324_vm14, %v1092_v4, 0.0  ;;  %vm1325_vm1 = vmand %vm1229_vm10, %vm1271_vm8  ;;  %v1098_v4 = vld [vmem:[%s5350_s7 + $0x180] sm:$0xff]  ;;  %vm1237_vm14 = vcmp.ne.s32.totalorder %v1173_v29, %v5345_v16  ;;  %v1177_v17 = vadd.s32 %v5333_v9, %v1144_v47 }
 0x124   : > { %1452 = vst [vmem:[%s5372_s9 + $0x150] sm:$0xff] %v5787_v19  ;;  %v5797_v41 = vsel %vm1325_vm1, %v1093_v12, 0.0  ;;  %vm1326_vm3 = vmand %vm1230_vm12, %vm1272_vm13  ;;  %v1099_v12 = vld [vmem:[%s5350_s7 + $0x188] sm:$0xff]  ;;  %vm1275_vm12 = vcmp.lt.s32.totalorder %v1173_v29, 300  ;;  %vm1276_vm1 = vcmp.lt.s32.totalorder %v1174_v36, 300 }
 0x125   : > { %1453 = vst [vmem:[%s5372_s9 + $0x158] sm:$0xff] %v5797_v41  ;;  %v5807_v50 = vsel %vm1326_vm3, %v1094_v23, 0.0  ;;  %vm1327_vm5 = vmand %vm1231_vm15, %vm1272_vm13  ;;  %v1175_v23 = vadd.s32 %v5333_v9, %v1142_v33  ;;  %vm1238_vm15 = vcmp.ne.s32.totalorder %v1174_v36, %v5343_v15  ;;  %v1101_v33 = vld [vmem:[%s5350_s7 + $0x198] sm:$0xff]  ;;  %vm1239_vm3 = vcmp.ne.s32.totalorder %v1174_v36, %v5345_v16 }
 0x126   : > { %1454 = vst [vmem:[%s5372_s9 + $0x160] sm:$0xff] %v5807_v50  ;;  %v5817_v63 = vsel %vm1327_vm5, %v1095_v28, 0.0  ;;  %vm1328_vm8 = vmand %vm1232_vm0, %vm1273_vm2 }
 0x127   : > { %1455 = vst [vmem:[%s5372_s9 + $0x168] sm:$0xff] %v5817_v63  ;;  %v5827_v8 = vsel %vm1328_vm8, %v1096_v45, 0.0  ;;  %vm1329_vm10 = vmand %vm1233_vm4, %vm1273_vm2  ;;  %v1100_v45 = vld [vmem:[%s5350_s7 + $0x190] sm:$0xff]  ;;  %vm1240_vm5 = vcmp.ne.s32.totalorder %v1175_v23, %v5343_v15  ;;  %vm1241_vm8 = vcmp.ne.s32.totalorder %v1175_v23, %v5345_v16 }
 0x128   : > { %1456 = vst [vmem:[%s5372_s9 + $0x170] sm:$0xff] %v5827_v8  ;;  %v5837_v28 = vsel %vm1329_vm10, %v1097_v54, 0.0  ;;  %vm1330_vm13 = vmand %vm1234_vm6, %vm1274_vm7  ;;  %v1176_v54 = vadd.s32 %v5333_v9, %v1143_v61  ;;  %vm1277_vm6 = vcmp.lt.s32.totalorder %v1175_v23, 300 }
 0x129   : > { %1457 = vst [vmem:[%s5372_s9 + $0x178] sm:$0xff] %v5837_v28  ;;  %v5847_v56 = vsel %vm1330_vm13, %v1098_v4, 0.0  ;;  %vm1331_vm0 = vmand %vm1235_vm9, %vm1274_vm7  ;;  %v1102_v4 = vld [vmem:[%s5350_s7 + $0x1a0] sm:$0xff] }
 0x12a   : > { %1458 = vst [vmem:[%s5372_s9 + $0x180] sm:$0xff] %v5847_v56  ;;  %v5857_v6 = vsel %vm1331_vm0, %v1099_v12, 0.0  ;;  %vm1332_vm2 = vmand %vm1236_vm11, %vm1275_vm12  ;;  %v1103_v12 = vld [vmem:[%s5350_s7 + $0x1a8] sm:$0xff]  ;;  %vm1242_vm10 = vcmp.ne.s32.totalorder %v1176_v54, %v5343_v15  ;;  %vm1278_vm11 = vcmp.lt.s32.totalorder %v1176_v54, 300  ;;  %vm1243_vm13 = vcmp.ne.s32.totalorder %v1176_v54, %v5345_v16 }
 0x12b   : > { %1459 = vst [vmem:[%s5372_s9 + $0x188] sm:$0xff] %v5857_v6  ;;  %v5867_v61 = vsel %vm1332_vm2, %v1100_v45, 0.0  ;;  %vm1333_vm4 = vmand %vm1237_vm14, %vm1275_vm12  ;;  %v1104_v45 = vld [vmem:[%s5350_s7 + $0x1b0] sm:$0xff]  ;;  %vm1279_vm0 = vcmp.lt.s32.totalorder %v1177_v17, 300  ;;  %vm1245_vm2 = vcmp.ne.s32.totalorder %v1177_v17, %v5345_v16 }
 0x12c   : > { %1460 = vst [vmem:[%s5372_s9 + $0x190] sm:$0xff] %v5867_v61  ;;  %v5877_v47 = vsel %vm1333_vm4, %v1101_v33, 0.0  ;;  %vm1334_vm7 = vmand %vm1238_vm15, %vm1276_vm1  ;;  %v1178_v33 = vadd.s32 %v5333_v9, %v1145_v13  ;;  %v1107_v13 = vld [vmem:[%s5350_s7 + $0x1c8] sm:$0xff]  ;;  %vm1244_vm15 = vcmp.ne.s32.totalorder %v1177_v17, %v5343_v15 }
 0x12d   : > { %1461 = vst [vmem:[%s5372_s9 + $0x198] sm:$0xff] %v5877_v47  ;;  %v5886_v29 = vsel %vm1334_vm7, %v1102_v4, 0.0  ;;  %vm1335_vm9 = vmand %vm1239_vm3, %vm1276_vm1  ;;  %v1106_v4 = vld [vmem:[%s5350_s7 + $0x1c0] sm:$0xff] }
 0x12e   : > { %1462 = vst [vmem:[%s5372_s9 + $0x1a0] sm:$0xff] %v5886_v29  ;;  %v5896_v62 = vsel %vm1335_vm9, %v1103_v12, 0.0  ;;  %vm1336_vm12 = vmand %vm1240_vm5, %vm1277_vm6  ;;  %v1179_v12 = vadd.s32 %v5333_v9, %v1146_v2  ;;  %v1109_v9 = vld [vmem:[%s5350_s7 + $0x1d8] sm:$0xff]  ;;  %vm1246_vm4 = vcmp.ne.s32.totalorder %v1178_v33, %v5343_v15  ;;  %vm1280_vm5 = vcmp.lt.s32.totalorder %v1178_v33, 300 }
 0x12f   : > { %1463 = vst [vmem:[%s5372_s9 + $0x1a8] sm:$0xff] %v5896_v62  ;;  %v5905_v36 = vsel %vm1336_vm12, %v1104_v45, 0.0  ;;  %vm1337_vm14 = vmand %vm1241_vm8, %vm1277_vm6  ;;  %v1108_v45 = vld [vmem:[%s5350_s7 + $0x1d0] sm:$0xff]  ;;  %vm1247_vm7 = vcmp.ne.s32.totalorder %v1178_v33, %v5345_v16 }
 0x130   : > { %1464 = vst [vmem:[%s5372_s9 + $0x1b0] sm:$0xff] %v5905_v36  ;;  %v5915_v57 = vsel %vm1337_vm14, %v1105_v5, 0.0  ;;  %vm1338_vm1 = vmand %vm1242_vm10, %vm1278_vm11  ;;  %v1110_v5 = vld [vmem:[%s5350_s7 + $0x1e0] sm:$0xff]  ;;  %vm1248_vm9 = vcmp.ne.s32.totalorder %v1179_v12, %v5343_v15  ;;  %vm1281_vm10 = vcmp.lt.s32.totalorder %v1179_v12, 300  ;;  %vm1249_vm12 = vcmp.ne.s32.totalorder %v1179_v12, %v5345_v16 }
 0x131   : > { %1465 = vst [vmem:[%s5372_s9 + $0x1b8] sm:$0xff] %v5915_v57  ;;  %v5924_v23 = vsel %vm1338_vm1, %v1106_v4, 0.0  ;;  %vm1339_vm3 = vmand %vm1243_vm13, %vm1278_vm11  ;;  %v1111_v4 = vld [vmem:[%s5350_s7 + $0x1e8] sm:$0xff] }
 0x132   : > { %1466 = vst [vmem:[%s5372_s9 + $0x1c0] sm:$0xff] %v5924_v23  ;;  %v5933_v2 = vsel %vm1339_vm3, %v1107_v13, 0.0  ;;  %vm1340_vm6 = vmand %vm1244_vm15, %vm1279_vm0 }
 0x133   : > { %1467 = vst [vmem:[%s5372_s9 + $0x1c8] sm:$0xff] %v5933_v2  ;;  %v5942_v54 = vsel %vm1340_vm6, %v1108_v45, 0.0  ;;  %vm1341_vm8 = vmand %vm1245_vm2, %vm1279_vm0  ;;  %v1112_v45 = vld [vmem:[%s5350_s7 + $0x1f0] sm:$0xff] }
 0x134   : > { %1468 = vst [vmem:[%s5372_s9 + $0x1d0] sm:$0xff] %v5942_v54  ;;  %v5949_v13 = vsel %vm1341_vm8, %v1109_v9, 0.0  ;;  %vm1342_vm11 = vmand %vm1246_vm4, %vm1280_vm5 }
 0x135   : > { %1469 = vst [vmem:[%s5372_s9 + $0x1d8] sm:$0xff] %v5949_v13  ;;  %v5958_v17 = vsel %vm1342_vm11, %v1110_v5, 0.0  ;;  %vm1343_vm13 = vmand %vm1247_vm7, %vm1280_vm5  ;;  %1477 = sbr.rel (%p3117_p5) target bundleno = 331 (0x14b), region = 130 }
 0x136   : > { %1470 = vst [vmem:[%s5372_s9 + $0x1e0] sm:$0xff] %v5958_v17  ;;  %v5964_v9 = vsel %vm1343_vm13, %v1111_v4, 0.0  ;;  %vm1344_vm14 = vmand %vm1248_vm9, %vm1281_vm10 }
 0x137   : > { %1471 = vst [vmem:[%s5372_s9 + $0x1e8] sm:$0xff] %v5964_v9  ;;  %v5969_v15 = vsel %vm1344_vm14, %v1112_v45, 0.0  ;;  %vm1345_vm15 = vmand %vm1249_vm12, %vm1281_vm10 }
 0x138   : > { %1472 = vst [vmem:[%s5372_s9 + $0x1f0] sm:$0xff] %v5969_v15  ;;  %v5974_v16 = vsel %vm1345_vm15, %v1113_v53, 0.0 }
 0x139   : > { %1473 = vst [vmem:[%s5372_s9 + $0x1f8] sm:$0xff] %v5974_v16 }
 0x13a   : > { %v4653_v33 = vmov 0.0  }
 0x13b   : > { %1478 = vst [vmem:[%s5979_s0] sm:$0xff] %v4653_v33  ;;  %1479 = vst [vmem:[%s5979_s0 + $0x8] sm:$0xff] %v4653_v33 }
 0x13c   : > { %1480 = vst [vmem:[%s5979_s0 + $0x10] sm:$0xff] %v4653_v33  ;;  %1481 = vst [vmem:[%s5979_s0 + $0x18] sm:$0xff] %v4653_v33 }
 0x13d   : > { %1482 = vst [vmem:[%s5979_s0 + $0x20] sm:$0xff] %v4653_v33  ;;  %1483 = vst [vmem:[%s5979_s0 + $0x28] sm:$0xff] %v4653_v33 }
 0x13e   : > { %1484 = vst [vmem:[%s5979_s0 + $0x30] sm:$0xff] %v4653_v33  ;;  %1485 = vst [vmem:[%s5979_s0 + $0x38] sm:$0xff] %v4653_v33 }
 0x13f   : > { %1486 = vst [vmem:[%s5979_s0 + $0x40] sm:$0xff] %v4653_v33  ;;  %1487 = vst [vmem:[%s5979_s0 + $0x48] sm:$0xff] %v4653_v33 }
 0x140   : > { %1488 = vst [vmem:[%s5979_s0 + $0x50] sm:$0xff] %v4653_v33  ;;  %1489 = vst [vmem:[%s5979_s0 + $0x58] sm:$0xff] %v4653_v33 }
 0x141   : > { %1490 = vst [vmem:[%s5979_s0 + $0x60] sm:$0xff] %v4653_v33  ;;  %1491 = vst [vmem:[%s5979_s0 + $0x68] sm:$0xff] %v4653_v33 }
 0x142   : > { %1492 = vst [vmem:[%s5979_s0 + $0x70] sm:$0xff] %v4653_v33  ;;  %1493 = vst [vmem:[%s5979_s0 + $0x78] sm:$0xff] %v4653_v33 }
 0x143   : > { %1494 = vst [vmem:[%s5979_s0 + $0x80] sm:$0xff] %v4653_v33  ;;  %1495 = vst [vmem:[%s5979_s0 + $0x88] sm:$0xff] %v4653_v33 }
 0x144   : > { %1496 = vst [vmem:[%s5979_s0 + $0x90] sm:$0xff] %v4653_v33  ;;  %1497 = vst [vmem:[%s5979_s0 + $0x98] sm:$0xff] %v4653_v33 }
 0x145   : > { %1498 = vst [vmem:[%s5979_s0 + $0xa0] sm:$0xff] %v4653_v33  ;;  %1499 = vst [vmem:[%s5979_s0 + $0xa8] sm:$0xff] %v4653_v33 }
 0x146   : > { %1500 = vst [vmem:[%s5979_s0 + $0xb0] sm:$0xff] %v4653_v33  ;;  %1501 = vst [vmem:[%s5979_s0 + $0xb8] sm:$0xff] %v4653_v33 }
 0x147   : > { %1502 = vst [vmem:[%s5979_s0 + $0xc0] sm:$0xff] %v4653_v33  ;;  %1503 = vst [vmem:[%s5979_s0 + $0xc8] sm:$0xff] %v4653_v33 }
 0x148   : > { %1504 = vst [vmem:[%s5979_s0 + $0xd0] sm:$0xff] %v4653_v33  ;;  %1505 = vst [vmem:[%s5979_s0 + $0xd8] sm:$0xff] %v4653_v33 }
 0x149   : > { %1506 = vst [vmem:[%s5979_s0 + $0xe0] sm:$0xff] %v4653_v33  ;;  %1507 = vst [vmem:[%s5979_s0 + $0xe8] sm:$0xff] %v4653_v33 }
 0x14a   : > { %1508 = vst [vmem:[%s5979_s0 + $0xf0] sm:$0xff] %v4653_v33  ;;  %1509 = vst [vmem:[%s5979_s0 + $0xf8] sm:$0xff] %v4653_v33 }
 0x14b PF: > { %v3927_v53 = vpack.i.bf16 %v5697_v25, %v5687_v20  ;;  %v4039_v12 = vpack.i.bf16 %v5376_v27, %v5366_v24  ;;  %v3929_v5 = vpack.i.bf16 %v5717_v38, %v5707_v32  ;;  %v4041_v4 = vpack.i.bf16 %v5397_v34, %v5387_v30  ;;  %v1557_v45 = vld [vmem:[%s5362_s27 + $0x78] sm:$0xff]  ;;  %v1556_v20 = vld [vmem:[%s5362_s27 + $0x70] sm:$0xff]  ;;  %v1555_v30 = vld [vmem:[%s5362_s27 + $0x68] sm:$0xff]  ;;  %p3118_p3 = scmp.ne.s32.totalorder %s4497_s24, 1 }
 0x14c   : > { %v4654_v33 = vmov 0.0   ;;  %v3931_v24 = vpack.i.bf16 %v5737_v51, %v5727_v44  ;;  %v4043_v27 = vpack.i.bf16 %v5417_v40, %v5407_v37  ;;  %v3933_v34 = vpack.i.bf16 %v5757_v1, %v5747_v59  ;;  %v1554_v37 = vld [vmem:[%s5362_s27 + $0x60] sm:$0xff]  ;;  %v1552_v32 = vld [vmem:[%s5362_s27 + $0x50] sm:$0xff]  ;;  %v1549_v51 = vld [vmem:[%s5362_s27 + $0x38] sm:$0xff] }
 0x14d   : > { %3928 = vxpose.xlu0.b32.start [1/16] %v3927_v53, 128  ;;  %4040 = vxpose.xlu1.b32.start [1/16] %v4039_v12, 128  ;;  %v4045_v25 = vpack.i.bf16 %v5437_v46, %v5427_v42  ;;  %v3935_v40 = vpack.i.bf16 %v5777_v21, %v5767_v10  ;;  %v4047_v42 = vpack.i.bf16 %v5457_v52, %v5447_v49  ;;  %v1553_v46 = vld [vmem:[%s5362_s27 + $0x58] sm:$0xff]  ;;  %v1551_v52 = vld [vmem:[%s5362_s27 + $0x48] sm:$0xff]  ;;  %v1546_v10 = vld [vmem:[%s5362_s27 + $0x20] sm:$0xff] }
 0x14e   : > { %1702 = vmatprep.subr.mxu0 %v4654_v33  ;;  %3291 = vmatprep.subr.mxu1 %v4654_v33  ;;  %v3937_v38 = vpack.i.bf16 %v5797_v41, %v5787_v19  ;;  %v4049_v49 = vpack.i.bf16 %v5477_v58, %v5467_v55  ;;  %v3939_v44 = vpack.i.bf16 %v5817_v63, %v5807_v50  ;;  %v1550_v58 = vld [vmem:[%s5362_s27 + $0x40] sm:$0xff]  ;;  %v1543_v19 = vld [vmem:[%s5362_s27 + $0x8] sm:$0xff]  ;;  %v1572_v41 = vld [vmem:[%s5362_s27 + $0xf0] sm:$0xff] }
 0x14f   : > { %1703 = vmatpush1.msra.mxu0 %v1557_v45  ;;  %3323 = vmatpush1.msra.mxu1 %v1557_v45  ;;  %v4051_v55 = vpack.i.bf16 %v5497_v0, %v5487_v60  ;;  %v3941_v59 = vpack.i.bf16 %v5837_v28, %v5827_v8  ;;  %v4053_v60 = vpack.i.bf16 %v5517_v7, %v5507_v3  ;;  %v1548_v0 = vld [vmem:[%s5362_s27 + $0x30] sm:$0xff]  ;;  %v1547_v7 = vld [vmem:[%s5362_s27 + $0x28] sm:$0xff]  ;;  %v6697_v63 = vld [vmem:[#allocation23_spill] sm:$0xff] }
 0x150   : > { %1704 = vmatprep.subr.mxu0 %v4654_v33  ;;  %3292 = vmatprep.subr.mxu1 %v4654_v33  ;;  %v3943_v1 = vpack.i.bf16 %v5857_v6, %v5847_v56  ;;  %v4055_v3 = vpack.i.bf16 %v5537_v14, %v5527_v11  ;;  %v3945_v6 = vpack.i.bf16 %v5877_v47, %v5867_v61  ;;  %v1545_v14 = vld [vmem:[%s5362_s27 + $0x18] sm:$0xff]  ;;  %v6698_v8 = vld [vmem:[#allocation24_spill] sm:$0xff]  ;;  %v6699_v56 = vld [vmem:[#allocation25_spill] sm:$0xff] }
 0x151   : > { %3930 = vxpose.xlu0.b32.cont [2/16] %v3929_v5, 128  ;;  %4042 = vxpose.xlu1.b32.cont [2/16] %v4041_v4, 128  ;;  %v4057_v11 = vpack.i.bf16 %v5557_v22, %v5547_v18  ;;  %v3947_v21 = vpack.i.bf16 %v5896_v62, %v5886_v29  ;;  %v4059_v18 = vpack.i.bf16 %v5577_v31, %v5567_v26  ;;  %v1544_v22 = vld [vmem:[%s5362_s27 + $0x10] sm:$0xff]  ;;  %v1542_v31 = vld [vmem:[%s5362_s27] sm:$0xff]  ;;  %v6700_v61 = vld [vmem:[#allocation26_spill] sm:$0xff] }
 0x152   : > { %1705 = vmatpush1.msra.mxu0 %v1556_v20  ;;  %3324 = vmatpush1.msra.mxu1 %v1556_v20  ;;  %v3949_v62 = vpack.i.bf16 %v5915_v57, %v5905_v36  ;;  %v4061_v26 = vpack.i.bf16 %v5597_v39, %v5587_v35  ;;  %v3951_v57 = vpack.i.bf16 %v5933_v2, %v5924_v23  ;;  %v1573_v39 = vld [vmem:[%s5362_s27 + $0xf8] sm:$0xff]  ;;  %v1570_v29 = vld [vmem:[%s5362_s27 + $0xe0] sm:$0xff]  ;;  %v1564_v53 = vld [vmem:[%s5362_s27 + $0xb0] sm:$0xff] }
 0x153   : > { %1706 = vmatprep.subr.mxu0 %v4654_v33  ;;  %3293 = vmatprep.subr.mxu1 %v4654_v33  ;;  %v4063_v35 = vpack.i.bf16 %v5617_v48, %v5607_v43  ;;  %v3953_v50 = vpack.i.bf16 %v5949_v13, %v5942_v54  ;;  %v4065_v43 = vpack.i.bf16 %v6698_v8, %v6697_v63  ;;  %v1571_v48 = vld [vmem:[%s5362_s27 + $0xe8] sm:$0xff]  ;;  %v1569_v36 = vld [vmem:[%s5362_s27 + $0xd8] sm:$0xff]  ;;  %v6701_v2 = vld [vmem:[#allocation27_spill] sm:$0xff] }
 0x154   : > { %1707 = vmatpush1.msra.mxu0 %v1555_v30  ;;  %3325 = vmatpush1.msra.mxu1 %v1555_v30  ;;  %v3955_v28 = vpack.i.bf16 %v5964_v9, %v5958_v17  ;;  %v4067_v47 = vpack.i.bf16 %v6700_v61, %v6699_v56  ;;  %v3957_v23 = vpack.i.bf16 %v5974_v16, %v5969_v15  ;;  %v6702_v54 = vld [vmem:[#allocation28_spill] sm:$0xff]  ;;  %v1568_v17 = vld [vmem:[%s5362_s27 + $0xd0] sm:$0xff]  ;;  %v1566_v15 = vld [vmem:[%s5362_s27 + $0xc0] sm:$0xff] }
 0x155   : > { %3932 = vxpose.xlu0.b32.cont [3/16] %v3931_v24, 128  ;;  %4044 = vxpose.xlu1.b32.cont [3/16] %v4043_v27, 128  ;;  %v4069_v13 = vpack.i.bf16 %v6702_v54, %v6701_v2  ;;  %v1567_v9 = vld [vmem:[%s5362_s27 + $0xc8] sm:$0xff]  ;;  %v1565_v16 = vld [vmem:[%s5362_s27 + $0xb8] sm:$0xff]  ;;  %v1562_v5 = vld [vmem:[%s5362_s27 + $0xa0] sm:$0xff] }
 0x156   : > { %1708 = vmatprep.subr.mxu0 %v4654_v33  ;;  %3294 = vmatprep.subr.mxu1 %v4654_v33  ;;  %v1563_v12 = vld [vmem:[%s5362_s27 + $0xa8] sm:$0xff]  ;;  %v1561_v4 = vld [vmem:[%s5362_s27 + $0x98] sm:$0xff]  ;;  %v1560_v45 = vld [vmem:[%s5362_s27 + $0x90] sm:$0xff] }
 0x157   : > { %1709 = vmatpush1.msra.mxu0 %v1554_v37  ;;  %3326 = vmatpush1.msra.mxu1 %v1554_v37  ;;  %v1559_v24 = vld [vmem:[%s5362_s27 + $0x88] sm:$0xff]  ;;  %v1558_v27 = vld [vmem:[%s5362_s27 + $0x80] sm:$0xff] }
 0x158   : > { %1710 = vmatprep.subr.mxu0 %v4654_v33  ;;  %3295 = vmatprep.subr.mxu1 %v4654_v33 }
 0x159   : > { %3934 = vxpose.xlu0.b32.cont [4/16] %v3933_v34, 128  ;;  %4046 = vxpose.xlu1.b32.cont [4/16] %v4045_v25, 128 }
 0x15a   : > { %1711 = vmatpush1.msra.mxu0 %v1553_v46  ;;  %3327 = vmatpush1.msra.mxu1 %v1553_v46 }
 0x15b   : > { %1712 = vmatprep.subr.mxu0 %v4654_v33  ;;  %3296 = vmatprep.subr.mxu1 %v4654_v33 }
 0x15c   : > { %1713 = vmatpush1.msra.mxu0 %v1552_v32  ;;  %3328 = vmatpush1.msra.mxu1 %v1552_v32 }
 0x15d   : > { %3936 = vxpose.xlu0.b32.cont [5/16] %v3935_v40, 128  ;;  %4048 = vxpose.xlu1.b32.cont [5/16] %v4047_v42, 128 }
 0x15e   : > { %1714 = vmatprep.subr.mxu0 %v4654_v33  ;;  %3297 = vmatprep.subr.mxu1 %v4654_v33 }
 0x15f   : > { %1715 = vmatpush1.msra.mxu0 %v1551_v52  ;;  %3329 = vmatpush1.msra.mxu1 %v1551_v52 }
 0x160   : > { %1716 = vmatprep.subr.mxu0 %v4654_v33  ;;  %3298 = vmatprep.subr.mxu1 %v4654_v33 }
 0x161   : > { %3938 = vxpose.xlu0.b32.cont [6/16] %v3937_v38, 128  ;;  %4050 = vxpose.xlu1.b32.cont [6/16] %v4049_v49, 128 }
 0x162   : > { %1717 = vmatpush1.msra.mxu0 %v1550_v58  ;;  %3330 = vmatpush1.msra.mxu1 %v1550_v58 }
 0x163   : > { %1718 = vmatprep.subr.mxu0 %v4654_v33  ;;  %3299 = vmatprep.subr.mxu1 %v4654_v33 }
 0x164   : > { %1719 = vmatpush1.msra.mxu0 %v1549_v51  ;;  %3331 = vmatpush1.msra.mxu1 %v1549_v51 }
 0x165   : > { %3940 = vxpose.xlu0.b32.cont [7/16] %v3939_v44, 128  ;;  %4052 = vxpose.xlu1.b32.cont [7/16] %v4051_v55, 128 }
 0x166   : > { %1720 = vmatprep.subr.mxu0 %v4654_v33  ;;  %3300 = vmatprep.subr.mxu1 %v4654_v33 }
 0x167   : > { %1721 = vmatpush1.msra.mxu0 %v1548_v0  ;;  %3332 = vmatpush1.msra.mxu1 %v1548_v0 }
 0x168   : > { %1722 = vmatprep.subr.mxu0 %v4654_v33  ;;  %3301 = vmatprep.subr.mxu1 %v4654_v33 }
 0x169   : > { %3942 = vxpose.xlu0.b32.cont [8/16] %v3941_v59, 128  ;;  %4054 = vxpose.xlu1.b32.cont [8/16] %v4053_v60, 128 }
 0x16a   : > { %1723 = vmatpush1.msra.mxu0 %v1547_v7  ;;  %3333 = vmatpush1.msra.mxu1 %v1547_v7 }
 0x16b   : > { %1724 = vmatprep.subr.mxu0 %v4654_v33  ;;  %3302 = vmatprep.subr.mxu1 %v4654_v33 }
 0x16c   : > { %1725 = vmatpush1.msra.mxu0 %v1546_v10  ;;  %3334 = vmatpush1.msra.mxu1 %v1546_v10 }
 0x16d   : > { %3944 = vxpose.xlu0.b32.cont [9/16] %v3943_v1, 128  ;;  %4056 = vxpose.xlu1.b32.cont [9/16] %v4055_v3, 128 }
 0x16e   : > { %1726 = vmatprep.subr.mxu0 %v4654_v33  ;;  %3303 = vmatprep.subr.mxu1 %v4654_v33 }
 0x16f   : > { %1727 = vmatpush1.msra.mxu0 %v1545_v14  ;;  %3335 = vmatpush1.msra.mxu1 %v1545_v14 }
 0x170   : > { %1728 = vmatprep.subr.mxu0 %v4654_v33  ;;  %3304 = vmatprep.subr.mxu1 %v4654_v33 }
 0x171   : > { %3946 = vxpose.xlu0.b32.cont [10/16] %v3945_v6, 128  ;;  %4058 = vxpose.xlu1.b32.cont [10/16] %v4057_v11, 128 }
 0x172   : > { %1729 = vmatpush1.msra.mxu0 %v1544_v22  ;;  %3336 = vmatpush1.msra.mxu1 %v1544_v22 }
 0x173   : > { %1730 = vmatprep.subr.mxu0 %v4654_v33  ;;  %3305 = vmatprep.subr.mxu1 %v4654_v33 }
 0x174   : > { %1731 = vmatpush1.msra.mxu0 %v1543_v19  ;;  %3337 = vmatpush1.msra.mxu1 %v1543_v19 }
 0x175   : > { %3948 = vxpose.xlu0.b32.cont [11/16] %v3947_v21, 128  ;;  %4060 = vxpose.xlu1.b32.cont [11/16] %v4059_v18, 128 }
 0x176   : > { %1732 = vmatprep.subr.mxu0 %v4654_v33  ;;  %3306 = vmatprep.subr.mxu1 %v4654_v33 }
 0x177   : > { %1733 = vmatpush1.msra.mxu0 %v1542_v31  ;;  %3338 = vmatpush1.msra.mxu1 %v1542_v31 }
 0x178   : > { %1734 = vmatprep.subr.mxu0 %v4654_v33  ;;  %3307 = vmatprep.subr.mxu1 %v4654_v33 }
 0x179   : > { %3950 = vxpose.xlu0.b32.cont [12/16] %v3949_v62, 128  ;;  %4062 = vxpose.xlu1.b32.cont [12/16] %v4061_v26, 128 }
 0x17a   : > { %1735 = vmatpush2.msra.mxu0 %v1573_v39  ;;  %3339 = vmatpush2.msra.mxu1 %v1573_v39 }
 0x17b   : > { %1736 = vmatprep.subr.mxu0 %v4654_v33  ;;  %3308 = vmatprep.subr.mxu1 %v4654_v33 }
 0x17c   : > { %1737 = vmatpush2.msra.mxu0 %v1572_v41  ;;  %3340 = vmatpush2.msra.mxu1 %v1572_v41 }
 0x17d   : > { %3952 = vxpose.xlu0.b32.cont [13/16] %v3951_v57, 128  ;;  %4064 = vxpose.xlu1.b32.cont [13/16] %v4063_v35, 128 }
 0x17e   : > { %1738 = vmatprep.subr.mxu0 %v4654_v33  ;;  %3309 = vmatprep.subr.mxu1 %v4654_v33 }
 0x17f   : > { %1739 = vmatpush2.msra.mxu0 %v1571_v48  ;;  %3341 = vmatpush2.msra.mxu1 %v1571_v48 }
 0x180   : > { %1740 = vmatprep.subr.mxu0 %v4654_v33  ;;  %3310 = vmatprep.subr.mxu1 %v4654_v33 }
 0x181   : > { %3954 = vxpose.xlu0.b32.cont [14/16] %v3953_v50, 128  ;;  %4066 = vxpose.xlu1.b32.cont [14/16] %v4065_v43, 128 }
 0x182   : > { %1741 = vmatpush2.msra.mxu0 %v1570_v29  ;;  %3342 = vmatpush2.msra.mxu1 %v1570_v29 }
 0x183   : > { %1742 = vmatprep.subr.mxu0 %v4654_v33  ;;  %3311 = vmatprep.subr.mxu1 %v4654_v33 }
 0x184   : > { %1743 = vmatpush2.msra.mxu0 %v1569_v36  ;;  %3343 = vmatpush2.msra.mxu1 %v1569_v36 }
 0x185   : > { %3956 = vxpose.xlu0.b32.cont [15/16] %v3955_v28, 128  ;;  %4068 = vxpose.xlu1.b32.cont [15/16] %v4067_v47, 128 }
 0x186   : > { %1744 = vmatprep.subr.mxu0 %v4654_v33  ;;  %3312 = vmatprep.subr.mxu1 %v4654_v33 }
 0x187   : > { %1745 = vmatpush2.msra.mxu0 %v1568_v17  ;;  %3344 = vmatpush2.msra.mxu1 %v1568_v17 }
 0x188   : > { %1746 = vmatprep.subr.mxu0 %v4654_v33  ;;  %3313 = vmatprep.subr.mxu1 %v4654_v33 }
 0x189   : > { %3958 = vxpose.xlu0.b32.end [16/16] %v3957_v23, 128  ;;  %4070 = vxpose.xlu1.b32.end [16/16] %v4069_v13, 128 }
 0x18a   : > { %1747 = vmatpush2.msra.mxu0 %v1567_v9  ;;  %3345 = vmatpush2.msra.mxu1 %v1567_v9 }
 0x18b   : > { %1748 = vmatprep.subr.mxu0 %v4654_v33  ;;  %3314 = vmatprep.subr.mxu1 %v4654_v33 }
 0x18c   : > { %1749 = vmatpush2.msra.mxu0 %v1566_v15  ;;  %3346 = vmatpush2.msra.mxu1 %v1566_v15 }
 0x18d   : > { %1750 = vmatprep.subr.mxu0 %v4654_v33  ;;  %3315 = vmatprep.subr.mxu1 %v4654_v33 }
 0x18e   : > { %1751 = vmatpush2.msra.mxu0 %v1565_v16  ;;  %3347 = vmatpush2.msra.mxu1 %v1565_v16 }
 0x18f   : > { %1752 = vmatprep.subr.mxu0 %v4654_v33  ;;  %3316 = vmatprep.subr.mxu1 %v4654_v33 }
 0x190   : > { %1753 = vmatpush2.msra.mxu0 %v1564_v53  ;;  %3348 = vmatpush2.msra.mxu1 %v1564_v53 }
 0x191   : > { %1754 = vmatprep.subr.mxu0 %v4654_v33  ;;  %3317 = vmatprep.subr.mxu1 %v4654_v33 }
 0x192   : > { %1755 = vmatpush2.msra.mxu0 %v1563_v12  ;;  %3349 = vmatpush2.msra.mxu1 %v1563_v12 }
 0x193   : > { %1756 = vmatprep.subr.mxu0 %v4654_v33  ;;  %3318 = vmatprep.subr.mxu1 %v4654_v33 }
 0x194   : > { %1757 = vmatpush2.msra.mxu0 %v1562_v5  ;;  %3350 = vmatpush2.msra.mxu1 %v1562_v5 }
 0x195   : > { %1758 = vmatprep.subr.mxu0 %v4654_v33  ;;  %3319 = vmatprep.subr.mxu1 %v4654_v33 }
 0x196   : > { %1759 = vmatpush2.msra.mxu0 %v1561_v4  ;;  %3351 = vmatpush2.msra.mxu1 %v1561_v4 }
 0x197   : > { %1760 = vmatprep.subr.mxu0 %v4654_v33  ;;  %3320 = vmatprep.subr.mxu1 %v4654_v33 }
 0x198   : > { %1761 = vmatpush2.msra.mxu0 %v1560_v45  ;;  %3352 = vmatpush2.msra.mxu1 %v1560_v45 }
 0x199   : > { %1762 = vmatprep.subr.mxu0 %v4654_v33  ;;  %3321 = vmatprep.subr.mxu1 %v4654_v33 }
 0x19a   : > { %1763 = vmatpush2.msra.mxu0 %v1559_v24  ;;  %3353 = vmatpush2.msra.mxu1 %v1559_v24 }
 0x19b   : > { %1764 = vmatprep.subr.mxu0 %v4654_v33  ;;  %3322 = vmatprep.subr.mxu1 %v4654_v33 }
 0x19c   : > { %1765 = vmatpush2.msra.mxu0 %v1558_v27  ;;  %3354 = vmatpush2.msra.mxu1 %v1558_v27 }
 0x1c9   : > { %v3959_v20 = vpop.trf.xlu0  ;;  %v4071_v30 = vpop.trf.xlu1 }
 0x1ca   : > { %v3960_v34 = vunpack.i.l.bf16 %v3959_v20  ;;  %v3963_v25 = vunpack.i.h.bf16 %v3959_v20  ;;  %v4072_v37 = vunpack.i.l.bf16 %v4071_v30  ;;  %v4075_v40 = vunpack.i.h.bf16 %v4071_v30 }
 0x1cc   : > { %1766 = vmatprep.mubr.f32.mxu0 %v3960_v34  ;;  %1846 = vmatprep.mubr.f32.mxu1 %v3963_v25 }
 0x1cd   : > { %v3964_v42 = vpop.trf.xlu0  ;;  %v4076_v46 = vpop.trf.xlu1  ;;  %1767 = vmatmul.mubr.f32.vlgmr.msra.gmra.mxu0 %v4072_v37  ;;  %1847 = vmatmul.mubr.f32.vlgmr.msra.gmra.mxu1 %v4075_v40 }
 0x1ce   : > { %v3965_v32 = vunpack.i.l.bf16 %v3964_v42  ;;  %v3968_v38 = vunpack.i.h.bf16 %v3964_v42  ;;  %v4077_v49 = vunpack.i.l.bf16 %v4076_v46  ;;  %v4080_v52 = vunpack.i.h.bf16 %v4076_v46 }
 0x1d0   : > { %1771 = vmatprep.mubr.f32.mxu0 %v3965_v32  ;;  %1851 = vmatprep.mubr.f32.mxu1 %v3968_v38 }
 0x1d1   : > { %v3969_v33 = vpop.trf.xlu0  ;;  %v4081_v44 = vpop.trf.xlu1  ;;  %1772 = vmatmul.mubr.f32.gmra.mxu0 %v4077_v49  ;;  %1852 = vmatmul.mubr.f32.gmra.mxu1 %v4080_v52 }
 0x1d2   : > { %v3970_v55 = vunpack.i.l.bf16 %v3969_v33  ;;  %v3973_v58 = vunpack.i.h.bf16 %v3969_v33  ;;  %v4082_v51 = vunpack.i.l.bf16 %v4081_v44  ;;  %v4085_v59 = vunpack.i.h.bf16 %v4081_v44 }
 0x1d4   : > { %1776 = vmatprep.mubr.f32.mxu0 %v3970_v55  ;;  %1856 = vmatprep.mubr.f32.mxu1 %v3973_v58 }
 0x1d5   : > { %v3974_v60 = vpop.trf.xlu0  ;;  %v4086_v0 = vpop.trf.xlu1  ;;  %1777 = vmatmul.mubr.f32.gmra.mxu0 %v4082_v51  ;;  %1857 = vmatmul.mubr.f32.gmra.mxu1 %v4085_v59 }
 0x1d6   : > { %v3975_v1 = vunpack.i.l.bf16 %v3974_v60  ;;  %v3978_v3 = vunpack.i.h.bf16 %v3974_v60  ;;  %v4087_v7 = vunpack.i.l.bf16 %v4086_v0  ;;  %v4090_v10 = vunpack.i.h.bf16 %v4086_v0 }
 0x1d8   : > { %1781 = vmatprep.mubr.f32.mxu0 %v3975_v1  ;;  %1861 = vmatprep.mubr.f32.mxu1 %v3978_v3 }
 0x1d9   : > { %v3979_v6 = vpop.trf.xlu0  ;;  %v4091_v11 = vpop.trf.xlu1  ;;  %1782 = vmatmul.mubr.f32.gmra.mxu0 %v4087_v7  ;;  %1862 = vmatmul.mubr.f32.gmra.mxu1 %v4090_v10 }
 0x1da   : > { %v3980_v14 = vunpack.i.l.bf16 %v3979_v6  ;;  %v3983_v21 = vunpack.i.h.bf16 %v3979_v6  ;;  %v4092_v18 = vunpack.i.l.bf16 %v4091_v11  ;;  %v4095_v22 = vunpack.i.h.bf16 %v4091_v11 }
 0x1dc   : > { %1786 = vmatprep.mubr.f32.mxu0 %v3980_v14  ;;  %1866 = vmatprep.mubr.f32.mxu1 %v3983_v21 }
 0x1dd   : > { %v3984_v19 = vpop.trf.xlu0  ;;  %v4096_v62 = vpop.trf.xlu1  ;;  %1787 = vmatmul.mubr.f32.gmra.mxu0 %v4092_v18  ;;  %1867 = vmatmul.mubr.f32.gmra.mxu1 %v4095_v22 }
 0x1de   : > { %v3985_v26 = vunpack.i.l.bf16 %v3984_v19  ;;  %v3988_v31 = vunpack.i.h.bf16 %v3984_v19  ;;  %v4097_v57 = vunpack.i.l.bf16 %v4096_v62  ;;  %v4100_v35 = vunpack.i.h.bf16 %v4096_v62 }
 0x1e0   : > { %1791 = vmatprep.mubr.f32.mxu0 %v3985_v26  ;;  %1871 = vmatprep.mubr.f32.mxu1 %v3988_v31  ;;  %v1510_v26 = vld [vmem:[%s5979_s0] sm:$0xff] }
 0x1e1   : > { %v3989_v39 = vpop.trf.xlu0  ;;  %v4101_v41 = vpop.trf.xlu1  ;;  %1792 = vmatmul.mubr.f32.gmra.mxu0 %v4097_v57  ;;  %1872 = vmatmul.mubr.f32.gmra.mxu1 %v4100_v35  ;;  %v1526_v31 = vld [vmem:[%s5979_s0 + $0x80] sm:$0xff] }
 0x1e2   : > { %v3990_v50 = vunpack.i.l.bf16 %v3989_v39  ;;  %v3993_v63 = vunpack.i.h.bf16 %v3989_v39  ;;  %v4102_v8 = vunpack.i.l.bf16 %v4101_v41  ;;  %v4105_v43 = vunpack.i.h.bf16 %v4101_v41 }
 0x1e4   : > { %1796 = vmatprep.mubr.f32.mxu0 %v3990_v50  ;;  %1876 = vmatprep.mubr.f32.mxu1 %v3993_v63 }
 0x1e5   : > { %v3994_v48 = vpop.trf.xlu0  ;;  %v4106_v28 = vpop.trf.xlu1  ;;  %1797 = vmatmul.mubr.f32.gmra.mxu0 %v4102_v8  ;;  %1877 = vmatmul.mubr.f32.gmra.mxu1 %v4105_v43  ;;  %v1511_v8 = vld [vmem:[%s5979_s0 + $0x8] sm:$0xff] }
 0x1e6   : > { %v3995_v56 = vunpack.i.l.bf16 %v3994_v48  ;;  %v3998_v61 = vunpack.i.h.bf16 %v3994_v48  ;;  %v4107_v47 = vunpack.i.l.bf16 %v4106_v28  ;;  %v4110_v29 = vunpack.i.h.bf16 %v4106_v28  ;;  %v1527_v43 = vld [vmem:[%s5979_s0 + $0x88] sm:$0xff] }
 0x1e8   : > { %1801 = vmatprep.mubr.f32.mxu0 %v3995_v56  ;;  %1881 = vmatprep.mubr.f32.mxu1 %v3998_v61 }
 0x1e9   : > { %v3999_v36 = vpop.trf.xlu0  ;;  %v4111_v23 = vpop.trf.xlu1  ;;  %1802 = vmatmul.mubr.f32.gmra.mxu0 %v4107_v47  ;;  %1882 = vmatmul.mubr.f32.gmra.mxu1 %v4110_v29 }
 0x1ea   : > { %v4000_v2 = vunpack.i.l.bf16 %v3999_v36  ;;  %v4003_v54 = vunpack.i.h.bf16 %v3999_v36  ;;  %v4112_v13 = vunpack.i.l.bf16 %v4111_v23  ;;  %v4115_v17 = vunpack.i.h.bf16 %v4111_v23  ;;  %v1512_v36 = vld [vmem:[%s5979_s0 + $0x10] sm:$0xff] }
 0x1eb   : > { %v1528_v23 = vld [vmem:[%s5979_s0 + $0x90] sm:$0xff] }
 0x1ec   : > { %1806 = vmatprep.mubr.f32.mxu0 %v4000_v2  ;;  %1886 = vmatprep.mubr.f32.mxu1 %v4003_v54 }
 0x1ed   : > { %v4004_v9 = vpop.trf.xlu0  ;;  %v4116_v15 = vpop.trf.xlu1  ;;  %1807 = vmatmul.mubr.f32.gmra.mxu0 %v4112_v13  ;;  %1887 = vmatmul.mubr.f32.gmra.mxu1 %v4115_v17 }
 0x1ee   : > { %v4005_v16 = vunpack.i.l.bf16 %v4004_v9  ;;  %v4008_v53 = vunpack.i.h.bf16 %v4004_v9  ;;  %v4117_v12 = vunpack.i.l.bf16 %v4116_v15  ;;  %v4120_v5 = vunpack.i.h.bf16 %v4116_v15 }
 0x1f0   : > { %1811 = vmatprep.mubr.f32.mxu0 %v4005_v16  ;;  %1891 = vmatprep.mubr.f32.mxu1 %v4008_v53  ;;  %v1513_v16 = vld [vmem:[%s5979_s0 + $0x18] sm:$0xff] }
 0x1f1   : > { %v4009_v4 = vpop.trf.xlu0  ;;  %v4121_v45 = vpop.trf.xlu1  ;;  %1812 = vmatmul.mubr.f32.gmra.mxu0 %v4117_v12  ;;  %1892 = vmatmul.mubr.f32.gmra.mxu1 %v4120_v5  ;;  %v1529_v53 = vld [vmem:[%s5979_s0 + $0x98] sm:$0xff] }
 0x1f2   : > { %v4010_v24 = vunpack.i.l.bf16 %v4009_v4  ;;  %v4013_v27 = vunpack.i.h.bf16 %v4009_v4  ;;  %v4122_v20 = vunpack.i.l.bf16 %v4121_v45  ;;  %v4125_v30 = vunpack.i.h.bf16 %v4121_v45 }
 0x1f4   : > { %1816 = vmatprep.mubr.f32.mxu0 %v4010_v24  ;;  %1896 = vmatprep.mubr.f32.mxu1 %v4013_v27 }
 0x1f5   : > { %v4014_v34 = vpop.trf.xlu0  ;;  %v4126_v25 = vpop.trf.xlu1  ;;  %1817 = vmatmul.mubr.f32.gmra.mxu0 %v4122_v20  ;;  %1897 = vmatmul.mubr.f32.gmra.mxu1 %v4125_v30  ;;  %v1514_v20 = vld [vmem:[%s5979_s0 + $0x20] sm:$0xff] }
 0x1f6   : > { %v4015_v37 = vunpack.i.l.bf16 %v4014_v34  ;;  %v4018_v40 = vunpack.i.h.bf16 %v4014_v34  ;;  %v4127_v42 = vunpack.i.l.bf16 %v4126_v25  ;;  %v4130_v46 = vunpack.i.h.bf16 %v4126_v25  ;;  %v1530_v30 = vld [vmem:[%s5979_s0 + $0xa0] sm:$0xff] }
 0x1f8   : > { %1821 = vmatprep.mubr.f32.mxu0 %v4015_v37  ;;  %1901 = vmatprep.mubr.f32.mxu1 %v4018_v40 }
 0x1f9   : > { %v4019_v32 = vpop.trf.xlu0  ;;  %v4131_v38 = vpop.trf.xlu1  ;;  %1822 = vmatmul.mubr.f32.gmra.mxu0 %v4127_v42  ;;  %1902 = vmatmul.mubr.f32.gmra.mxu1 %v4130_v46 }
 0x1fa   : > { %v4020_v49 = vunpack.i.l.bf16 %v4019_v32  ;;  %v4023_v52 = vunpack.i.h.bf16 %v4019_v32  ;;  %v4132_v33 = vunpack.i.l.bf16 %v4131_v38  ;;  %v4135_v44 = vunpack.i.h.bf16 %v4131_v38  ;;  %v1515_v32 = vld [vmem:[%s5979_s0 + $0x28] sm:$0xff] }
 0x1fb   : > { %v1531_v38 = vld [vmem:[%s5979_s0 + $0xa8] sm:$0xff] }
 0x1fc   : > { %1826 = vmatprep.mubr.f32.mxu0 %v4020_v49  ;;  %1906 = vmatprep.mubr.f32.mxu1 %v4023_v52 }
 0x1fd   : > { %v4024_v55 = vpop.trf.xlu0  ;;  %v4136_v58 = vpop.trf.xlu1  ;;  %1827 = vmatmul.mubr.f32.gmra.mxu0 %v4132_v33  ;;  %1907 = vmatmul.mubr.f32.gmra.mxu1 %v4135_v44 }
 0x1fe   : > { %v4025_v51 = vunpack.i.l.bf16 %v4024_v55  ;;  %v4028_v59 = vunpack.i.h.bf16 %v4024_v55  ;;  %v4137_v60 = vunpack.i.l.bf16 %v4136_v58  ;;  %v4140_v0 = vunpack.i.h.bf16 %v4136_v58 }
 0x200   : > { %1831 = vmatprep.mubr.f32.mxu0 %v4025_v51  ;;  %1911 = vmatprep.mubr.f32.mxu1 %v4028_v59  ;;  %v1516_v51 = vld [vmem:[%s5979_s0 + $0x30] sm:$0xff] }
 0x201   : > { %v4029_v1 = vpop.trf.xlu0  ;;  %v4141_v3 = vpop.trf.xlu1  ;;  %1832 = vmatmul.mubr.f32.gmra.mxu0 %v4137_v60  ;;  %1912 = vmatmul.mubr.f32.gmra.mxu1 %v4140_v0  ;;  %v1532_v59 = vld [vmem:[%s5979_s0 + $0xb0] sm:$0xff] }
 0x202   : > { %v4030_v7 = vunpack.i.l.bf16 %v4029_v1  ;;  %v4033_v10 = vunpack.i.h.bf16 %v4029_v1  ;;  %v4142_v6 = vunpack.i.l.bf16 %v4141_v3  ;;  %v4145_v11 = vunpack.i.h.bf16 %v4141_v3 }
 0x204   : > { %1836 = vmatprep.mubr.f32.mxu0 %v4030_v7  ;;  %1916 = vmatprep.mubr.f32.mxu1 %v4033_v10 }
 0x205   : > { %v4034_v14 = vpop.trf.xlu0  ;;  %v4146_v21 = vpop.trf.xlu1  ;;  %1837 = vmatmul.mubr.f32.gmra.mxu0 %v4142_v6  ;;  %1917 = vmatmul.mubr.f32.gmra.mxu1 %v4145_v11  ;;  %v1517_v6 = vld [vmem:[%s5979_s0 + $0x38] sm:$0xff] }
 0x206   : > { %v4038_v18 = vunpack.i.h.bf16 %v4034_v14  ;;  %v4035_v22 = vunpack.i.l.bf16 %v4034_v14  ;;  %v4150_v19 = vunpack.i.h.bf16 %v4146_v21  ;;  %v4147_v62 = vunpack.i.l.bf16 %v4146_v21  ;;  %v1533_v11 = vld [vmem:[%s5979_s0 + $0xb8] sm:$0xff] }
 0x208   : > { %1841 = vmatprep.mubr.f32.mxu0 %v4035_v22  ;;  %1921 = vmatprep.mubr.f32.mxu1 %v4038_v18 }
 0x209   : > { %1842 = vmatmul.mubr.f32.gmra.mxu0 %v4147_v62  ;;  %1922 = vmatmul.mubr.f32.gmra.mxu1 %v4150_v19 }
 0x28d   : > { %v1768_v57 = vpop.f32.mrf.mxu0  ;;  %v1848_v35 = vpop.f32.mrf.mxu1 }
 0x28e   : > { %v1927_v39 = vadd.f32 %v1768_v57, %v1510_v26  ;;  %v1943_v41 = vadd.f32 %v1848_v35, %v1526_v31  ;;  %v1518_v26 = vld [vmem:[%s5979_s0 + $0x40] sm:$0xff] }
 0x28f   : > { %v1770_v50 = vpop.f32.mrf.mxu0  ;;  %v1850_v63 = vpop.f32.mrf.mxu1  ;;  %v1534_v31 = vld [vmem:[%s5979_s0 + $0xc0] sm:$0xff] }
 0x290   : > { %1959 = vst [vmem:[%s5979_s0] sm:$0xff] %v1927_v39  ;;  %1975 = vst [vmem:[%s5979_s0 + $0x80] sm:$0xff] %v1943_v41 }
 0x291   : > { %v1773_v48 = vpop.f32.mrf.mxu0  ;;  %v1853_v28 = vpop.f32.mrf.mxu1 }
 0x292   : > { %v1928_v56 = vadd.f32 %v1773_v48, %v1511_v8  ;;  %v1944_v61 = vadd.f32 %v1853_v28, %v1527_v43  ;;  %v1519_v8 = vld [vmem:[%s5979_s0 + $0x48] sm:$0xff] }
 0x293   : > { %v1775_v47 = vpop.f32.mrf.mxu0  ;;  %v1855_v29 = vpop.f32.mrf.mxu1  ;;  %v1535_v43 = vld [vmem:[%s5979_s0 + $0xc8] sm:$0xff] }
 0x294   : > { %1960 = vst [vmem:[%s5979_s0 + $0x8] sm:$0xff] %v1928_v56  ;;  %1976 = vst [vmem:[%s5979_s0 + $0x88] sm:$0xff] %v1944_v61 }
 0x295   : > { %v1778_v2 = vpop.f32.mrf.mxu0  ;;  %v1858_v54 = vpop.f32.mrf.mxu1 }
 0x296   : > { %v1929_v13 = vadd.f32 %v1778_v2, %v1512_v36  ;;  %v1945_v17 = vadd.f32 %v1858_v54, %v1528_v23  ;;  %v1520_v36 = vld [vmem:[%s5979_s0 + $0x50] sm:$0xff] }
 0x297   : > { %v1780_v9 = vpop.f32.mrf.mxu0  ;;  %v1860_v15 = vpop.f32.mrf.mxu1  ;;  %v1536_v23 = vld [vmem:[%s5979_s0 + $0xd0] sm:$0xff] }
 0x298   : > { %1961 = vst [vmem:[%s5979_s0 + $0x10] sm:$0xff] %v1929_v13  ;;  %1977 = vst [vmem:[%s5979_s0 + $0x90] sm:$0xff] %v1945_v17 }
 0x299   : > { %v1783_v12 = vpop.f32.mrf.mxu0  ;;  %v1863_v5 = vpop.f32.mrf.mxu1 }
 0x29a   : > { %v1930_v4 = vadd.f32 %v1783_v12, %v1513_v16  ;;  %v1946_v45 = vadd.f32 %v1863_v5, %v1529_v53  ;;  %v1521_v16 = vld [vmem:[%s5979_s0 + $0x58] sm:$0xff] }
 0x29b   : > { %v1785_v24 = vpop.f32.mrf.mxu0  ;;  %v1865_v27 = vpop.f32.mrf.mxu1  ;;  %v1537_v53 = vld [vmem:[%s5979_s0 + $0xd8] sm:$0xff] }
 0x29c   : > { %1962 = vst [vmem:[%s5979_s0 + $0x18] sm:$0xff] %v1930_v4  ;;  %1978 = vst [vmem:[%s5979_s0 + $0x98] sm:$0xff] %v1946_v45 }
 0x29d   : > { %v1788_v34 = vpop.f32.mrf.mxu0  ;;  %v1868_v25 = vpop.f32.mrf.mxu1 }
 0x29e   : > { %v1931_v37 = vadd.f32 %v1788_v34, %v1514_v20  ;;  %v1947_v40 = vadd.f32 %v1868_v25, %v1530_v30  ;;  %v1522_v20 = vld [vmem:[%s5979_s0 + $0x60] sm:$0xff] }
 0x29f   : > { %v1790_v42 = vpop.f32.mrf.mxu0  ;;  %v1870_v46 = vpop.f32.mrf.mxu1  ;;  %v1538_v30 = vld [vmem:[%s5979_s0 + $0xe0] sm:$0xff] }
 0x2a0   : > { %1963 = vst [vmem:[%s5979_s0 + $0x20] sm:$0xff] %v1931_v37  ;;  %1979 = vst [vmem:[%s5979_s0 + $0xa0] sm:$0xff] %v1947_v40 }
 0x2a1   : > { %v1793_v49 = vpop.f32.mrf.mxu0  ;;  %v1873_v52 = vpop.f32.mrf.mxu1 }
 0x2a2   : > { %v1932_v33 = vadd.f32 %v1793_v49, %v1515_v32  ;;  %v1948_v44 = vadd.f32 %v1873_v52, %v1531_v38  ;;  %v1523_v32 = vld [vmem:[%s5979_s0 + $0x68] sm:$0xff] }
 0x2a3   : > { %v1795_v55 = vpop.f32.mrf.mxu0  ;;  %v1875_v58 = vpop.f32.mrf.mxu1  ;;  %v1539_v38 = vld [vmem:[%s5979_s0 + $0xe8] sm:$0xff] }
 0x2a4   : > { %1964 = vst [vmem:[%s5979_s0 + $0x28] sm:$0xff] %v1932_v33  ;;  %1980 = vst [vmem:[%s5979_s0 + $0xa8] sm:$0xff] %v1948_v44 }
 0x2a5   : > { %v1798_v60 = vpop.f32.mrf.mxu0  ;;  %v1878_v0 = vpop.f32.mrf.mxu1 }
 0x2a6   : > { %v1933_v1 = vadd.f32 %v1798_v60, %v1516_v51  ;;  %v1949_v3 = vadd.f32 %v1878_v0, %v1532_v59  ;;  %v1524_v51 = vld [vmem:[%s5979_s0 + $0x70] sm:$0xff] }
 0x2a7   : > { %v1800_v7 = vpop.f32.mrf.mxu0  ;;  %v1880_v10 = vpop.f32.mrf.mxu1  ;;  %v1540_v59 = vld [vmem:[%s5979_s0 + $0xf0] sm:$0xff] }
 0x2a8   : > { %1965 = vst [vmem:[%s5979_s0 + $0x30] sm:$0xff] %v1933_v1  ;;  %1981 = vst [vmem:[%s5979_s0 + $0xb0] sm:$0xff] %v1949_v3 }
 0x2a9   : > { %v1803_v14 = vpop.f32.mrf.mxu0  ;;  %v1883_v21 = vpop.f32.mrf.mxu1 }
 0x2aa   : > { %v1934_v18 = vadd.f32 %v1803_v14, %v1517_v6  ;;  %v1950_v22 = vadd.f32 %v1883_v21, %v1533_v11  ;;  %v1525_v6 = vld [vmem:[%s5979_s0 + $0x78] sm:$0xff] }
 0x2ab   : > { %v1805_v19 = vpop.f32.mrf.mxu0  ;;  %v1885_v62 = vpop.f32.mrf.mxu1  ;;  %v1541_v11 = vld [vmem:[%s5979_s0 + $0xf8] sm:$0xff] }
 0x2ac   : > { %1966 = vst [vmem:[%s5979_s0 + $0x38] sm:$0xff] %v1934_v18  ;;  %1982 = vst [vmem:[%s5979_s0 + $0xb8] sm:$0xff] %v1950_v22 }
 0x2ad   : > { %v1808_v57 = vpop.f32.mrf.mxu0  ;;  %v1888_v35 = vpop.f32.mrf.mxu1 }
 0x2ae   : > { %v1935_v39 = vadd.f32 %v1808_v57, %v1518_v26  ;;  %v1951_v41 = vadd.f32 %v1888_v35, %v1534_v31 }
 0x2af   : > { %v1810_v50 = vpop.f32.mrf.mxu0  ;;  %v1890_v63 = vpop.f32.mrf.mxu1 }
 0x2b0   : > { %1967 = vst [vmem:[%s5979_s0 + $0x40] sm:$0xff] %v1935_v39  ;;  %1983 = vst [vmem:[%s5979_s0 + $0xc0] sm:$0xff] %v1951_v41 }
 0x2b1   : > { %v1813_v48 = vpop.f32.mrf.mxu0  ;;  %v1893_v28 = vpop.f32.mrf.mxu1 }
 0x2b2   : > { %v1936_v56 = vadd.f32 %v1813_v48, %v1519_v8  ;;  %v1952_v61 = vadd.f32 %v1893_v28, %v1535_v43 }
 0x2b3   : > { %v1815_v47 = vpop.f32.mrf.mxu0  ;;  %v1895_v29 = vpop.f32.mrf.mxu1 }
 0x2b4   : > { %1968 = vst [vmem:[%s5979_s0 + $0x48] sm:$0xff] %v1936_v56  ;;  %1984 = vst [vmem:[%s5979_s0 + $0xc8] sm:$0xff] %v1952_v61 }
 0x2b5   : > { %v1818_v2 = vpop.f32.mrf.mxu0  ;;  %v1898_v54 = vpop.f32.mrf.mxu1 }
 0x2b6   : > { %v1937_v13 = vadd.f32 %v1818_v2, %v1520_v36  ;;  %v1953_v17 = vadd.f32 %v1898_v54, %v1536_v23 }
 0x2b7   : > { %v1820_v9 = vpop.f32.mrf.mxu0  ;;  %v1900_v15 = vpop.f32.mrf.mxu1 }
 0x2b8   : > { %1969 = vst [vmem:[%s5979_s0 + $0x50] sm:$0xff] %v1937_v13  ;;  %1985 = vst [vmem:[%s5979_s0 + $0xd0] sm:$0xff] %v1953_v17 }
 0x2b9   : > { %v1823_v12 = vpop.f32.mrf.mxu0  ;;  %v1903_v5 = vpop.f32.mrf.mxu1 }
 0x2ba   : > { %v1938_v4 = vadd.f32 %v1823_v12, %v1521_v16  ;;  %v1954_v45 = vadd.f32 %v1903_v5, %v1537_v53 }
 0x2bb   : > { %v1825_v24 = vpop.f32.mrf.mxu0  ;;  %v1905_v27 = vpop.f32.mrf.mxu1 }
 0x2bc   : > { %1970 = vst [vmem:[%s5979_s0 + $0x58] sm:$0xff] %v1938_v4  ;;  %1986 = vst [vmem:[%s5979_s0 + $0xd8] sm:$0xff] %v1954_v45 }
 0x2bd   : > { %v1828_v34 = vpop.f32.mrf.mxu0  ;;  %v1908_v25 = vpop.f32.mrf.mxu1 }
 0x2be   : > { %v1939_v37 = vadd.f32 %v1828_v34, %v1522_v20  ;;  %v1955_v40 = vadd.f32 %v1908_v25, %v1538_v30 }
 0x2bf   : > { %v1830_v42 = vpop.f32.mrf.mxu0  ;;  %v1910_v46 = vpop.f32.mrf.mxu1 }
 0x2c0   : > { %1971 = vst [vmem:[%s5979_s0 + $0x60] sm:$0xff] %v1939_v37  ;;  %1987 = vst [vmem:[%s5979_s0 + $0xe0] sm:$0xff] %v1955_v40 }
 0x2c1   : > { %v1833_v49 = vpop.f32.mrf.mxu0  ;;  %v1913_v52 = vpop.f32.mrf.mxu1 }
 0x2c2   : > { %v1940_v33 = vadd.f32 %v1833_v49, %v1523_v32  ;;  %v1956_v44 = vadd.f32 %v1913_v52, %v1539_v38 }
 0x2c3   : > { %v1835_v55 = vpop.f32.mrf.mxu0  ;;  %v1915_v58 = vpop.f32.mrf.mxu1 }
 0x2c4   : > { %1972 = vst [vmem:[%s5979_s0 + $0x68] sm:$0xff] %v1940_v33  ;;  %1988 = vst [vmem:[%s5979_s0 + $0xe8] sm:$0xff] %v1956_v44 }
 0x2c5   : > { %v1838_v60 = vpop.f32.mrf.mxu0  ;;  %v1918_v0 = vpop.f32.mrf.mxu1 }
 0x2c6   : > { %v1941_v1 = vadd.f32 %v1838_v60, %v1524_v51  ;;  %v1957_v3 = vadd.f32 %v1918_v0, %v1540_v59 }
 0x2c7   : > { %v1840_v7 = vpop.f32.mrf.mxu0  ;;  %v1920_v10 = vpop.f32.mrf.mxu1 }
 0x2c8   : > { %1973 = vst [vmem:[%s5979_s0 + $0x70] sm:$0xff] %v1941_v1  ;;  %1989 = vst [vmem:[%s5979_s0 + $0xf0] sm:$0xff] %v1957_v3  ;;  %1994 = sbr.rel (%p3118_p3) target bundleno = 975 (0x3cf), region = 134 }
 0x2c9   : > { %v1843_v14 = vpop.f32.mrf.mxu0  ;;  %v1923_v21 = vpop.f32.mrf.mxu1 }
 0x2ca   : > { %v1942_v18 = vadd.f32 %v1843_v14, %v1525_v6  ;;  %v1958_v22 = vadd.f32 %v1923_v21, %v1541_v11 }
 0x2cb   : > { %v1845_v19 = vpop.f32.mrf.mxu0  ;;  %v1925_v62 = vpop.f32.mrf.mxu1 }
 0x2cc   : > { %1974 = vst [vmem:[%s5979_s0 + $0x78] sm:$0xff] %v1942_v18  ;;  %1990 = vst [vmem:[%s5979_s0 + $0xf8] sm:$0xff] %v1958_v22 }
 0x2cd   : > { %v2042_v26 = vld [vmem:[%s6627_s2 + $0x78] sm:$0xff]  ;;  %v2041_v31 = vld [vmem:[%s6627_s2 + $0x70] sm:$0xff]  ;;  %v2040_v57 = vld [vmem:[%s6627_s2 + $0x68] sm:$0xff] }
 0x2ce   : > { %3211 = vmatprep.subr.mxu0 %v2042_v26  ;;  %3355 = vmatprep.subr.mxu1 %v2042_v26  ;;  %v2039_v35 = vld [vmem:[%s6627_s2 + $0x60] sm:$0xff]  ;;  %v2038_v39 = vld [vmem:[%s6627_s2 + $0x58] sm:$0xff]  ;;  %v2037_v41 = vld [vmem:[%s6627_s2 + $0x50] sm:$0xff] }
 0x2cf   : > { %3212 = vmatpush3.msra.mxu0 %v2042_v26  ;;  %3371 = vmatpush3.msra.mxu1 %v2042_v26  ;;  %v2036_v50 = vld [vmem:[%s6627_s2 + $0x48] sm:$0xff]  ;;  %v2035_v63 = vld [vmem:[%s6627_s2 + $0x40] sm:$0xff]  ;;  %v2034_v8 = vld [vmem:[%s6627_s2 + $0x38] sm:$0xff] }
 0x2d0   : > { %3213 = vmatprep.subr.mxu0 %v2041_v31  ;;  %3356 = vmatprep.subr.mxu1 %v2041_v31  ;;  %v2033_v43 = vld [vmem:[%s6627_s2 + $0x30] sm:$0xff]  ;;  %v2032_v48 = vld [vmem:[%s6627_s2 + $0x28] sm:$0xff]  ;;  %v2031_v28 = vld [vmem:[%s6627_s2 + $0x20] sm:$0xff] }
 0x2d1   : > { %3214 = vmatpush3.msra.mxu0 %v2041_v31  ;;  %3372 = vmatpush3.msra.mxu1 %v2041_v31  ;;  %v2030_v56 = vld [vmem:[%s6627_s2 + $0x18] sm:$0xff]  ;;  %v2029_v61 = vld [vmem:[%s6627_s2 + $0x10] sm:$0xff]  ;;  %v2028_v47 = vld [vmem:[%s6627_s2 + $0x8] sm:$0xff] }
 0x2d2   : > { %3215 = vmatprep.subr.mxu0 %v2040_v57  ;;  %3357 = vmatprep.subr.mxu1 %v2040_v57  ;;  %v2027_v29 = vld [vmem:[%s6627_s2] sm:$0xff]  ;;  %v1996_v2 = vld [vmem:[%s5979_s0 + $0x8] sm:$0xff]  ;;  %v1997_v13 = vld [vmem:[%s5979_s0 + $0x10] sm:$0xff] }
 0x2d3   : > { %3216 = vmatpush3.msra.mxu0 %v2040_v57  ;;  %3373 = vmatpush3.msra.mxu1 %v2040_v57  ;;  %v1995_v36 = vld [vmem:[%s5979_s0] sm:$0xff]  ;;  %v2012_v54 = vld [vmem:[%s5979_s0 + $0x88] sm:$0xff]  ;;  %v2013_v17 = vld [vmem:[%s5979_s0 + $0x90] sm:$0xff] }
 0x2d4   : > { %3217 = vmatprep.subr.mxu0 %v2039_v35  ;;  %3358 = vmatprep.subr.mxu1 %v2039_v35  ;;  %v2011_v23 = vld [vmem:[%s5979_s0 + $0x80] sm:$0xff]  ;;  %v1998_v9 = vld [vmem:[%s5979_s0 + $0x18] sm:$0xff]  ;;  %v2000_v12 = vld [vmem:[%s5979_s0 + $0x28] sm:$0xff] }
 0x2d5   : > { %3218 = vmatpush3.msra.mxu0 %v2039_v35  ;;  %3374 = vmatpush3.msra.mxu1 %v2039_v35  ;;  %v2014_v15 = vld [vmem:[%s5979_s0 + $0x98] sm:$0xff]  ;;  %v1999_v16 = vld [vmem:[%s5979_s0 + $0x20] sm:$0xff]  ;;  %v2016_v5 = vld [vmem:[%s5979_s0 + $0xa8] sm:$0xff] }
 0x2d6   : > { %3219 = vmatprep.subr.mxu0 %v2038_v39  ;;  %3359 = vmatprep.subr.mxu1 %v2038_v39  ;;  %v2015_v53 = vld [vmem:[%s5979_s0 + $0xa0] sm:$0xff]  ;;  %v2001_v4 = vld [vmem:[%s5979_s0 + $0x30] sm:$0xff]  ;;  %v2002_v24 = vld [vmem:[%s5979_s0 + $0x38] sm:$0xff] }
 0x2d7   : > { %3220 = vmatpush3.msra.mxu0 %v2038_v39  ;;  %3375 = vmatpush3.msra.mxu1 %v2038_v39  ;;  %v2017_v45 = vld [vmem:[%s5979_s0 + $0xb0] sm:$0xff]  ;;  %v2018_v27 = vld [vmem:[%s5979_s0 + $0xb8] sm:$0xff]  ;;  %v2003_v20 = vld [vmem:[%s5979_s0 + $0x40] sm:$0xff] }
 0x2d8   : > { %3221 = vmatprep.subr.mxu0 %v2037_v41  ;;  %3360 = vmatprep.subr.mxu1 %v2037_v41  ;;  %v2019_v30 = vld [vmem:[%s5979_s0 + $0xc0] sm:$0xff]  ;;  %v2004_v34 = vld [vmem:[%s5979_s0 + $0x48] sm:$0xff]  ;;  %v2005_v37 = vld [vmem:[%s5979_s0 + $0x50] sm:$0xff] }
 0x2d9   : > { %3222 = vmatpush3.msra.mxu0 %v2037_v41  ;;  %3376 = vmatpush3.msra.mxu1 %v2037_v41  ;;  %v2020_v25 = vld [vmem:[%s5979_s0 + $0xc8] sm:$0xff]  ;;  %v2021_v40 = vld [vmem:[%s5979_s0 + $0xd0] sm:$0xff]  ;;  %v2006_v42 = vld [vmem:[%s5979_s0 + $0x58] sm:$0xff] }
 0x2da   : > { %3223 = vmatprep.subr.mxu0 %v2036_v50  ;;  %3361 = vmatprep.subr.mxu1 %v2036_v50  ;;  %v2022_v46 = vld [vmem:[%s5979_s0 + $0xd8] sm:$0xff]  ;;  %v2007_v32 = vld [vmem:[%s5979_s0 + $0x60] sm:$0xff]  ;;  %v2008_v49 = vld [vmem:[%s5979_s0 + $0x68] sm:$0xff] }
 0x2db   : > { %3224 = vmatpush3.msra.mxu0 %v2036_v50  ;;  %3377 = vmatpush3.msra.mxu1 %v2036_v50  ;;  %v2023_v38 = vld [vmem:[%s5979_s0 + $0xe0] sm:$0xff]  ;;  %v2024_v52 = vld [vmem:[%s5979_s0 + $0xe8] sm:$0xff]  ;;  %v2009_v33 = vld [vmem:[%s5979_s0 + $0x70] sm:$0xff] }
 0x2dc   : > { %3225 = vmatprep.subr.mxu0 %v2035_v63  ;;  %3362 = vmatprep.subr.mxu1 %v2035_v63  ;;  %v2025_v44 = vld [vmem:[%s5979_s0 + $0xf0] sm:$0xff]  ;;  %v2010_v55 = vld [vmem:[%s5979_s0 + $0x78] sm:$0xff] }
 0x2dd   : > { %3226 = vmatpush3.msra.mxu0 %v2035_v63  ;;  %3378 = vmatpush3.msra.mxu1 %v2035_v63  ;;  %v2026_v58 = vld [vmem:[%s5979_s0 + $0xf8] sm:$0xff] }
 0x2de   : > { %3227 = vmatprep.subr.mxu0 %v2034_v8  ;;  %3363 = vmatprep.subr.mxu1 %v2034_v8 }
 0x2df   : > { %3228 = vmatpush3.msra.mxu0 %v2034_v8  ;;  %3379 = vmatpush3.msra.mxu1 %v2034_v8 }
 0x2e0   : > { %3229 = vmatprep.subr.mxu0 %v2033_v43  ;;  %3364 = vmatprep.subr.mxu1 %v2033_v43 }
 0x2e1   : > { %3230 = vmatpush3.msra.mxu0 %v2033_v43  ;;  %3380 = vmatpush3.msra.mxu1 %v2033_v43 }
 0x2e2   : > { %3231 = vmatprep.subr.mxu0 %v2032_v48  ;;  %3365 = vmatprep.subr.mxu1 %v2032_v48 }
 0x2e3   : > { %3232 = vmatpush3.msra.mxu0 %v2032_v48  ;;  %3381 = vmatpush3.msra.mxu1 %v2032_v48 }
 0x2e4   : > { %3233 = vmatprep.subr.mxu0 %v2031_v28  ;;  %3366 = vmatprep.subr.mxu1 %v2031_v28 }
 0x2e5   : > { %3234 = vmatpush3.msra.mxu0 %v2031_v28  ;;  %3382 = vmatpush3.msra.mxu1 %v2031_v28 }
 0x2e6   : > { %3235 = vmatprep.subr.mxu0 %v2030_v56  ;;  %3367 = vmatprep.subr.mxu1 %v2030_v56 }
 0x2e7   : > { %3236 = vmatpush3.msra.mxu0 %v2030_v56  ;;  %3383 = vmatpush3.msra.mxu1 %v2030_v56 }
 0x2e8   : > { %3237 = vmatprep.subr.mxu0 %v2029_v61  ;;  %3368 = vmatprep.subr.mxu1 %v2029_v61 }
 0x2e9   : > { %3238 = vmatpush3.msra.mxu0 %v2029_v61  ;;  %3384 = vmatpush3.msra.mxu1 %v2029_v61 }
 0x2ea   : > { %3239 = vmatprep.subr.mxu0 %v2028_v47  ;;  %3369 = vmatprep.subr.mxu1 %v2028_v47 }
 0x2eb   : > { %3240 = vmatpush3.msra.mxu0 %v2028_v47  ;;  %3385 = vmatpush3.msra.mxu1 %v2028_v47 }
 0x2ec   : > { %3241 = vmatprep.subr.mxu0 %v2027_v29  ;;  %3370 = vmatprep.subr.mxu1 %v2027_v29 }
 0x2ed   : > { %3242 = vmatpush3.msra.mxu0 %v2027_v29  ;;  %3386 = vmatpush3.msra.mxu1 %v2027_v29 }
 0x2ee   : > { %3243 = vmatprep.mubr.f32.mxu0 %v1995_v36  ;;  %3267 = vmatprep.mubr.f32.mxu1 %v2011_v23 }
 0x2ef   : > { %3244 = vmatmul.mubr.f32.vlgmr.msra.gmra.mxu0 %v1996_v2  ;;  %3268 = vmatmul.mubr.f32.vlgmr.msra.gmra.mxu1 %v2012_v54 }
 0x2f0   : > { %3246 = vmatprep.mubr.f32.mxu0 %v1997_v13  ;;  %3270 = vmatprep.mubr.f32.mxu1 %v2013_v17 }
 0x2f3   : > { %3247 = vmatmul.mubr.f32.gmra.mxu0 %v1998_v9  ;;  %3271 = vmatmul.mubr.f32.gmra.mxu1 %v2014_v15 }
 0x2f4   : > { %3249 = vmatprep.mubr.f32.mxu0 %v1999_v16  ;;  %3273 = vmatprep.mubr.f32.mxu1 %v2015_v53 }
 0x2f7   : > { %3250 = vmatmul.mubr.f32.gmra.mxu0 %v2000_v12  ;;  %3274 = vmatmul.mubr.f32.gmra.mxu1 %v2016_v5 }
 0x2f8   : > { %3252 = vmatprep.mubr.f32.mxu0 %v2001_v4  ;;  %3276 = vmatprep.mubr.f32.mxu1 %v2017_v45 }
 0x2fb   : > { %3253 = vmatmul.mubr.f32.gmra.mxu0 %v2002_v24  ;;  %3277 = vmatmul.mubr.f32.gmra.mxu1 %v2018_v27 }
 0x2fc   : > { %3255 = vmatprep.mubr.f32.mxu0 %v2003_v20  ;;  %3279 = vmatprep.mubr.f32.mxu1 %v2019_v30 }
 0x2ff   : > { %3256 = vmatmul.mubr.f32.gmra.mxu0 %v2004_v34  ;;  %3280 = vmatmul.mubr.f32.gmra.mxu1 %v2020_v25 }
 0x300   : > { %3258 = vmatprep.mubr.f32.mxu0 %v2005_v37  ;;  %3282 = vmatprep.mubr.f32.mxu1 %v2021_v40 }
 0x303   : > { %3259 = vmatmul.mubr.f32.gmra.mxu0 %v2006_v42  ;;  %3283 = vmatmul.mubr.f32.gmra.mxu1 %v2022_v46 }
 0x304   : > { %3261 = vmatprep.mubr.f32.mxu0 %v2007_v32  ;;  %3285 = vmatprep.mubr.f32.mxu1 %v2023_v38 }
 0x307   : > { %3262 = vmatmul.mubr.f32.gmra.mxu0 %v2008_v49  ;;  %3286 = vmatmul.mubr.f32.gmra.mxu1 %v2024_v52 }
 0x308   : > { %3264 = vmatprep.mubr.f32.mxu0 %v2009_v33  ;;  %3288 = vmatprep.mubr.f32.mxu1 %v2025_v44 }
 0x30b   : > { %3265 = vmatmul.mubr.f32.gmra.mxu0 %v2010_v55  ;;  %3289 = vmatmul.mubr.f32.gmra.mxu1 %v2026_v58 }
 0x3af   : > { %v3245_v51 = vpop.f32.mrf.mxu0  ;;  %v3269_v59 = vpop.f32.mrf.mxu1 }
 0x3b0   : > { %2269 = vst [vmem:[%s5982_s29 + $0x8] sm:$0xff] %v3245_v51  ;;  %2285 = vst [vmem:[%s5982_s29 + $0x88] sm:$0xff] %v3269_v59 }
 0x3b1   : > { %v2109_v60 = vpop.f32.mrf.mxu0  ;;  %v2189_v0 = vpop.f32.mrf.mxu1 }
 0x3b2   : > { %2268 = vst [vmem:[%s5982_s29] sm:$0xff] %v2109_v60  ;;  %2284 = vst [vmem:[%s5982_s29 + $0x80] sm:$0xff] %v2189_v0 }
 0x3b3   : > { %v3248_v1 = vpop.f32.mrf.mxu0  ;;  %v3272_v3 = vpop.f32.mrf.mxu1 }
 0x3b4   : > { %2271 = vst [vmem:[%s5982_s29 + $0x18] sm:$0xff] %v3248_v1  ;;  %2287 = vst [vmem:[%s5982_s29 + $0x98] sm:$0xff] %v3272_v3 }
 0x3b5   : > { %v2119_v7 = vpop.f32.mrf.mxu0  ;;  %v2199_v10 = vpop.f32.mrf.mxu1 }
 0x3b6   : > { %2270 = vst [vmem:[%s5982_s29 + $0x10] sm:$0xff] %v2119_v7  ;;  %2286 = vst [vmem:[%s5982_s29 + $0x90] sm:$0xff] %v2199_v10 }
 0x3b7   : > { %v3251_v6 = vpop.f32.mrf.mxu0  ;;  %v3275_v11 = vpop.f32.mrf.mxu1 }
 0x3b8   : > { %2273 = vst [vmem:[%s5982_s29 + $0x28] sm:$0xff] %v3251_v6  ;;  %2289 = vst [vmem:[%s5982_s29 + $0xa8] sm:$0xff] %v3275_v11 }
 0x3b9   : > { %v2129_v14 = vpop.f32.mrf.mxu0  ;;  %v2209_v21 = vpop.f32.mrf.mxu1 }
 0x3ba   : > { %2272 = vst [vmem:[%s5982_s29 + $0x20] sm:$0xff] %v2129_v14  ;;  %2288 = vst [vmem:[%s5982_s29 + $0xa0] sm:$0xff] %v2209_v21 }
 0x3bb   : > { %v3254_v18 = vpop.f32.mrf.mxu0  ;;  %v3278_v22 = vpop.f32.mrf.mxu1 }
 0x3bc   : > { %2275 = vst [vmem:[%s5982_s29 + $0x38] sm:$0xff] %v3254_v18  ;;  %2291 = vst [vmem:[%s5982_s29 + $0xb8] sm:$0xff] %v3278_v22 }
 0x3bd   : > { %v2139_v19 = vpop.f32.mrf.mxu0  ;;  %v2219_v62 = vpop.f32.mrf.mxu1 }
 0x3be   : > { %2274 = vst [vmem:[%s5982_s29 + $0x30] sm:$0xff] %v2139_v19  ;;  %2290 = vst [vmem:[%s5982_s29 + $0xb0] sm:$0xff] %v2219_v62 }
 0x3bf   : > { %v3257_v26 = vpop.f32.mrf.mxu0  ;;  %v3281_v31 = vpop.f32.mrf.mxu1 }
 0x3c0   : > { %2277 = vst [vmem:[%s5982_s29 + $0x48] sm:$0xff] %v3257_v26  ;;  %2293 = vst [vmem:[%s5982_s29 + $0xc8] sm:$0xff] %v3281_v31 }
 0x3c1   : > { %v2149_v57 = vpop.f32.mrf.mxu0  ;;  %v2229_v35 = vpop.f32.mrf.mxu1 }
 0x3c2   : > { %2276 = vst [vmem:[%s5982_s29 + $0x40] sm:$0xff] %v2149_v57  ;;  %2292 = vst [vmem:[%s5982_s29 + $0xc0] sm:$0xff] %v2229_v35 }
 0x3c3   : > { %v3260_v39 = vpop.f32.mrf.mxu0  ;;  %v3284_v41 = vpop.f32.mrf.mxu1 }
 0x3c4   : > { %2279 = vst [vmem:[%s5982_s29 + $0x58] sm:$0xff] %v3260_v39  ;;  %2295 = vst [vmem:[%s5982_s29 + $0xd8] sm:$0xff] %v3284_v41 }
 0x3c5   : > { %v2159_v50 = vpop.f32.mrf.mxu0  ;;  %v2239_v63 = vpop.f32.mrf.mxu1 }
 0x3c6   : > { %2278 = vst [vmem:[%s5982_s29 + $0x50] sm:$0xff] %v2159_v50  ;;  %2294 = vst [vmem:[%s5982_s29 + $0xd0] sm:$0xff] %v2239_v63 }
 0x3c7   : > { %v3263_v8 = vpop.f32.mrf.mxu0  ;;  %v3287_v43 = vpop.f32.mrf.mxu1 }
 0x3c8   : > { %2281 = vst [vmem:[%s5982_s29 + $0x68] sm:$0xff] %v3263_v8  ;;  %2297 = vst [vmem:[%s5982_s29 + $0xe8] sm:$0xff] %v3287_v43 }
 0x3c9   : > { %v2169_v48 = vpop.f32.mrf.mxu0  ;;  %v2249_v28 = vpop.f32.mrf.mxu1 }
 0x3ca   : > { %2280 = vst [vmem:[%s5982_s29 + $0x60] sm:$0xff] %v2169_v48  ;;  %2296 = vst [vmem:[%s5982_s29 + $0xe0] sm:$0xff] %v2249_v28 }
 0x3cb   : > { %v3266_v56 = vpop.f32.mrf.mxu0  ;;  %v3290_v61 = vpop.f32.mrf.mxu1 }
 0x3cc   : > { %2283 = vst [vmem:[%s5982_s29 + $0x78] sm:$0xff] %v3266_v56  ;;  %2299 = vst [vmem:[%s5982_s29 + $0xf8] sm:$0xff] %v3290_v61 }
 0x3cd   : > { %v2179_v47 = vpop.f32.mrf.mxu0  ;;  %v2259_v29 = vpop.f32.mrf.mxu1 }
 0x3ce   : > { %2282 = vst [vmem:[%s5982_s29 + $0x70] sm:$0xff] %v2179_v47  ;;  %2298 = vst [vmem:[%s5982_s29 + $0xf0] sm:$0xff] %v2259_v29 }
 0x3cf PF: > { %s6356_s26 = scalar_lea.sflag [#allocation4], %s996_s6  ;;  %s6360_s15 = scalar_lea.sflag [#allocation7], %s971_s5 }
 0x3d0   : > { %2316 = sbr.rel (!%p4771_p7) target bundleno = 1009 (0x3f1), region = 138  ;;  %s3122_s19 = sshll.u32 (%p4771_p7), %s4501_s25, 5 }
 0x3d1   : > { %s2318_s16 = ssub.s32 (%p4771_p7), 38, %s3122_s19 }
 0x3d2   : > { %p2319_p6 = scmp.lt.s32.totalorder (%p4771_p7), %s2318_s16, 32 }
 0x3d5   : > { %s6759_s16 = smov (!%p2319_p6, %s2318_s16), 32 }
 0x3d6   : > { %s6365_s13 = sshll.u32 %s6759_s16, 7 }
 0x3d7   : > { %s2323_s23 = ssub.s32 4096, %s6365_s13 }
 0x3d8   : > { %2324 = vsyncadd %s6356_s26, %s2323_s23  ;;  %p3124_p8 = scmp.ne.s32.totalorder %s6365_s13, 0  ;;  %s3159_s5 = sshll.u32 %s4501_s25, 12 }
 0x3d9   : > { %s6703_s11 = sld [smem:[#allocation30_spill]]  ;;  %s2329_s18 = sshll.u32 %s5979_s0, 4  ;;  %s6377_s18 = int_to_ptr.vmem [resolvable:$true] %s2329_s18 }
 0x3da   : > { %s4151_s21 = scalar_lea.vmem %s6377_s18, %s6365_s13  ;;  %s4655_s7 = smov [#allocation3]  }
 0x3db   : > { %p4152_p9 = scmp.ne.s32.totalorder %s6377_s18, %s4151_s21  ;;  %s4155_s17 = sshll.u32 %s4655_s7, 4  ;;  %s4156_s17 = int_to_ptr.vmem [resolvable:$false] %s4155_s17 }
 0x3dc   : > { %s4157_s3 = scalar_lea.vmem %s4156_s17, 8192  ;;  %p4158_p0 = scmp.lt.s32.totalorder %s6377_s18, %s4156_s17 }
 0x3dd   : > { %p4153_p10 = pnand %p4152_p9, %p3124_p8  ;;  %p4159_p4 = scmp.lt.s32.totalorder %s4157_s3, %s4151_s21 }
 0x3df   : > { %s6374_s14 = scalar_lea.hbm %s6703_s11, %s3159_s5  ;;  %p4154_p11 = pneg %p4153_p10 }
 0x3e0   : > { %p4160_p1 = por %p4159_p4, %p4158_p0 }
 0x3e2   : > { %p4161_p5 = pnand %p4160_p1, %p4154_p11 }
 0x3e4   : > { %4164 = shalt.err (!%p4161_p5)
}
 0x3e5   : > { %s4165_s0 = scalar_lea.hbm %s6374_s14, %s6365_s13  ;;  %s4169_s19 = scalar_lea.hbm %s6703_s11, 4864 }
 0x3e6   : > { %p4166_p3 = scmp.ne.s32.totalorder %s6374_s14, %s4165_s0  ;;  %p4170_p10 = scmp.lt.s32.totalorder %s6374_s14, %s6703_s11 }
 0x3e7   : > { %p4171_p11 = scmp.lt.s32.totalorder %s4169_s19, %s4165_s0 }
 0x3e8   : > { %p4167_p6 = pnand %p4166_p3, %p3124_p8 }
 0x3e9   : > { %p4172_p0 = por %p4171_p11, %p4170_p10 }
 0x3ea   : > { %p4168_p9 = pneg %p4167_p6 }
 0x3ec   : > { %p4173_p4 = pnand %p4172_p0, %p4168_p9 }
 0x3ee   : > { %4176 = shalt.err (!%p4173_p4)
}
 0x3ef   : > { %s4656_s5 = smov 128   ;;  %s4657_s6 = smov 8  }
 0x3f0   : > { %2335 = dma.vmem_to_hbm [thread:$0]  (%p3124_p8), %s6377_s18, %s6365_s13, %s6374_s14, %s6356_s26, %s4656_s5, %s4656_s5, %s4657_s6  }
 0x3f1 PF: > { %2338 = sbr.rel (!%p4771_p7) target bundleno = 1062 (0x426), region = 142  ;;  %s3128_s8 = sshll.u32 (%p4771_p7), %s4501_s25, 5 }
 0x3f2   : > { %s6704_s17 = sld [smem:[#allocation31_spill]] (%p4771_p7)  ;;  %s2340_s0 = ssub.s32 (%p4771_p7), 38, %s3128_s8 }
 0x3f3   : > { %p2341_p1 = scmp.lt.s32.totalorder (%p4771_p7), %s2340_s0, 32 }
 0x3f6   : > { %s6761_s0 = smov (!%p2341_p1, %s2340_s0), 32 }
 0x3f7   : > { %s3129_s4 = sshll.u32 %s6761_s0, 7 }
 0x3f8   : > { %s6411_s3 = scalar_lea.vmem %s6704_s17, %s3116_s30   ;;  %p3132_p8 = scmp.eq.s32.totalorder %s3129_s4, 0 }
 0x3f9   : > { %s6417_s12 = sshrl.u32 (!%p3132_p8), %s6761_s0, 5 }
 0x3fa   : > { %2349 = sbr.rel (%p3132_p8) target bundleno = 1062 (0x426), region = 146  ;;  %p3133_p7 = scmp.le.s32.totalorder (!%p3132_p8), %s6417_s12, 0 }
 0x3ff   : > { %2962 = sbr.rel (%p3133_p7) target bundleno = 1045 (0x415), region = 400  ;;  %s6705_s26 = smov (!%p3133_p7), %s6411_s3 }
 0x400   : > { %s6706_s30 = smov (!%p3133_p7), %s5982_s29  ;;  %s6426_s13 = smov (!%p3133_p7), 0  }
 0x401   : > { %s6428_s14 = smov (!%p3133_p7), 0  }
 0x404 LB: >> { %v2474_v36 = vld [vmem:[%s4625_s30] sm:$0xff]  ;;  %v2476_v23 = vld [vmem:[%s4625_s30 + $0x8] sm:$0xff]  ;;  %v2478_v2 = vld [vmem:[%s4625_s30 + $0x10] sm:$0xff]  ;;  %s2538_s18 = sadd.s32 1, %s4629_s13  ;;  %s2468_s14 = sadd.s32 1, %s4633_s14   ;;  %s4633_s14 = sphi %s6428_s14, %s2468_s14   ;;  %s4629_s13 = sphi %s6426_s13, %s6709_s13   ;;  %s4625_s30 = sphi %s6706_s30, %s6708_s30   ;;  %s4621_s26 = sphi %s6705_s26, %s6707_s26  }
 0x405   : >> { %2475 = vst [vmem:[%s4621_s26] sm:$0xff] %v2474_v36  ;;  %2477 = vst [vmem:[%s4621_s26 + $0x8] sm:$0xff] %v2476_v23  ;;  %v2480_v54 = vld [vmem:[%s4625_s30 + $0x18] sm:$0xff]  ;;  %v2482_v13 = vld [vmem:[%s4625_s30 + $0x20] sm:$0xff]  ;;  %p2539_p5 = scmp.ge.s32.totalorder %s2538_s18, %s6417_s12  ;;  %p2467_p3 = scmp.ge.s32.totalorder %s2468_s14, %s6417_s12 }
 0x406   : >> { %2479 = vst [vmem:[%s4621_s26 + $0x10] sm:$0xff] %v2478_v2  ;;  %v2484_v17 = vld [vmem:[%s4625_s30 + $0x28] sm:$0xff]  ;;  %2481 = vst [vmem:[%s4621_s26 + $0x18] sm:$0xff] %v2480_v54  ;;  %v2486_v9 = vld [vmem:[%s4625_s30 + $0x30] sm:$0xff] }
 0x407   : >> { %2483 = vst [vmem:[%s4621_s26 + $0x20] sm:$0xff] %v2482_v13  ;;  %2485 = vst [vmem:[%s4621_s26 + $0x28] sm:$0xff] %v2484_v17  ;;  %v2488_v15 = vld [vmem:[%s4625_s30 + $0x38] sm:$0xff]  ;;  %v2490_v16 = vld [vmem:[%s4625_s30 + $0x40] sm:$0xff]  ;;  %s6763_s18 = smov (%p2539_p5, %s2538_s18), 0 }
 0x408   : >> { %2487 = vst [vmem:[%s4621_s26 + $0x30] sm:$0xff] %v2486_v9  ;;  %2489 = vst [vmem:[%s4621_s26 + $0x38] sm:$0xff] %v2488_v15  ;;  %v2492_v53 = vld [vmem:[%s4625_s30 + $0x48] sm:$0xff]  ;;  %v2494_v12 = vld [vmem:[%s4625_s30 + $0x50] sm:$0xff]  ;;  %s3134_s27 = sshll.u32 %s6763_s18, 8  ;;  %s6709_s13 = smov %s6763_s18 }
 0x409   : >> { %2491 = vst [vmem:[%s4621_s26 + $0x40] sm:$0xff] %v2490_v16  ;;  %v2496_v5 = vld [vmem:[%s4625_s30 + $0x58] sm:$0xff]  ;;  %2493 = vst [vmem:[%s4621_s26 + $0x48] sm:$0xff] %v2492_v53  ;;  %v2498_v4 = vld [vmem:[%s4625_s30 + $0x60] sm:$0xff]  ;;  %s6484_s19 = scalar_lea.vmem %s5982_s29, %s3134_s27 [#allocation5]   ;;  %s2544_s16 = scalar_lea.vmem %s6411_s3, %s3134_s27  }
 0x40a   : >> { %2495 = vst [vmem:[%s4621_s26 + $0x50] sm:$0xff] %v2494_v12  ;;  %2497 = vst [vmem:[%s4621_s26 + $0x58] sm:$0xff] %v2496_v5  ;;  %v2500_v45 = vld [vmem:[%s4625_s30 + $0x68] sm:$0xff]  ;;  %v2502_v24 = vld [vmem:[%s4625_s30 + $0x70] sm:$0xff] }
 0x40b   : >> { %2499 = vst [vmem:[%s4621_s26 + $0x60] sm:$0xff] %v2498_v4  ;;  %2501 = vst [vmem:[%s4621_s26 + $0x68] sm:$0xff] %v2500_v45  ;;  %v2504_v27 = vld [vmem:[%s4625_s30 + $0x78] sm:$0xff]  ;;  %v2506_v20 = vld [vmem:[%s4625_s30 + $0x80] sm:$0xff] }
 0x40c   : >> { %2503 = vst [vmem:[%s4621_s26 + $0x70] sm:$0xff] %v2502_v24  ;;  %v2508_v30 = vld [vmem:[%s4625_s30 + $0x88] sm:$0xff]  ;;  %2505 = vst [vmem:[%s4621_s26 + $0x78] sm:$0xff] %v2504_v27  ;;  %v2510_v34 = vld [vmem:[%s4625_s30 + $0x90] sm:$0xff] }
 0x40d   : >> { %2507 = vst [vmem:[%s4621_s26 + $0x80] sm:$0xff] %v2506_v20  ;;  %2509 = vst [vmem:[%s4621_s26 + $0x88] sm:$0xff] %v2508_v30  ;;  %v2512_v25 = vld [vmem:[%s4625_s30 + $0x98] sm:$0xff]  ;;  %v2514_v37 = vld [vmem:[%s4625_s30 + $0xa0] sm:$0xff] }
 0x40e   : >> { %2511 = vst [vmem:[%s4621_s26 + $0x90] sm:$0xff] %v2510_v34  ;;  %2513 = vst [vmem:[%s4621_s26 + $0x98] sm:$0xff] %v2512_v25  ;;  %v2516_v40 = vld [vmem:[%s4625_s30 + $0xa8] sm:$0xff]  ;;  %v2518_v42 = vld [vmem:[%s4625_s30 + $0xb0] sm:$0xff] }
 0x40f   : >> { %2515 = vst [vmem:[%s4621_s26 + $0xa0] sm:$0xff] %v2514_v37  ;;  %v2520_v46 = vld [vmem:[%s4625_s30 + $0xb8] sm:$0xff]  ;;  %2517 = vst [vmem:[%s4621_s26 + $0xa8] sm:$0xff] %v2516_v40  ;;  %v2522_v32 = vld [vmem:[%s4625_s30 + $0xc0] sm:$0xff] }
 0x410   : >> { %2519 = vst [vmem:[%s4621_s26 + $0xb0] sm:$0xff] %v2518_v42  ;;  %2521 = vst [vmem:[%s4621_s26 + $0xb8] sm:$0xff] %v2520_v46  ;;  %v2524_v38 = vld [vmem:[%s4625_s30 + $0xc8] sm:$0xff]  ;;  %v2526_v49 = vld [vmem:[%s4625_s30 + $0xd0] sm:$0xff]  ;;  %2470 = sbr.rel (!%p2467_p3) target bundleno = 1028 (0x404), region = 406 }
 0x411   : >> { %2523 = vst [vmem:[%s4621_s26 + $0xc0] sm:$0xff] %v2522_v32  ;;  %2525 = vst [vmem:[%s4621_s26 + $0xc8] sm:$0xff] %v2524_v38  ;;  %v2528_v52 = vld [vmem:[%s4625_s30 + $0xd8] sm:$0xff]  ;;  %v2530_v33 = vld [vmem:[%s4625_s30 + $0xe0] sm:$0xff] }
 0x412   : >> { %2527 = vst [vmem:[%s4621_s26 + $0xd0] sm:$0xff] %v2526_v49  ;;  %v2532_v44 = vld [vmem:[%s4625_s30 + $0xe8] sm:$0xff]  ;;  %2529 = vst [vmem:[%s4621_s26 + $0xd8] sm:$0xff] %v2528_v52  ;;  %v2534_v55 = vld [vmem:[%s4625_s30 + $0xf0] sm:$0xff] }
 0x413   : >> { %2531 = vst [vmem:[%s4621_s26 + $0xe0] sm:$0xff] %v2530_v33  ;;  %2533 = vst [vmem:[%s4621_s26 + $0xe8] sm:$0xff] %v2532_v44  ;;  %v2536_v58 = vld [vmem:[%s4625_s30 + $0xf8] sm:$0xff]  ;;  %s6708_s30 = smov %s6484_s19 }
 0x414   : >> { %2535 = vst [vmem:[%s4621_s26 + $0xf0] sm:$0xff] %v2534_v55  ;;  %2537 = vst [vmem:[%s4621_s26 + $0xf8] sm:$0xff] %v2536_v58  ;;  %s6707_s26 = smov %s2544_s16 }
 0x415 PF: > { %s6525_s23 = sand.u32 31, %s6761_s0   ;;  %s3161_s5 = sshll.u32 %s6417_s12, 8 }
 0x416   : > { %s2549_s6 = scalar_lea.vmem %s5982_s29, %s3161_s5 [#allocation5]   ;;  %s2551_s8 = scalar_lea.vmem %s6411_s3, %s3161_s5  }
 0x417   : > { %p3139_p6 = scmp.le.s32.totalorder %s6525_s23, 0 }
 0x418   : > { %s4635_s21 = smov (!%p3139_p6), %s2551_s8   ;;  %s4639_s7 = smov (!%p3139_p6), %s2549_s6  }
 0x419   : > { %2976 = sbr.rel (%p3139_p6) target bundleno = 1062 (0x426), region = 411  ;;  %s4643_s17 = smov (!%p3139_p6), 0  }
 0x41a   : > { %s4647_s4 = smov (!%p3139_p6), 0  }
 0x41e LB: >> { %v2561_v51 = vld [vmem:[%s4641_s7] sm:$0xff]  ;;  %s2563_s0 = sadd.s32 1, %s4645_s17  ;;  %s2555_s4 = sadd.s32 1, %s4649_s4   ;;  %s4649_s4 = sphi %s4647_s4, %s2555_s4   ;;  %s4645_s17 = sphi %s4643_s17, %s4644_s17   ;;  %s4641_s7 = sphi %s4639_s7, %s2568_s7   ;;  %s4637_s21 = sphi %s4635_s21, %s2569_s21  }
 0x41f   : >> { %2562 = vst [vmem:[%s4637_s21] sm:$0xff] %v2561_v51  ;;  %p2564_p9 = scmp.ge.s32.totalorder %s2563_s0, %s6525_s23  ;;  %p2554_p10 = scmp.ge.s32.totalorder %s2555_s4, %s6525_s23 }
 0x421   : >> { %s6765_s0 = smov (%p2564_p9, %s2563_s0), 0  ;;  %2557 = sbr.rel (!%p2554_p10) target bundleno = 1054 (0x41e), region = 417 }
 0x422   : >> { %s3140_s29 = sshll.u32 %s6765_s0, 3  ;;  %s4644_s17 = smov %s6765_s0  }
 0x423   : >> { %s2568_s7 = scalar_lea.vmem %s2549_s6, %s3140_s29 [#allocation5]   ;;  %s2569_s21 = scalar_lea.vmem %s2551_s8, %s3140_s29  }
 0x426 PF: > { %2575 = sbr.rel (!%p4792_p13) target bundleno = 1099 (0x44b), region = 194  ;;  %s3143_s12 = sshll.u32 (%p4792_p13), %s4501_s25, 1 }
 0x427   : > { %s2578_s26 = ssub.s32 (%p4792_p13), 38, %s5327_s10  ;;  %s2582_s30 = ssub.s32 (%p4792_p13), 3, %s3143_s12 }
 0x428   : > { %p2579_p11 = scmp.lt.s32.totalorder (%p4792_p13), %s2578_s26, 32  ;;  %p2583_p0 = scmp.lt.s32.totalorder (%p4792_p13), %s2582_s30, 2 }
 0x42b   : > { %s6767_s26 = smov (!%p2579_p11, %s2578_s26), 32  ;;  %s6769_s30 = smov (!%p2583_p0, %s2582_s30), 2 }
 0x42c   : > { %s3144_s13 = sshll.u32 %s6767_s26, 7 }
 0x42d   : > { %s6540_s14 = smul.u32 %s3144_s13, %s6769_s30 }
 0x42f   : > { %s2587_s18 = ssub.s32 8192, %s6540_s14 }
 0x430   : > { %2588 = vsyncadd %s6360_s15, %s2587_s18  ;;  %p3145_p13 = scmp.ne.s32.totalorder %s6540_s14, 0  ;;  %s3388_s25 = smul.u32 96, %s4497_s24 }
 0x431   : > { %s3148_s10 = sshll.u32 %s6769_s30, 3  ;;  %s2596_s27 = sshll.u32 %s5372_s9, 4  ;;  %s6550_s27 = int_to_ptr.vmem [resolvable:$true] %s2596_s27 }
 0x432   : > { %s2591_s19 = sadd.s32 %s3388_s25, %s3143_s12  ;;  %s2595_s16 = smul.u32 %s3148_s10, %s6767_s26 }
 0x433   : > { %s3147_s23 = sshll.u32 %s2591_s19, 7  ;;  %s6711_s8 = sld [smem:[#allocation32_spill]] }
 0x434   : > { %s6557_s7 = sshll.u32 %s2595_s16, 4  ;;  %s4658_s9 = smov [#allocation6]  }
 0x435   : > { %s4177_s24 = scalar_lea.vmem %s6550_s27, %s6557_s7  ;;  %s4181_s17 = sshll.u32 %s4658_s9, 4  ;;  %s4182_s17 = int_to_ptr.vmem [resolvable:$false] %s4181_s17 }
 0x436   : > { %p4178_p4 = scmp.ne.s32.totalorder %s6550_s27, %s4177_s24  ;;  %s4183_s4 = scalar_lea.vmem %s4182_s17, 16384 }
 0x437   : > { %p4184_p7 = scmp.lt.s32.totalorder %s6550_s27, %s4182_s17  ;;  %p4185_p5 = scmp.lt.s32.totalorder %s4183_s4, %s4177_s24 }
 0x438   : > { %p4179_p1 = pnand %p4178_p4, %p3145_p13 }
 0x439   : > { %s6555_s21 = scalar_lea.hbm %s6711_s8, %s3147_s23  ;;  %p4186_p3 = por %p4185_p5, %p4184_p7 }
 0x43a   : > { %p4180_p8 = pneg %p4179_p1 }
 0x43c   : > { %p4187_p6 = pnand %p4186_p3, %p4180_p8 }
 0x43e   : > { %4190 = shalt.err (!%p4187_p6)
}
 0x43f   : > { %s4191_s0 = scalar_lea.hbm %s6555_s21, %s6557_s7  ;;  %s4195_s12 = scalar_lea.hbm %s6711_s8, 14592 }
 0x440   : > { %p4192_p9 = scmp.ne.s32.totalorder %s6555_s21, %s4191_s0  ;;  %p4196_p0 = scmp.lt.s32.totalorder %s6555_s21, %s6711_s8 }
 0x441   : > { %p4197_p4 = scmp.lt.s32.totalorder %s4195_s12, %s4191_s0 }
 0x442   : > { %p4193_p10 = pnand %p4192_p9, %p3145_p13 }
 0x443   : > { %p4198_p1 = por %p4197_p4, %p4196_p0 }
 0x444   : > { %p4194_p11 = pneg %p4193_p10 }
 0x446   : > { %p4199_p8 = pnand %p4198_p1, %p4194_p11 }
 0x448   : > { %4202 = shalt.err (!%p4199_p8)
}
 0x449   : > { %s4659_s18 = smov 256   ;;  %s4660_s25 = smov 384  }
 0x44a   : > { %2602 = dma.vmem_to_hbm [thread:$0]  (%p3145_p13), %s6550_s27, %s6557_s7, %s6555_s21, %s6360_s15, %s4659_s18, %s4660_s25, %s3148_s10  }
 0x44b PF: > { %s6712_s19 = sld [smem:[#allocation11_spill]]  ;;  %p3398_p7 = scmp.ge.s32.totalorder %s4513_s28, 2 }
 0x44d   : > { %p3392_p5 = pnand %p3398_p7, %p4779_p12 }
 0x44f   : > { %p3393_p3 = pneg %p3392_p5 }
 0x451   : > { %s2611_s23 = sand.u32 1, %s6712_s19  }
 0x452   : > { %s2612_s5 = scalar_lea.sflag [#allocation4], %s2611_s23 }
 0x453   : > { %4464 = dma.done.wait (%p3393_p3), %s2612_s5, 4096  }
 0x454   : > { %4466 = vsyncadd (%p3393_p3), %s2612_s5, 4294963200  ;;  %s6714_s6 = sld [smem:[#allocation10_spill]]  ;;  %p3395_p6 = pnand %p3398_p7, %p4798_p2 }
 0x456   : > { %p3396_p9 = pneg %p3395_p6 }
 0x45a   : > { %s2627_s9 = sand.u32 1, %s6714_s6  }
 0x45b   : > { %s2628_s15 = scalar_lea.sflag [#allocation7], %s2627_s9 }
 0x45c   : > { %4468 = dma.done.wait (%p3396_p9), %s2628_s15, 8192  }
 0x45d   : > { %4470 = vsyncadd (%p3396_p9), %s2628_s15, 4294959104  ;;  %s22_s28 = sadd.s32 1, %s4513_s28   ;;  %s6716_s30 = sld [smem:[#allocation12_spill]] }
 0x45e   : > { %p19_p13 = scmp.ge.s32.totalorder %s22_s28, 6   ;;  %s6717_s21 = sld [smem:[#allocation19_spill]] }
 0x45f   : > { %s6718_s14 = sld [smem:[#allocation13_spill]]  ;;  %s6724_s18 = smov %s4489_s22 }
 0x460   : > { %s6719_s23 = sld [smem:[#allocation20_spill]]  ;;  %s6725_s19 = smov %s4481_s20 }
 0x461   : > { %s6720_s24 = sld [smem:[#allocation14_spill]]  ;;  %21 = sbr.rel (!%p19_p13) target bundleno = 14 (0xe), region = 428 }
 0x462   : > { %s6721_s25 = sld [smem:[#allocation15_spill]] }
 0x463   : > { %s6722_s26 = sld [smem:[#allocation16_spill]]  ;;  %s6726_s20 = smov %s6716_s30 }
 0x464   : > { %s6723_s27 = sld [smem:[#allocation17_spill]] }
 0x465   : > { %s6727_s22 = smov %s6718_s14 }
 0x466   :  { %2633 = vsyncpa [#allocation4], 1 }
 0x467   :  { %2635 = vsyncpa [#allocation4 + $0x1], 1 }
 0x468   :  { %2636 = vsyncpa [#allocation7], 1 }
 0x469   :  { %2638 = vsyncpa [#allocation7 + $0x1], 1 }

</bundles_post_ra>
